<compile_context>
chip_gen: v6e
topology: v6e:2x2x1
jax: 0.10.0
libtpu: 0.0.40
codegen_flags: <defaults>
</compile_context>

<pallas_src>
import jax
import jax.numpy as jnp
from jax.experimental import pallas as pl
from jax.experimental.pallas import tpu as pltpu

EPS = 1e-5
MATMUL_DTYPE = jnp.bfloat16  # MXU input dtype (accumulation is f32)


def _channel_stats(x4):
    """Per-channel (last axis) mean / biased variance of a 4-D NHWC value."""
    cnt = x4.shape[0] * x4.shape[1] * x4.shape[2]
    s = jnp.sum(x4, axis=0, keepdims=True)
    s = jnp.sum(s, axis=1, keepdims=True)
    s = jnp.sum(s, axis=2, keepdims=True)          # (1,1,1,C)
    mean = s / cnt
    d = x4 - mean
    v = jnp.sum(d * d, axis=0, keepdims=True)
    v = jnp.sum(v, axis=1, keepdims=True)
    v = jnp.sum(v, axis=2, keepdims=True)
    var = v / cnt                                   # biased var (training mode)
    return mean[0, 0], var[0, 0]                    # (1, C), (1, C)


def _tile_taps(v):
    """Repeat a (1, C) lane vector 9x along the lane axis -> (1, 9*C)."""
    return jnp.concatenate([v] * 9, axis=1)


def downconv_kernel(x00_ref, x01_ref, x10_ref, x11_ref,
                    g0_ref, b0_ref, w1t_ref, c1b_ref,
                    g1_ref, b1g_ref, w2t_ref, c2b_ref,
                    out_ref, p1_ref, p2_ref):
    N, Hp, Wp, Cin = x00_ref.shape
    Cout = w1t_ref.shape[0]
    H1, W1 = Hp - 2, Wp - 2
    H2, W2 = H1 - 2, W1 - 2
    M1 = N * H1 * W1

    # ---- MaxPool2d(2,2): elementwise max of the four window phases ----------
    pooled = jnp.maximum(jnp.maximum(x00_ref[...], x01_ref[...]),
                         jnp.maximum(x10_ref[...], x11_ref[...]))  # (N,Hp,Wp,Cin)

    # ---- BatchNorm2d(Cin): stats only; scale/shift folded into conv1 --------
    mean0, var0 = _channel_stats(pooled)                 # (1, Cin) each, f32
    s0 = g0_ref[...] * jax.lax.rsqrt(var0 + EPS)         # (1, Cin)
    t0 = b0_ref[...] - mean0 * s0                        # (1, Cin)
    s0_taps = _tile_taps(s0)                             # (1, 9*Cin)
    t0_taps = _tile_taps(t0)

    # Folded conv1 weight / bias (weights arrive pre-flattened as (Cout, 9*Cin)
    # so the BN scale fold is a plain lane-broadcast multiply, hoisted once).
    w1t = w1t_ref[...]
    w1e = (w1t * s0_taps).astype(MATMUL_DTYPE)                            # (Cout, 9*Cin)
    b1e = c1b_ref[...] + jnp.einsum('ik,ck->ic', t0_taps, w1t,
                                    preferred_element_type=jnp.float32)   # (1, Cout)

    # ---- im2col for conv1: one (W1, 9*Cin) strip + one store per output row -
    for n in range(N):
        for h in range(H1):
            pieces = []
            for dy in range(3):
                row = pooled[n, h + dy]                  # (Wp, Cin)
                for dx in range(3):
                    pieces.append(row[dx:dx + W1, :])
            r0 = (n * H1 + h) * W1
            p1_ref[r0:r0 + W1, :] = jnp.concatenate(pieces, axis=1).astype(p1_ref.dtype)

    # ---- Conv1 + bias + ReLU as a single (M1, 9*Cin) x (Cout, 9*Cin)^T matmul
    a1 = jnp.maximum(
        jnp.einsum('mk,ck->mc', p1_ref[...], w1e,
                   preferred_element_type=jnp.float32) + b1e, 0.0)        # (M1, Cout) f32

    # ---- BatchNorm2d(Cout): stats only; folded into conv2 -------------------
    mean1 = jnp.sum(a1, axis=0, keepdims=True) / M1                       # (1, Cout)
    d1 = a1 - mean1
    var1 = jnp.sum(d1 * d1, axis=0, keepdims=True) / M1
    s1 = g1_ref[...] * jax.lax.rsqrt(var1 + EPS)
    t1 = b1g_ref[...] - mean1 * s1
    s1_taps = _tile_taps(s1)                                              # (1, 9*Cout)
    t1_taps = _tile_taps(t1)

    w2t = w2t_ref[...]
    w2e = (w2t * s1_taps).astype(MATMUL_DTYPE)                            # (Cout, 9*Cout)
    b2e = c2b_ref[...] + jnp.einsum('ik,ck->ic', t1_taps, w2t,
                                    preferred_element_type=jnp.float32)   # (1, Cout)

    # ---- im2col for conv2 straight out of the flat (M1, Cout) a1 value ------
    for n in range(N):
        for h in range(H2):
            pieces = []
            for dy in range(3):
                base = (n * H1 + h + dy) * W1
                for dx in range(3):
                    pieces.append(a1[base + dx:base + dx + W2, :])
            r0 = (n * H2 + h) * W2
            p2_ref[r0:r0 + W2, :] = jnp.concatenate(pieces, axis=1).astype(p2_ref.dtype)

    # ---- Conv2 + bias + ReLU; one lane-oriented store of the whole output ---
    out = jnp.maximum(
        jnp.einsum('mk,ck->mc', p2_ref[...], w2e,
                   preferred_element_type=jnp.float32) + b2e, 0.0)        # (M2, Cout)
    out_ref[...] = out.astype(out_ref.dtype)


def downconv_forward(x_nchw, params):
    """x_nchw: (N, Cin, H, W) float32 -> (N, Cout, H//2-4, W//2-4) float32."""
    x = jnp.transpose(x_nchw, (0, 2, 3, 1)).astype(jnp.float32)   # NCHW -> NHWC
    N, H, W, Cin = x.shape
    assert H % 2 == 0 and W % 2 == 0
    Cout = params["w1"].shape[-1]
    Hp, Wp = H // 2, W // 2
    H1, W1 = Hp - 2, Wp - 2
    H2, W2 = H1 - 2, W1 - 2
    M1, M2 = N * H1 * W1, N * H2 * W2

    # Four phases of the 2x2 / stride-2 pooling window (wrapper-side layout
    # plumbing; the max itself happens inside the kernel).
    x00 = x[:, 0::2, 0::2, :]
    x01 = x[:, 0::2, 1::2, :]
    x10 = x[:, 1::2, 0::2, :]
    x11 = x[:, 1::2, 1::2, :]

    # Conv weights pre-flattened as (Cout, 9*Cin) so the in-kernel BN fold is a
    # lane-broadcast multiply and the matmul contracts over the last axis.
    w1t = jnp.transpose(params["w1"], (3, 0, 1, 2)).reshape(Cout, 9 * Cin)
    w2t = jnp.transpose(params["w2"], (3, 0, 1, 2)).reshape(Cout, 9 * Cout)

    args = (
        x00, x01, x10, x11,
        params["bn0_gamma"].reshape(1, Cin).astype(jnp.float32),
        params["bn0_beta"].reshape(1, Cin).astype(jnp.float32),
        w1t.astype(jnp.float32),
        params["b1"].reshape(1, Cout).astype(jnp.float32),
        params["bn1_gamma"].reshape(1, Cout).astype(jnp.float32),
        params["bn1_beta"].reshape(1, Cout).astype(jnp.float32),
        w2t.astype(jnp.float32),
        params["b2"].reshape(1, Cout).astype(jnp.float32),
    )

    out_flat = pl.pallas_call(
        downconv_kernel,
        out_shape=jax.ShapeDtypeStruct((M2, Cout), jnp.float32),
        in_specs=[pl.BlockSpec(memory_space=pltpu.MemorySpace.VMEM)] * len(args),
        out_specs=pl.BlockSpec(memory_space=pltpu.MemorySpace.VMEM),
        scratch_shapes=[
            pltpu.VMEM((M1, 9 * Cin), MATMUL_DTYPE),    # conv1 im2col patches
            pltpu.VMEM((M2, 9 * Cout), MATMUL_DTYPE),   # conv2 im2col patches
        ],
        compiler_params=pltpu.CompilerParams(vmem_limit_bytes=64 * 1024 * 1024),
    )(*args)
    # TODO(synk): at production UNet sizes this should be tiled over a grid
    # (batch / output-row blocks with a 2-row halo, "parallel" dimension
    # semantics for v7x's two TensorCores) with a separate BN-statistics pass;
    # at these toy shapes a single VMEM-resident invocation is both correct
    # and fastest.

    out = out_flat.reshape(N, H2, W2, Cout)
    return jnp.transpose(out, (0, 3, 1, 2))              # NHWC -> NCHW


def downconv_ref(x_nchw, p):
    """Pure-JAX f32 reference (XLA ops) for the correctness check."""
    x = jnp.transpose(x_nchw, (0, 2, 3, 1))
    xp = jax.lax.reduce_window(x, -jnp.inf, jax.lax.max,
                               (1, 2, 2, 1), (1, 2, 2, 1), "VALID")

    def bn(a, g, b):
        m = jnp.mean(a, axis=(0, 1, 2), keepdims=True)
        v = jnp.mean((a - m) ** 2, axis=(0, 1, 2), keepdims=True)
        return (a - m) * jax.lax.rsqrt(v + EPS) * g.reshape(1, 1, 1, -1) + b.reshape(1, 1, 1, -1)

    def conv_relu(a, w, b):
        y = jax.lax.conv_general_dilated(
            a, w, (1, 1), "VALID", dimension_numbers=("NHWC", "HWIO", "NHWC"))
        return jax.nn.relu(y + b.reshape(1, 1, 1, -1))

    xp = bn(xp, p["bn0_gamma"], p["bn0_beta"])
    a1 = conv_relu(xp, p["w1"], p["b1"])
    a1 = bn(a1, p["bn1_gamma"], p["bn1_beta"])
    out = conv_relu(a1, p["w2"], p["b2"])
    return jnp.transpose(out, (0, 3, 1, 2))


if __name__ == "__main__":
    key = jax.random.PRNGKey(0)
    kx, *ks = jax.random.split(key, 9)

    N, Cin, Cout, H, W = 2, 4, 8, 16, 16
    x = jax.random.normal(kx, (N, Cin, H, W), dtype=jnp.float32)

    # Deterministic synthetic parameters (shapes as in the torch module).
    params = {
        "bn0_gamma": jax.random.uniform(ks[0], (Cin,), minval=0.5, maxval=1.5, dtype=jnp.float32),
        "bn0_beta": 0.1 * jax.random.normal(ks[1], (Cin,), dtype=jnp.float32),
        "w1": 0.3 * jax.random.normal(ks[2], (3, 3, Cin, Cout), dtype=jnp.float32),
        "b1": 0.1 * jax.random.normal(ks[3], (Cout,), dtype=jnp.float32),
        "bn1_gamma": jax.random.uniform(ks[4], (Cout,), minval=0.5, maxval=1.5, dtype=jnp.float32),
        "bn1_beta": 0.1 * jax.random.normal(ks[5], (Cout,), dtype=jnp.float32),
        "w2": 0.3 * jax.random.normal(ks[6], (3, 3, Cout, Cout), dtype=jnp.float32),
        "b2": 0.1 * jax.random.normal(ks[7], (Cout,), dtype=jnp.float32),
    }
    # TODO(synk): BatchNorm running-stat (momentum) updates are training-time
    # bookkeeping, not part of the returned forward value; they are not modeled.

    out = jax.block_until_ready(downconv_forward(x, params))
    ref = jax.block_until_ready(downconv_ref(x, params))

    assert out.shape == (N, Cout, H // 2 - 4, W // 2 - 4), out.shape
    err = jnp.abs(out - ref)
    # Tolerances account for bf16 MXU inputs (f32 accumulation) vs. the pure
    # f32 reference; semantic bugs (wrong BN stats / bias / fold) would produce
    # errors at least an order of magnitude larger.
    assert float(jnp.max(err)) < 8e-2, float(jnp.max(err))
    assert float(jnp.mean(err)) < 2e-2, float(jnp.mean(err))

    print("KERNEL_OK")
</pallas_src>

<mosaic_0001>
module attributes {stable_mosaic.version = 11 : i64} {
  func.func @downconv_kernel(%arg0: memref<2x8x8x4xf32, #tpu.memory_space<vmem>>, %arg1: memref<2x8x8x4xf32, #tpu.memory_space<vmem>>, %arg2: memref<2x8x8x4xf32, #tpu.memory_space<vmem>>, %arg3: memref<2x8x8x4xf32, #tpu.memory_space<vmem>>, %arg4: memref<1x4xf32, #tpu.memory_space<vmem>>, %arg5: memref<1x4xf32, #tpu.memory_space<vmem>>, %arg6: memref<8x36xf32, #tpu.memory_space<vmem>>, %arg7: memref<1x8xf32, #tpu.memory_space<vmem>>, %arg8: memref<1x8xf32, #tpu.memory_space<vmem>>, %arg9: memref<1x8xf32, #tpu.memory_space<vmem>>, %arg10: memref<8x72xf32, #tpu.memory_space<vmem>>, %arg11: memref<1x8xf32, #tpu.memory_space<vmem>>, %arg12: memref<32x8xf32, #tpu.memory_space<vmem>>, %arg13: memref<72x36xbf16, #tpu.memory_space<vmem>>, %arg14: memref<32x72xbf16, #tpu.memory_space<vmem>>) attributes {dimension_semantics = [], scalar_prefetch = 0 : i64, scratch_operands = 2 : i64, tpu.core_type = #tpu.core_type<tc>} {
    %c0 = arith.constant 0 : index
    %c0_0 = arith.constant 0 : index
    %c0_1 = arith.constant 0 : index
    %c0_2 = arith.constant 0 : index
    %0 = vector.load %arg0[%c0, %c0_0, %c0_1, %c0_2] : memref<2x8x8x4xf32, #tpu.memory_space<vmem>>, vector<2x8x8x4xf32>
    %c0_3 = arith.constant 0 : index
    %c0_4 = arith.constant 0 : index
    %c0_5 = arith.constant 0 : index
    %c0_6 = arith.constant 0 : index
    %1 = vector.load %arg1[%c0_3, %c0_4, %c0_5, %c0_6] : memref<2x8x8x4xf32, #tpu.memory_space<vmem>>, vector<2x8x8x4xf32>
    %2 = arith.maximumf %0, %1 : vector<2x8x8x4xf32>
    %c0_7 = arith.constant 0 : index
    %c0_8 = arith.constant 0 : index
    %c0_9 = arith.constant 0 : index
    %c0_10 = arith.constant 0 : index
    %3 = vector.load %arg2[%c0_7, %c0_8, %c0_9, %c0_10] : memref<2x8x8x4xf32, #tpu.memory_space<vmem>>, vector<2x8x8x4xf32>
    %c0_11 = arith.constant 0 : index
    %c0_12 = arith.constant 0 : index
    %c0_13 = arith.constant 0 : index
    %c0_14 = arith.constant 0 : index
    %4 = vector.load %arg3[%c0_11, %c0_12, %c0_13, %c0_14] : memref<2x8x8x4xf32, #tpu.memory_space<vmem>>, vector<2x8x8x4xf32>
    %5 = arith.maximumf %3, %4 : vector<2x8x8x4xf32>
    %6 = arith.maximumf %2, %5 : vector<2x8x8x4xf32>
    %cst = arith.constant dense<0.000000e+00> : vector<8x8x4xf32>
    %7 = vector.multi_reduction <add>, %6, %cst [0] : vector<2x8x8x4xf32> to vector<8x8x4xf32>
    %8 = vector.shape_cast %7 : vector<8x8x4xf32> to vector<1x8x8x4xf32>
    %cst_15 = arith.constant dense<0.000000e+00> : vector<1x8x4xf32>
    %9 = vector.multi_reduction <add>, %8, %cst_15 [1] : vector<1x8x8x4xf32> to vector<1x8x4xf32>
    %10 = vector.shape_cast %9 : vector<1x8x4xf32> to vector<1x1x8x4xf32>
    %cst_16 = arith.constant dense<0.000000e+00> : vector<1x1x4xf32>
    %11 = vector.multi_reduction <add>, %10, %cst_16 [2] : vector<1x1x8x4xf32> to vector<1x1x4xf32>
    %12 = vector.shape_cast %11 : vector<1x1x4xf32> to vector<1x1x1x4xf32>
    %cst_17 = arith.constant 1.280000e+02 : f32
    %13 = vector.broadcast %cst_17 : f32 to vector<1x1x1x4xf32>
    %14 = arith.divf %12, %13 : vector<1x1x1x4xf32>
    %15 = vector.broadcast %14 : vector<1x1x1x4xf32> to vector<2x8x8x4xf32>
    %16 = arith.subf %6, %15 : vector<2x8x8x4xf32>
    %17 = arith.mulf %16, %16 : vector<2x8x8x4xf32>
    %cst_18 = arith.constant dense<0.000000e+00> : vector<8x8x4xf32>
    %18 = vector.multi_reduction <add>, %17, %cst_18 [0] : vector<2x8x8x4xf32> to vector<8x8x4xf32>
    %19 = vector.shape_cast %18 : vector<8x8x4xf32> to vector<1x8x8x4xf32>
    %cst_19 = arith.constant dense<0.000000e+00> : vector<1x8x4xf32>
    %20 = vector.multi_reduction <add>, %19, %cst_19 [1] : vector<1x8x8x4xf32> to vector<1x8x4xf32>
    %21 = vector.shape_cast %20 : vector<1x8x4xf32> to vector<1x1x8x4xf32>
    %cst_20 = arith.constant dense<0.000000e+00> : vector<1x1x4xf32>
    %22 = vector.multi_reduction <add>, %21, %cst_20 [2] : vector<1x1x8x4xf32> to vector<1x1x4xf32>
    %23 = vector.shape_cast %22 : vector<1x1x4xf32> to vector<1x1x1x4xf32>
    %cst_21 = arith.constant 1.280000e+02 : f32
    %24 = vector.broadcast %cst_21 : f32 to vector<1x1x1x4xf32>
    %25 = arith.divf %23, %24 : vector<1x1x1x4xf32>
    %26 = vector.shape_cast %14 : vector<1x1x1x4xf32> to vector<1x4xf32>
    %27 = vector.shape_cast %25 : vector<1x1x1x4xf32> to vector<1x4xf32>
    %c0_22 = arith.constant 0 : index
    %c0_23 = arith.constant 0 : index
    %28 = vector.load %arg4[%c0_22, %c0_23] : memref<1x4xf32, #tpu.memory_space<vmem>>, vector<1x4xf32>
    %cst_24 = arith.constant 9.99999974E-6 : f32
    %29 = vector.broadcast %cst_24 : f32 to vector<1x4xf32>
    %30 = arith.addf %27, %29 : vector<1x4xf32>
    %31 = math.rsqrt %30 : vector<1x4xf32>
    %32 = arith.mulf %28, %31 : vector<1x4xf32>
    %c0_25 = arith.constant 0 : index
    %c0_26 = arith.constant 0 : index
    %33 = vector.load %arg5[%c0_25, %c0_26] : memref<1x4xf32, #tpu.memory_space<vmem>>, vector<1x4xf32>
    %34 = arith.mulf %26, %32 : vector<1x4xf32>
    %35 = arith.subf %33, %34 : vector<1x4xf32>
    %36 = tpu.concatenate %32, %32, %32, %32, %32, %32, %32, %32, %32 in 1 : vector<1x4xf32>, vector<1x4xf32>, vector<1x4xf32>, vector<1x4xf32>, vector<1x4xf32>, vector<1x4xf32>, vector<1x4xf32>, vector<1x4xf32>, vector<1x4xf32> -> vector<1x36xf32>
    %37 = tpu.concatenate %35, %35, %35, %35, %35, %35, %35, %35, %35 in 1 : vector<1x4xf32>, vector<1x4xf32>, vector<1x4xf32>, vector<1x4xf32>, vector<1x4xf32>, vector<1x4xf32>, vector<1x4xf32>, vector<1x4xf32>, vector<1x4xf32> -> vector<1x36xf32>
    %c0_27 = arith.constant 0 : index
    %c0_28 = arith.constant 0 : index
    %38 = vector.load %arg6[%c0_27, %c0_28] : memref<8x36xf32, #tpu.memory_space<vmem>>, vector<8x36xf32>
    %39 = vector.broadcast %36 : vector<1x36xf32> to vector<8x36xf32>
    %40 = arith.mulf %38, %39 : vector<8x36xf32>
    %41 = arith.truncf %40 : vector<8x36xf32> to vector<8x36xbf16>
    %c0_29 = arith.constant 0 : index
    %c0_30 = arith.constant 0 : index
    %42 = vector.load %arg7[%c0_29, %c0_30] : memref<1x8xf32, #tpu.memory_space<vmem>>, vector<1x8xf32>
    "tpu.trace_start"() <{level = 10 : i32, message = "ik,ck->ic"}> : () -> ()
    %cst_31 = arith.constant dense<0.000000e+00> : vector<1x8xf32>
    %43 = tpu.matmul %37, %38, %cst_31 {dimension_numbers = #tpu.dot_dimension_numbers<[1], [1], [0], [0], [0, 0, 1, 0], [], []>} : vector<1x36xf32>, vector<8x36xf32>, vector<1x8xf32> -> vector<1x8xf32>
    "tpu.trace_stop"() : () -> ()
    %44 = arith.addf %42, %43 : vector<1x8xf32>
    %45 = vector.extract_strided_slice %6 {offsets = [0, 0, 0, 0], sizes = [1, 1, 8, 4], strides = [1, 1, 1, 1]} : vector<2x8x8x4xf32> to vector<1x1x8x4xf32>
    %46 = vector.shape_cast %45 : vector<1x1x8x4xf32> to vector<8x4xf32>
    %47 = vector.extract_strided_slice %46 {offsets = [0, 0], sizes = [6, 4], strides = [1, 1]} : vector<8x4xf32> to vector<6x4xf32>
    %48 = vector.extract_strided_slice %46 {offsets = [1, 0], sizes = [6, 4], strides = [1, 1]} : vector<8x4xf32> to vector<6x4xf32>
    %49 = vector.extract_strided_slice %46 {offsets = [2, 0], sizes = [6, 4], strides = [1, 1]} : vector<8x4xf32> to vector<6x4xf32>
    %50 = vector.extract_strided_slice %6 {offsets = [0, 1, 0, 0], sizes = [1, 1, 8, 4], strides = [1, 1, 1, 1]} : vector<2x8x8x4xf32> to vector<1x1x8x4xf32>
    %51 = vector.shape_cast %50 : vector<1x1x8x4xf32> to vector<8x4xf32>
    %52 = vector.extract_strided_slice %51 {offsets = [0, 0], sizes = [6, 4], strides = [1, 1]} : vector<8x4xf32> to vector<6x4xf32>
    %53 = vector.extract_strided_slice %51 {offsets = [1, 0], sizes = [6, 4], strides = [1, 1]} : vector<8x4xf32> to vector<6x4xf32>
    %54 = vector.extract_strided_slice %51 {offsets = [2, 0], sizes = [6, 4], strides = [1, 1]} : vector<8x4xf32> to vector<6x4xf32>
    %55 = vector.extract_strided_slice %6 {offsets = [0, 2, 0, 0], sizes = [1, 1, 8, 4], strides = [1, 1, 1, 1]} : vector<2x8x8x4xf32> to vector<1x1x8x4xf32>
    %56 = vector.shape_cast %55 : vector<1x1x8x4xf32> to vector<8x4xf32>
    %57 = vector.extract_strided_slice %56 {offsets = [0, 0], sizes = [6, 4], strides = [1, 1]} : vector<8x4xf32> to vector<6x4xf32>
    %58 = vector.extract_strided_slice %56 {offsets = [1, 0], sizes = [6, 4], strides = [1, 1]} : vector<8x4xf32> to vector<6x4xf32>
    %59 = vector.extract_strided_slice %56 {offsets = [2, 0], sizes = [6, 4], strides = [1, 1]} : vector<8x4xf32> to vector<6x4xf32>
    %60 = tpu.concatenate %47, %48, %49, %52, %53, %54, %57, %58, %59 in 1 : vector<6x4xf32>, vector<6x4xf32>, vector<6x4xf32>, vector<6x4xf32>, vector<6x4xf32>, vector<6x4xf32>, vector<6x4xf32>, vector<6x4xf32>, vector<6x4xf32> -> vector<6x36xf32>
    %61 = arith.truncf %60 : vector<6x36xf32> to vector<6x36xbf16>
    %c0_32 = arith.constant 0 : index
    %c0_33 = arith.constant 0 : index
    %62 = vector.load %arg13[%c0_32, %c0_33] : memref<72x36xbf16, #tpu.memory_space<vmem>>, vector<6x36xbf16>
    tpu.vector_store %arg13[%c0_32, %c0_33], %61 {strides = array<i32>} : memref<72x36xbf16, #tpu.memory_space<vmem>>, vector<6x36xbf16>,
    %63 = vector.extract_strided_slice %6 {offsets = [0, 1, 0, 0], sizes = [1, 1, 8, 4], strides = [1, 1, 1, 1]} : vector<2x8x8x4xf32> to vector<1x1x8x4xf32>
    %64 = vector.shape_cast %63 : vector<1x1x8x4xf32> to vector<8x4xf32>
    %65 = vector.extract_strided_slice %64 {offsets = [0, 0], sizes = [6, 4], strides = [1, 1]} : vector<8x4xf32> to vector<6x4xf32>
    %66 = vector.extract_strided_slice %64 {offsets = [1, 0], sizes = [6, 4], strides = [1, 1]} : vector<8x4xf32> to vector<6x4xf32>
    %67 = vector.extract_strided_slice %64 {offsets = [2, 0], sizes = [6, 4], strides = [1, 1]} : vector<8x4xf32> to vector<6x4xf32>
    %68 = vector.extract_strided_slice %6 {offsets = [0, 2, 0, 0], sizes = [1, 1, 8, 4], strides = [1, 1, 1, 1]} : vector<2x8x8x4xf32> to vector<1x1x8x4xf32>
    %69 = vector.shape_cast %68 : vector<1x1x8x4xf32> to vector<8x4xf32>
    %70 = vector.extract_strided_slice %69 {offsets = [0, 0], sizes = [6, 4], strides = [1, 1]} : vector<8x4xf32> to vector<6x4xf32>
    %71 = vector.extract_strided_slice %69 {offsets = [1, 0], sizes = [6, 4], strides = [1, 1]} : vector<8x4xf32> to vector<6x4xf32>
    %72 = vector.extract_strided_slice %69 {offsets = [2, 0], sizes = [6, 4], strides = [1, 1]} : vector<8x4xf32> to vector<6x4xf32>
    %73 = vector.extract_strided_slice %6 {offsets = [0, 3, 0, 0], sizes = [1, 1, 8, 4], strides = [1, 1, 1, 1]} : vector<2x8x8x4xf32> to vector<1x1x8x4xf32>
    %74 = vector.shape_cast %73 : vector<1x1x8x4xf32> to vector<8x4xf32>
    %75 = vector.extract_strided_slice %74 {offsets = [0, 0], sizes = [6, 4], strides = [1, 1]} : vector<8x4xf32> to vector<6x4xf32>
    %76 = vector.extract_strided_slice %74 {offsets = [1, 0], sizes = [6, 4], strides = [1, 1]} : vector<8x4xf32> to vector<6x4xf32>
    %77 = vector.extract_strided_slice %74 {offsets = [2, 0], sizes = [6, 4], strides = [1, 1]} : vector<8x4xf32> to vector<6x4xf32>
    %78 = tpu.concatenate %65, %66, %67, %70, %71, %72, %75, %76, %77 in 1 : vector<6x4xf32>, vector<6x4xf32>, vector<6x4xf32>, vector<6x4xf32>, vector<6x4xf32>, vector<6x4xf32>, vector<6x4xf32>, vector<6x4xf32>, vector<6x4xf32> -> vector<6x36xf32>
    %79 = arith.truncf %78 : vector<6x36xf32> to vector<6x36xbf16>
    %c6 = arith.constant 6 : index
    %c0_34 = arith.constant 0 : index
    %80 = vector.load %arg13[%c6, %c0_34] : memref<72x36xbf16, #tpu.memory_space<vmem>>, vector<6x36xbf16>
    tpu.vector_store %arg13[%c6, %c0_34], %79 {strides = array<i32>} : memref<72x36xbf16, #tpu.memory_space<vmem>>, vector<6x36xbf16>,
    %81 = vector.extract_strided_slice %6 {offsets = [0, 2, 0, 0], sizes = [1, 1, 8, 4], strides = [1, 1, 1, 1]} : vector<2x8x8x4xf32> to vector<1x1x8x4xf32>
    %82 = vector.shape_cast %81 : vector<1x1x8x4xf32> to vector<8x4xf32>
    %83 = vector.extract_strided_slice %82 {offsets = [0, 0], sizes = [6, 4], strides = [1, 1]} : vector<8x4xf32> to vector<6x4xf32>
    %84 = vector.extract_strided_slice %82 {offsets = [1, 0], sizes = [6, 4], strides = [1, 1]} : vector<8x4xf32> to vector<6x4xf32>
    %85 = vector.extract_strided_slice %82 {offsets = [2, 0], sizes = [6, 4], strides = [1, 1]} : vector<8x4xf32> to vector<6x4xf32>
    %86 = vector.extract_strided_slice %6 {offsets = [0, 3, 0, 0], sizes = [1, 1, 8, 4], strides = [1, 1, 1, 1]} : vector<2x8x8x4xf32> to vector<1x1x8x4xf32>
    %87 = vector.shape_cast %86 : vector<1x1x8x4xf32> to vector<8x4xf32>
    %88 = vector.extract_strided_slice %87 {offsets = [0, 0], sizes = [6, 4], strides = [1, 1]} : vector<8x4xf32> to vector<6x4xf32>
    %89 = vector.extract_strided_slice %87 {offsets = [1, 0], sizes = [6, 4], strides = [1, 1]} : vector<8x4xf32> to vector<6x4xf32>
    %90 = vector.extract_strided_slice %87 {offsets = [2, 0], sizes = [6, 4], strides = [1, 1]} : vector<8x4xf32> to vector<6x4xf32>
    %91 = vector.extract_strided_slice %6 {offsets = [0, 4, 0, 0], sizes = [1, 1, 8, 4], strides = [1, 1, 1, 1]} : vector<2x8x8x4xf32> to vector<1x1x8x4xf32>
    %92 = vector.shape_cast %91 : vector<1x1x8x4xf32> to vector<8x4xf32>
    %93 = vector.extract_strided_slice %92 {offsets = [0, 0], sizes = [6, 4], strides = [1, 1]} : vector<8x4xf32> to vector<6x4xf32>
    %94 = vector.extract_strided_slice %92 {offsets = [1, 0], sizes = [6, 4], strides = [1, 1]} : vector<8x4xf32> to vector<6x4xf32>
    %95 = vector.extract_strided_slice %92 {offsets = [2, 0], sizes = [6, 4], strides = [1, 1]} : vector<8x4xf32> to vector<6x4xf32>
    %96 = tpu.concatenate %83, %84, %85, %88, %89, %90, %93, %94, %95 in 1 : vector<6x4xf32>, vector<6x4xf32>, vector<6x4xf32>, vector<6x4xf32>, vector<6x4xf32>, vector<6x4xf32>, vector<6x4xf32>, vector<6x4xf32>, vector<6x4xf32> -> vector<6x36xf32>
    %97 = arith.truncf %96 : vector<6x36xf32> to vector<6x36xbf16>
    %c12 = arith.constant 12 : index
    %c0_35 = arith.constant 0 : index
    %98 = vector.load %arg13[%c12, %c0_35] : memref<72x36xbf16, #tpu.memory_space<vmem>>, vector<6x36xbf16>
    tpu.vector_store %arg13[%c12, %c0_35], %97 {strides = array<i32>} : memref<72x36xbf16, #tpu.memory_space<vmem>>, vector<6x36xbf16>,
    %99 = vector.extract_strided_slice %6 {offsets = [0, 3, 0, 0], sizes = [1, 1, 8, 4], strides = [1, 1, 1, 1]} : vector<2x8x8x4xf32> to vector<1x1x8x4xf32>
    %100 = vector.shape_cast %99 : vector<1x1x8x4xf32> to vector<8x4xf32>
    %101 = vector.extract_strided_slice %100 {offsets = [0, 0], sizes = [6, 4], strides = [1, 1]} : vector<8x4xf32> to vector<6x4xf32>
    %102 = vector.extract_strided_slice %100 {offsets = [1, 0], sizes = [6, 4], strides = [1, 1]} : vector<8x4xf32> to vector<6x4xf32>
    %103 = vector.extract_strided_slice %100 {offsets = [2, 0], sizes = [6, 4], strides = [1, 1]} : vector<8x4xf32> to vector<6x4xf32>
    %104 = vector.extract_strided_slice %6 {offsets = [0, 4, 0, 0], sizes = [1, 1, 8, 4], strides = [1, 1, 1, 1]} : vector<2x8x8x4xf32> to vector<1x1x8x4xf32>
    %105 = vector.shape_cast %104 : vector<1x1x8x4xf32> to vector<8x4xf32>
    %106 = vector.extract_strided_slice %105 {offsets = [0, 0], sizes = [6, 4], strides = [1, 1]} : vector<8x4xf32> to vector<6x4xf32>
    %107 = vector.extract_strided_slice %105 {offsets = [1, 0], sizes = [6, 4], strides = [1, 1]} : vector<8x4xf32> to vector<6x4xf32>
    %108 = vector.extract_strided_slice %105 {offsets = [2, 0], sizes = [6, 4], strides = [1, 1]} : vector<8x4xf32> to vector<6x4xf32>
    %109 = vector.extract_strided_slice %6 {offsets = [0, 5, 0, 0], sizes = [1, 1, 8, 4], strides = [1, 1, 1, 1]} : vector<2x8x8x4xf32> to vector<1x1x8x4xf32>
    %110 = vector.shape_cast %109 : vector<1x1x8x4xf32> to vector<8x4xf32>
    %111 = vector.extract_strided_slice %110 {offsets = [0, 0], sizes = [6, 4], strides = [1, 1]} : vector<8x4xf32> to vector<6x4xf32>
    %112 = vector.extract_strided_slice %110 {offsets = [1, 0], sizes = [6, 4], strides = [1, 1]} : vector<8x4xf32> to vector<6x4xf32>
    %113 = vector.extract_strided_slice %110 {offsets = [2, 0], sizes = [6, 4], strides = [1, 1]} : vector<8x4xf32> to vector<6x4xf32>
    %114 = tpu.concatenate %101, %102, %103, %106, %107, %108, %111, %112, %113 in 1 : vector<6x4xf32>, vector<6x4xf32>, vector<6x4xf32>, vector<6x4xf32>, vector<6x4xf32>, vector<6x4xf32>, vector<6x4xf32>, vector<6x4xf32>, vector<6x4xf32> -> vector<6x36xf32>
    %115 = arith.truncf %114 : vector<6x36xf32> to vector<6x36xbf16>
    %c18 = arith.constant 18 : index
    %c0_36 = arith.constant 0 : index
    %116 = vector.load %arg13[%c18, %c0_36] : memref<72x36xbf16, #tpu.memory_space<vmem>>, vector<6x36xbf16>
    tpu.vector_store %arg13[%c18, %c0_36], %115 {strides = array<i32>} : memref<72x36xbf16, #tpu.memory_space<vmem>>, vector<6x36xbf16>,
    %117 = vector.extract_strided_slice %6 {offsets = [0, 4, 0, 0], sizes = [1, 1, 8, 4], strides = [1, 1, 1, 1]} : vector<2x8x8x4xf32> to vector<1x1x8x4xf32>
    %118 = vector.shape_cast %117 : vector<1x1x8x4xf32> to vector<8x4xf32>
    %119 = vector.extract_strided_slice %118 {offsets = [0, 0], sizes = [6, 4], strides = [1, 1]} : vector<8x4xf32> to vector<6x4xf32>
    %120 = vector.extract_strided_slice %118 {offsets = [1, 0], sizes = [6, 4], strides = [1, 1]} : vector<8x4xf32> to vector<6x4xf32>
    %121 = vector.extract_strided_slice %118 {offsets = [2, 0], sizes = [6, 4], strides = [1, 1]} : vector<8x4xf32> to vector<6x4xf32>
    %122 = vector.extract_strided_slice %6 {offsets = [0, 5, 0, 0], sizes = [1, 1, 8, 4], strides = [1, 1, 1, 1]} : vector<2x8x8x4xf32> to vector<1x1x8x4xf32>
    %123 = vector.shape_cast %122 : vector<1x1x8x4xf32> to vector<8x4xf32>
    %124 = vector.extract_strided_slice %123 {offsets = [0, 0], sizes = [6, 4], strides = [1, 1]} : vector<8x4xf32> to vector<6x4xf32>
    %125 = vector.extract_strided_slice %123 {offsets = [1, 0], sizes = [6, 4], strides = [1, 1]} : vector<8x4xf32> to vector<6x4xf32>
    %126 = vector.extract_strided_slice %123 {offsets = [2, 0], sizes = [6, 4], strides = [1, 1]} : vector<8x4xf32> to vector<6x4xf32>
    %127 = vector.extract_strided_slice %6 {offsets = [0, 6, 0, 0], sizes = [1, 1, 8, 4], strides = [1, 1, 1, 1]} : vector<2x8x8x4xf32> to vector<1x1x8x4xf32>
    %128 = vector.shape_cast %127 : vector<1x1x8x4xf32> to vector<8x4xf32>
    %129 = vector.extract_strided_slice %128 {offsets = [0, 0], sizes = [6, 4], strides = [1, 1]} : vector<8x4xf32> to vector<6x4xf32>
    %130 = vector.extract_strided_slice %128 {offsets = [1, 0], sizes = [6, 4], strides = [1, 1]} : vector<8x4xf32> to vector<6x4xf32>
    %131 = vector.extract_strided_slice %128 {offsets = [2, 0], sizes = [6, 4], strides = [1, 1]} : vector<8x4xf32> to vector<6x4xf32>
    %132 = tpu.concatenate %119, %120, %121, %124, %125, %126, %129, %130, %131 in 1 : vector<6x4xf32>, vector<6x4xf32>, vector<6x4xf32>, vector<6x4xf32>, vector<6x4xf32>, vector<6x4xf32>, vector<6x4xf32>, vector<6x4xf32>, vector<6x4xf32> -> vector<6x36xf32>
    %133 = arith.truncf %132 : vector<6x36xf32> to vector<6x36xbf16>
    %c24 = arith.constant 24 : index
    %c0_37 = arith.constant 0 : index
    %134 = vector.load %arg13[%c24, %c0_37] : memref<72x36xbf16, #tpu.memory_space<vmem>>, vector<6x36xbf16>
    tpu.vector_store %arg13[%c24, %c0_37], %133 {strides = array<i32>} : memref<72x36xbf16, #tpu.memory_space<vmem>>, vector<6x36xbf16>,
    %135 = vector.extract_strided_slice %6 {offsets = [0, 5, 0, 0], sizes = [1, 1, 8, 4], strides = [1, 1, 1, 1]} : vector<2x8x8x4xf32> to vector<1x1x8x4xf32>
    %136 = vector.shape_cast %135 : vector<1x1x8x4xf32> to vector<8x4xf32>
    %137 = vector.extract_strided_slice %136 {offsets = [0, 0], sizes = [6, 4], strides = [1, 1]} : vector<8x4xf32> to vector<6x4xf32>
    %138 = vector.extract_strided_slice %136 {offsets = [1, 0], sizes = [6, 4], strides = [1, 1]} : vector<8x4xf32> to vector<6x4xf32>
    %139 = vector.extract_strided_slice %136 {offsets = [2, 0], sizes = [6, 4], strides = [1, 1]} : vector<8x4xf32> to vector<6x4xf32>
    %140 = vector.extract_strided_slice %6 {offsets = [0, 6, 0, 0], sizes = [1, 1, 8, 4], strides = [1, 1, 1, 1]} : vector<2x8x8x4xf32> to vector<1x1x8x4xf32>
    %141 = vector.shape_cast %140 : vector<1x1x8x4xf32> to vector<8x4xf32>
    %142 = vector.extract_strided_slice %141 {offsets = [0, 0], sizes = [6, 4], strides = [1, 1]} : vector<8x4xf32> to vector<6x4xf32>
    %143 = vector.extract_strided_slice %141 {offsets = [1, 0], sizes = [6, 4], strides = [1, 1]} : vector<8x4xf32> to vector<6x4xf32>
    %144 = vector.extract_strided_slice %141 {offsets = [2, 0], sizes = [6, 4], strides = [1, 1]} : vector<8x4xf32> to vector<6x4xf32>
    %145 = vector.extract_strided_slice %6 {offsets = [0, 7, 0, 0], sizes = [1, 1, 8, 4], strides = [1, 1, 1, 1]} : vector<2x8x8x4xf32> to vector<1x1x8x4xf32>
    %146 = vector.shape_cast %145 : vector<1x1x8x4xf32> to vector<8x4xf32>
    %147 = vector.extract_strided_slice %146 {offsets = [0, 0], sizes = [6, 4], strides = [1, 1]} : vector<8x4xf32> to vector<6x4xf32>
    %148 = vector.extract_strided_slice %146 {offsets = [1, 0], sizes = [6, 4], strides = [1, 1]} : vector<8x4xf32> to vector<6x4xf32>
    %149 = vector.extract_strided_slice %146 {offsets = [2, 0], sizes = [6, 4], strides = [1, 1]} : vector<8x4xf32> to vector<6x4xf32>
    %150 = tpu.concatenate %137, %138, %139, %142, %143, %144, %147, %148, %149 in 1 : vector<6x4xf32>, vector<6x4xf32>, vector<6x4xf32>, vector<6x4xf32>, vector<6x4xf32>, vector<6x4xf32>, vector<6x4xf32>, vector<6x4xf32>, vector<6x4xf32> -> vector<6x36xf32>
    %151 = arith.truncf %150 : vector<6x36xf32> to vector<6x36xbf16>
    %c30 = arith.constant 30 : index
    %c0_38 = arith.constant 0 : index
    %152 = vector.load %arg13[%c30, %c0_38] : memref<72x36xbf16, #tpu.memory_space<vmem>>, vector<6x36xbf16>
    tpu.vector_store %arg13[%c30, %c0_38], %151 {strides = array<i32>} : memref<72x36xbf16, #tpu.memory_space<vmem>>, vector<6x36xbf16>,
    %153 = vector.extract_strided_slice %6 {offsets = [1, 0, 0, 0], sizes = [1, 1, 8, 4], strides = [1, 1, 1, 1]} : vector<2x8x8x4xf32> to vector<1x1x8x4xf32>
    %154 = vector.shape_cast %153 : vector<1x1x8x4xf32> to vector<8x4xf32>
    %155 = vector.extract_strided_slice %154 {offsets = [0, 0], sizes = [6, 4], strides = [1, 1]} : vector<8x4xf32> to vector<6x4xf32>
    %156 = vector.extract_strided_slice %154 {offsets = [1, 0], sizes = [6, 4], strides = [1, 1]} : vector<8x4xf32> to vector<6x4xf32>
    %157 = vector.extract_strided_slice %154 {offsets = [2, 0], sizes = [6, 4], strides = [1, 1]} : vector<8x4xf32> to vector<6x4xf32>
    %158 = vector.extract_strided_slice %6 {offsets = [1, 1, 0, 0], sizes = [1, 1, 8, 4], strides = [1, 1, 1, 1]} : vector<2x8x8x4xf32> to vector<1x1x8x4xf32>
    %159 = vector.shape_cast %158 : vector<1x1x8x4xf32> to vector<8x4xf32>
    %160 = vector.extract_strided_slice %159 {offsets = [0, 0], sizes = [6, 4], strides = [1, 1]} : vector<8x4xf32> to vector<6x4xf32>
    %161 = vector.extract_strided_slice %159 {offsets = [1, 0], sizes = [6, 4], strides = [1, 1]} : vector<8x4xf32> to vector<6x4xf32>
    %162 = vector.extract_strided_slice %159 {offsets = [2, 0], sizes = [6, 4], strides = [1, 1]} : vector<8x4xf32> to vector<6x4xf32>
    %163 = vector.extract_strided_slice %6 {offsets = [1, 2, 0, 0], sizes = [1, 1, 8, 4], strides = [1, 1, 1, 1]} : vector<2x8x8x4xf32> to vector<1x1x8x4xf32>
    %164 = vector.shape_cast %163 : vector<1x1x8x4xf32> to vector<8x4xf32>
    %165 = vector.extract_strided_slice %164 {offsets = [0, 0], sizes = [6, 4], strides = [1, 1]} : vector<8x4xf32> to vector<6x4xf32>
    %166 = vector.extract_strided_slice %164 {offsets = [1, 0], sizes = [6, 4], strides = [1, 1]} : vector<8x4xf32> to vector<6x4xf32>
    %167 = vector.extract_strided_slice %164 {offsets = [2, 0], sizes = [6, 4], strides = [1, 1]} : vector<8x4xf32> to vector<6x4xf32>
    %168 = tpu.concatenate %155, %156, %157, %160, %161, %162, %165, %166, %167 in 1 : vector<6x4xf32>, vector<6x4xf32>, vector<6x4xf32>, vector<6x4xf32>, vector<6x4xf32>, vector<6x4xf32>, vector<6x4xf32>, vector<6x4xf32>, vector<6x4xf32> -> vector<6x36xf32>
    %169 = arith.truncf %168 : vector<6x36xf32> to vector<6x36xbf16>
    %c36 = arith.constant 36 : index
    %c0_39 = arith.constant 0 : index
    %170 = vector.load %arg13[%c36, %c0_39] : memref<72x36xbf16, #tpu.memory_space<vmem>>, vector<6x36xbf16>
    tpu.vector_store %arg13[%c36, %c0_39], %169 {strides = array<i32>} : memref<72x36xbf16, #tpu.memory_space<vmem>>, vector<6x36xbf16>,
    %171 = vector.extract_strided_slice %6 {offsets = [1, 1, 0, 0], sizes = [1, 1, 8, 4], strides = [1, 1, 1, 1]} : vector<2x8x8x4xf32> to vector<1x1x8x4xf32>
    %172 = vector.shape_cast %171 : vector<1x1x8x4xf32> to vector<8x4xf32>
    %173 = vector.extract_strided_slice %172 {offsets = [0, 0], sizes = [6, 4], strides = [1, 1]} : vector<8x4xf32> to vector<6x4xf32>
    %174 = vector.extract_strided_slice %172 {offsets = [1, 0], sizes = [6, 4], strides = [1, 1]} : vector<8x4xf32> to vector<6x4xf32>
    %175 = vector.extract_strided_slice %172 {offsets = [2, 0], sizes = [6, 4], strides = [1, 1]} : vector<8x4xf32> to vector<6x4xf32>
    %176 = vector.extract_strided_slice %6 {offsets = [1, 2, 0, 0], sizes = [1, 1, 8, 4], strides = [1, 1, 1, 1]} : vector<2x8x8x4xf32> to vector<1x1x8x4xf32>
    %177 = vector.shape_cast %176 : vector<1x1x8x4xf32> to vector<8x4xf32>
    %178 = vector.extract_strided_slice %177 {offsets = [0, 0], sizes = [6, 4], strides = [1, 1]} : vector<8x4xf32> to vector<6x4xf32>
    %179 = vector.extract_strided_slice %177 {offsets = [1, 0], sizes = [6, 4], strides = [1, 1]} : vector<8x4xf32> to vector<6x4xf32>
    %180 = vector.extract_strided_slice %177 {offsets = [2, 0], sizes = [6, 4], strides = [1, 1]} : vector<8x4xf32> to vector<6x4xf32>
    %181 = vector.extract_strided_slice %6 {offsets = [1, 3, 0, 0], sizes = [1, 1, 8, 4], strides = [1, 1, 1, 1]} : vector<2x8x8x4xf32> to vector<1x1x8x4xf32>
    %182 = vector.shape_cast %181 : vector<1x1x8x4xf32> to vector<8x4xf32>
    %183 = vector.extract_strided_slice %182 {offsets = [0, 0], sizes = [6, 4], strides = [1, 1]} : vector<8x4xf32> to vector<6x4xf32>
    %184 = vector.extract_strided_slice %182 {offsets = [1, 0], sizes = [6, 4], strides = [1, 1]} : vector<8x4xf32> to vector<6x4xf32>
    %185 = vector.extract_strided_slice %182 {offsets = [2, 0], sizes = [6, 4], strides = [1, 1]} : vector<8x4xf32> to vector<6x4xf32>
    %186 = tpu.concatenate %173, %174, %175, %178, %179, %180, %183, %184, %185 in 1 : vector<6x4xf32>, vector<6x4xf32>, vector<6x4xf32>, vector<6x4xf32>, vector<6x4xf32>, vector<6x4xf32>, vector<6x4xf32>, vector<6x4xf32>, vector<6x4xf32> -> vector<6x36xf32>
    %187 = arith.truncf %186 : vector<6x36xf32> to vector<6x36xbf16>
    %c42 = arith.constant 42 : index
    %c0_40 = arith.constant 0 : index
    %188 = vector.load %arg13[%c42, %c0_40] : memref<72x36xbf16, #tpu.memory_space<vmem>>, vector<6x36xbf16>
    tpu.vector_store %arg13[%c42, %c0_40], %187 {strides = array<i32>} : memref<72x36xbf16, #tpu.memory_space<vmem>>, vector<6x36xbf16>,
    %189 = vector.extract_strided_slice %6 {offsets = [1, 2, 0, 0], sizes = [1, 1, 8, 4], strides = [1, 1, 1, 1]} : vector<2x8x8x4xf32> to vector<1x1x8x4xf32>
    %190 = vector.shape_cast %189 : vector<1x1x8x4xf32> to vector<8x4xf32>
    %191 = vector.extract_strided_slice %190 {offsets = [0, 0], sizes = [6, 4], strides = [1, 1]} : vector<8x4xf32> to vector<6x4xf32>
    %192 = vector.extract_strided_slice %190 {offsets = [1, 0], sizes = [6, 4], strides = [1, 1]} : vector<8x4xf32> to vector<6x4xf32>
    %193 = vector.extract_strided_slice %190 {offsets = [2, 0], sizes = [6, 4], strides = [1, 1]} : vector<8x4xf32> to vector<6x4xf32>
    %194 = vector.extract_strided_slice %6 {offsets = [1, 3, 0, 0], sizes = [1, 1, 8, 4], strides = [1, 1, 1, 1]} : vector<2x8x8x4xf32> to vector<1x1x8x4xf32>
    %195 = vector.shape_cast %194 : vector<1x1x8x4xf32> to vector<8x4xf32>
    %196 = vector.extract_strided_slice %195 {offsets = [0, 0], sizes = [6, 4], strides = [1, 1]} : vector<8x4xf32> to vector<6x4xf32>
    %197 = vector.extract_strided_slice %195 {offsets = [1, 0], sizes = [6, 4], strides = [1, 1]} : vector<8x4xf32> to vector<6x4xf32>
    %198 = vector.extract_strided_slice %195 {offsets = [2, 0], sizes = [6, 4], strides = [1, 1]} : vector<8x4xf32> to vector<6x4xf32>
    %199 = vector.extract_strided_slice %6 {offsets = [1, 4, 0, 0], sizes = [1, 1, 8, 4], strides = [1, 1, 1, 1]} : vector<2x8x8x4xf32> to vector<1x1x8x4xf32>
    %200 = vector.shape_cast %199 : vector<1x1x8x4xf32> to vector<8x4xf32>
    %201 = vector.extract_strided_slice %200 {offsets = [0, 0], sizes = [6, 4], strides = [1, 1]} : vector<8x4xf32> to vector<6x4xf32>
    %202 = vector.extract_strided_slice %200 {offsets = [1, 0], sizes = [6, 4], strides = [1, 1]} : vector<8x4xf32> to vector<6x4xf32>
    %203 = vector.extract_strided_slice %200 {offsets = [2, 0], sizes = [6, 4], strides = [1, 1]} : vector<8x4xf32> to vector<6x4xf32>
    %204 = tpu.concatenate %191, %192, %193, %196, %197, %198, %201, %202, %203 in 1 : vector<6x4xf32>, vector<6x4xf32>, vector<6x4xf32>, vector<6x4xf32>, vector<6x4xf32>, vector<6x4xf32>, vector<6x4xf32>, vector<6x4xf32>, vector<6x4xf32> -> vector<6x36xf32>
    %205 = arith.truncf %204 : vector<6x36xf32> to vector<6x36xbf16>
    %c48 = arith.constant 48 : index
    %c0_41 = arith.constant 0 : index
    %206 = vector.load %arg13[%c48, %c0_41] : memref<72x36xbf16, #tpu.memory_space<vmem>>, vector<6x36xbf16>
    tpu.vector_store %arg13[%c48, %c0_41], %205 {strides = array<i32>} : memref<72x36xbf16, #tpu.memory_space<vmem>>, vector<6x36xbf16>,
    %207 = vector.extract_strided_slice %6 {offsets = [1, 3, 0, 0], sizes = [1, 1, 8, 4], strides = [1, 1, 1, 1]} : vector<2x8x8x4xf32> to vector<1x1x8x4xf32>
    %208 = vector.shape_cast %207 : vector<1x1x8x4xf32> to vector<8x4xf32>
    %209 = vector.extract_strided_slice %208 {offsets = [0, 0], sizes = [6, 4], strides = [1, 1]} : vector<8x4xf32> to vector<6x4xf32>
    %210 = vector.extract_strided_slice %208 {offsets = [1, 0], sizes = [6, 4], strides = [1, 1]} : vector<8x4xf32> to vector<6x4xf32>
    %211 = vector.extract_strided_slice %208 {offsets = [2, 0], sizes = [6, 4], strides = [1, 1]} : vector<8x4xf32> to vector<6x4xf32>
    %212 = vector.extract_strided_slice %6 {offsets = [1, 4, 0, 0], sizes = [1, 1, 8, 4], strides = [1, 1, 1, 1]} : vector<2x8x8x4xf32> to vector<1x1x8x4xf32>
    %213 = vector.shape_cast %212 : vector<1x1x8x4xf32> to vector<8x4xf32>
    %214 = vector.extract_strided_slice %213 {offsets = [0, 0], sizes = [6, 4], strides = [1, 1]} : vector<8x4xf32> to vector<6x4xf32>
    %215 = vector.extract_strided_slice %213 {offsets = [1, 0], sizes = [6, 4], strides = [1, 1]} : vector<8x4xf32> to vector<6x4xf32>
    %216 = vector.extract_strided_slice %213 {offsets = [2, 0], sizes = [6, 4], strides = [1, 1]} : vector<8x4xf32> to vector<6x4xf32>
    %217 = vector.extract_strided_slice %6 {offsets = [1, 5, 0, 0], sizes = [1, 1, 8, 4], strides = [1, 1, 1, 1]} : vector<2x8x8x4xf32> to vector<1x1x8x4xf32>
    %218 = vector.shape_cast %217 : vector<1x1x8x4xf32> to vector<8x4xf32>
    %219 = vector.extract_strided_slice %218 {offsets = [0, 0], sizes = [6, 4], strides = [1, 1]} : vector<8x4xf32> to vector<6x4xf32>
    %220 = vector.extract_strided_slice %218 {offsets = [1, 0], sizes = [6, 4], strides = [1, 1]} : vector<8x4xf32> to vector<6x4xf32>
    %221 = vector.extract_strided_slice %218 {offsets = [2, 0], sizes = [6, 4], strides = [1, 1]} : vector<8x4xf32> to vector<6x4xf32>
    %222 = tpu.concatenate %209, %210, %211, %214, %215, %216, %219, %220, %221 in 1 : vector<6x4xf32>, vector<6x4xf32>, vector<6x4xf32>, vector<6x4xf32>, vector<6x4xf32>, vector<6x4xf32>, vector<6x4xf32>, vector<6x4xf32>, vector<6x4xf32> -> vector<6x36xf32>
    %223 = arith.truncf %222 : vector<6x36xf32> to vector<6x36xbf16>
    %c54 = arith.constant 54 : index
    %c0_42 = arith.constant 0 : index
    %224 = vector.load %arg13[%c54, %c0_42] : memref<72x36xbf16, #tpu.memory_space<vmem>>, vector<6x36xbf16>
    tpu.vector_store %arg13[%c54, %c0_42], %223 {strides = array<i32>} : memref<72x36xbf16, #tpu.memory_space<vmem>>, vector<6x36xbf16>,
    %225 = vector.extract_strided_slice %6 {offsets = [1, 4, 0, 0], sizes = [1, 1, 8, 4], strides = [1, 1, 1, 1]} : vector<2x8x8x4xf32> to vector<1x1x8x4xf32>
    %226 = vector.shape_cast %225 : vector<1x1x8x4xf32> to vector<8x4xf32>
    %227 = vector.extract_strided_slice %226 {offsets = [0, 0], sizes = [6, 4], strides = [1, 1]} : vector<8x4xf32> to vector<6x4xf32>
    %228 = vector.extract_strided_slice %226 {offsets = [1, 0], sizes = [6, 4], strides = [1, 1]} : vector<8x4xf32> to vector<6x4xf32>
    %229 = vector.extract_strided_slice %226 {offsets = [2, 0], sizes = [6, 4], strides = [1, 1]} : vector<8x4xf32> to vector<6x4xf32>
    %230 = vector.extract_strided_slice %6 {offsets = [1, 5, 0, 0], sizes = [1, 1, 8, 4], strides = [1, 1, 1, 1]} : vector<2x8x8x4xf32> to vector<1x1x8x4xf32>
    %231 = vector.shape_cast %230 : vector<1x1x8x4xf32> to vector<8x4xf32>
    %232 = vector.extract_strided_slice %231 {offsets = [0, 0], sizes = [6, 4], strides = [1, 1]} : vector<8x4xf32> to vector<6x4xf32>
    %233 = vector.extract_strided_slice %231 {offsets = [1, 0], sizes = [6, 4], strides = [1, 1]} : vector<8x4xf32> to vector<6x4xf32>
    %234 = vector.extract_strided_slice %231 {offsets = [2, 0], sizes = [6, 4], strides = [1, 1]} : vector<8x4xf32> to vector<6x4xf32>
    %235 = vector.extract_strided_slice %6 {offsets = [1, 6, 0, 0], sizes = [1, 1, 8, 4], strides = [1, 1, 1, 1]} : vector<2x8x8x4xf32> to vector<1x1x8x4xf32>
    %236 = vector.shape_cast %235 : vector<1x1x8x4xf32> to vector<8x4xf32>
    %237 = vector.extract_strided_slice %236 {offsets = [0, 0], sizes = [6, 4], strides = [1, 1]} : vector<8x4xf32> to vector<6x4xf32>
    %238 = vector.extract_strided_slice %236 {offsets = [1, 0], sizes = [6, 4], strides = [1, 1]} : vector<8x4xf32> to vector<6x4xf32>
    %239 = vector.extract_strided_slice %236 {offsets = [2, 0], sizes = [6, 4], strides = [1, 1]} : vector<8x4xf32> to vector<6x4xf32>
    %240 = tpu.concatenate %227, %228, %229, %232, %233, %234, %237, %238, %239 in 1 : vector<6x4xf32>, vector<6x4xf32>, vector<6x4xf32>, vector<6x4xf32>, vector<6x4xf32>, vector<6x4xf32>, vector<6x4xf32>, vector<6x4xf32>, vector<6x4xf32> -> vector<6x36xf32>
    %241 = arith.truncf %240 : vector<6x36xf32> to vector<6x36xbf16>
    %c60 = arith.constant 60 : index
    %c0_43 = arith.constant 0 : index
    %242 = vector.load %arg13[%c60, %c0_43] : memref<72x36xbf16, #tpu.memory_space<vmem>>, vector<6x36xbf16>
    tpu.vector_store %arg13[%c60, %c0_43], %241 {strides = array<i32>} : memref<72x36xbf16, #tpu.memory_space<vmem>>, vector<6x36xbf16>,
    %243 = vector.extract_strided_slice %6 {offsets = [1, 5, 0, 0], sizes = [1, 1, 8, 4], strides = [1, 1, 1, 1]} : vector<2x8x8x4xf32> to vector<1x1x8x4xf32>
    %244 = vector.shape_cast %243 : vector<1x1x8x4xf32> to vector<8x4xf32>
    %245 = vector.extract_strided_slice %244 {offsets = [0, 0], sizes = [6, 4], strides = [1, 1]} : vector<8x4xf32> to vector<6x4xf32>
    %246 = vector.extract_strided_slice %244 {offsets = [1, 0], sizes = [6, 4], strides = [1, 1]} : vector<8x4xf32> to vector<6x4xf32>
    %247 = vector.extract_strided_slice %244 {offsets = [2, 0], sizes = [6, 4], strides = [1, 1]} : vector<8x4xf32> to vector<6x4xf32>
    %248 = vector.extract_strided_slice %6 {offsets = [1, 6, 0, 0], sizes = [1, 1, 8, 4], strides = [1, 1, 1, 1]} : vector<2x8x8x4xf32> to vector<1x1x8x4xf32>
    %249 = vector.shape_cast %248 : vector<1x1x8x4xf32> to vector<8x4xf32>
    %250 = vector.extract_strided_slice %249 {offsets = [0, 0], sizes = [6, 4], strides = [1, 1]} : vector<8x4xf32> to vector<6x4xf32>
    %251 = vector.extract_strided_slice %249 {offsets = [1, 0], sizes = [6, 4], strides = [1, 1]} : vector<8x4xf32> to vector<6x4xf32>
    %252 = vector.extract_strided_slice %249 {offsets = [2, 0], sizes = [6, 4], strides = [1, 1]} : vector<8x4xf32> to vector<6x4xf32>
    %253 = vector.extract_strided_slice %6 {offsets = [1, 7, 0, 0], sizes = [1, 1, 8, 4], strides = [1, 1, 1, 1]} : vector<2x8x8x4xf32> to vector<1x1x8x4xf32>
    %254 = vector.shape_cast %253 : vector<1x1x8x4xf32> to vector<8x4xf32>
    %255 = vector.extract_strided_slice %254 {offsets = [0, 0], sizes = [6, 4], strides = [1, 1]} : vector<8x4xf32> to vector<6x4xf32>
    %256 = vector.extract_strided_slice %254 {offsets = [1, 0], sizes = [6, 4], strides = [1, 1]} : vector<8x4xf32> to vector<6x4xf32>
    %257 = vector.extract_strided_slice %254 {offsets = [2, 0], sizes = [6, 4], strides = [1, 1]} : vector<8x4xf32> to vector<6x4xf32>
    %258 = tpu.concatenate %245, %246, %247, %250, %251, %252, %255, %256, %257 in 1 : vector<6x4xf32>, vector<6x4xf32>, vector<6x4xf32>, vector<6x4xf32>, vector<6x4xf32>, vector<6x4xf32>, vector<6x4xf32>, vector<6x4xf32>, vector<6x4xf32> -> vector<6x36xf32>
    %259 = arith.truncf %258 : vector<6x36xf32> to vector<6x36xbf16>
    %c66 = arith.constant 66 : index
    %c0_44 = arith.constant 0 : index
    %260 = vector.load %arg13[%c66, %c0_44] : memref<72x36xbf16, #tpu.memory_space<vmem>>, vector<6x36xbf16>
    tpu.vector_store %arg13[%c66, %c0_44], %259 {strides = array<i32>} : memref<72x36xbf16, #tpu.memory_space<vmem>>, vector<6x36xbf16>,
    %c0_45 = arith.constant 0 : index
    %c0_46 = arith.constant 0 : index
    %261 = vector.load %arg13[%c0_45, %c0_46] : memref<72x36xbf16, #tpu.memory_space<vmem>>, vector<72x36xbf16>
    "tpu.trace_start"() <{level = 10 : i32, message = "mk,ck->mc"}> : () -> ()
    %cst_47 = arith.constant dense<0.000000e+00> : vector<72x8xf32>
    %262 = tpu.matmul %261, %41, %cst_47 {dimension_numbers = #tpu.dot_dimension_numbers<[1], [1], [0], [0], [0, 0, 1, 0], [], []>} : vector<72x36xbf16>, vector<8x36xbf16>, vector<72x8xf32> -> vector<72x8xf32>
    "tpu.trace_stop"() : () -> ()
    %263 = vector.broadcast %44 : vector<1x8xf32> to vector<72x8xf32>
    %264 = arith.addf %262, %263 : vector<72x8xf32>
    %cst_48 = arith.constant 0.000000e+00 : f32
    %265 = vector.broadcast %cst_48 : f32 to vector<72x8xf32>
    %266 = arith.maximumf %264, %265 : vector<72x8xf32>
    %cst_49 = arith.constant dense<0.000000e+00> : vector<8xf32>
    %267 = vector.multi_reduction <add>, %266, %cst_49 [0] : vector<72x8xf32> to vector<8xf32>
    %268 = vector.shape_cast %267 : vector<8xf32> to vector<1x8xf32>
    %cst_50 = arith.constant 7.200000e+01 : f32
    %269 = vector.broadcast %cst_50 : f32 to vector<1x8xf32>
    %270 = arith.divf %268, %269 : vector<1x8xf32>
    %271 = vector.broadcast %270 : vector<1x8xf32> to vector<72x8xf32>
    %272 = arith.subf %266, %271 : vector<72x8xf32>
    %273 = arith.mulf %272, %272 : vector<72x8xf32>
    %cst_51 = arith.constant dense<0.000000e+00> : vector<8xf32>
    %274 = vector.multi_reduction <add>, %273, %cst_51 [0] : vector<72x8xf32> to vector<8xf32>
    %275 = vector.shape_cast %274 : vector<8xf32> to vector<1x8xf32>
    %cst_52 = arith.constant 7.200000e+01 : f32
    %276 = vector.broadcast %cst_52 : f32 to vector<1x8xf32>
    %277 = arith.divf %275, %276 : vector<1x8xf32>
    %c0_53 = arith.constant 0 : index
    %c0_54 = arith.constant 0 : index
    %278 = vector.load %arg8[%c0_53, %c0_54] : memref<1x8xf32, #tpu.memory_space<vmem>>, vector<1x8xf32>
    %cst_55 = arith.constant 9.99999974E-6 : f32
    %279 = vector.broadcast %cst_55 : f32 to vector<1x8xf32>
    %280 = arith.addf %277, %279 : vector<1x8xf32>
    %281 = math.rsqrt %280 : vector<1x8xf32>
    %282 = arith.mulf %278, %281 : vector<1x8xf32>
    %c0_56 = arith.constant 0 : index
    %c0_57 = arith.constant 0 : index
    %283 = vector.load %arg9[%c0_56, %c0_57] : memref<1x8xf32, #tpu.memory_space<vmem>>, vector<1x8xf32>
    %284 = arith.mulf %270, %282 : vector<1x8xf32>
    %285 = arith.subf %283, %284 : vector<1x8xf32>
    %286 = tpu.concatenate %282, %282, %282, %282, %282, %282, %282, %282, %282 in 1 : vector<1x8xf32>, vector<1x8xf32>, vector<1x8xf32>, vector<1x8xf32>, vector<1x8xf32>, vector<1x8xf32>, vector<1x8xf32>, vector<1x8xf32>, vector<1x8xf32> -> vector<1x72xf32>
    %287 = tpu.concatenate %285, %285, %285, %285, %285, %285, %285, %285, %285 in 1 : vector<1x8xf32>, vector<1x8xf32>, vector<1x8xf32>, vector<1x8xf32>, vector<1x8xf32>, vector<1x8xf32>, vector<1x8xf32>, vector<1x8xf32>, vector<1x8xf32> -> vector<1x72xf32>
    %c0_58 = arith.constant 0 : index
    %c0_59 = arith.constant 0 : index
    %288 = vector.load %arg10[%c0_58, %c0_59] : memref<8x72xf32, #tpu.memory_space<vmem>>, vector<8x72xf32>
    %289 = vector.broadcast %286 : vector<1x72xf32> to vector<8x72xf32>
    %290 = arith.mulf %288, %289 : vector<8x72xf32>
    %291 = arith.truncf %290 : vector<8x72xf32> to vector<8x72xbf16>
    %c0_60 = arith.constant 0 : index
    %c0_61 = arith.constant 0 : index
    %292 = vector.load %arg11[%c0_60, %c0_61] : memref<1x8xf32, #tpu.memory_space<vmem>>, vector<1x8xf32>
    "tpu.trace_start"() <{level = 10 : i32, message = "ik,ck->ic"}> : () -> ()
    %cst_62 = arith.constant dense<0.000000e+00> : vector<1x8xf32>
    %293 = tpu.matmul %287, %288, %cst_62 {dimension_numbers = #tpu.dot_dimension_numbers<[1], [1], [0], [0], [0, 0, 1, 0], [], []>} : vector<1x72xf32>, vector<8x72xf32>, vector<1x8xf32> -> vector<1x8xf32>
    "tpu.trace_stop"() : () -> ()
    %294 = arith.addf %292, %293 : vector<1x8xf32>
    %295 = vector.extract_strided_slice %266 {offsets = [0, 0], sizes = [4, 8], strides = [1, 1]} : vector<72x8xf32> to vector<4x8xf32>
    %296 = vector.extract_strided_slice %266 {offsets = [1, 0], sizes = [4, 8], strides = [1, 1]} : vector<72x8xf32> to vector<4x8xf32>
    %297 = vector.extract_strided_slice %266 {offsets = [2, 0], sizes = [4, 8], strides = [1, 1]} : vector<72x8xf32> to vector<4x8xf32>
    %298 = vector.extract_strided_slice %266 {offsets = [6, 0], sizes = [4, 8], strides = [1, 1]} : vector<72x8xf32> to vector<4x8xf32>
    %299 = vector.extract_strided_slice %266 {offsets = [7, 0], sizes = [4, 8], strides = [1, 1]} : vector<72x8xf32> to vector<4x8xf32>
    %300 = vector.extract_strided_slice %266 {offsets = [8, 0], sizes = [4, 8], strides = [1, 1]} : vector<72x8xf32> to vector<4x8xf32>
    %301 = vector.extract_strided_slice %266 {offsets = [12, 0], sizes = [4, 8], strides = [1, 1]} : vector<72x8xf32> to vector<4x8xf32>
    %302 = vector.extract_strided_slice %266 {offsets = [13, 0], sizes = [4, 8], strides = [1, 1]} : vector<72x8xf32> to vector<4x8xf32>
    %303 = vector.extract_strided_slice %266 {offsets = [14, 0], sizes = [4, 8], strides = [1, 1]} : vector<72x8xf32> to vector<4x8xf32>
    %304 = tpu.concatenate %295, %296, %297, %298, %299, %300, %301, %302, %303 in 1 : vector<4x8xf32>, vector<4x8xf32>, vector<4x8xf32>, vector<4x8xf32>, vector<4x8xf32>, vector<4x8xf32>, vector<4x8xf32>, vector<4x8xf32>, vector<4x8xf32> -> vector<4x72xf32>
    %305 = arith.truncf %304 : vector<4x72xf32> to vector<4x72xbf16>
    %c0_63 = arith.constant 0 : index
    %c0_64 = arith.constant 0 : index
    %306 = vector.load %arg14[%c0_63, %c0_64] : memref<32x72xbf16, #tpu.memory_space<vmem>>, vector<4x72xbf16>
    tpu.vector_store %arg14[%c0_63, %c0_64], %305 {strides = array<i32>} : memref<32x72xbf16, #tpu.memory_space<vmem>>, vector<4x72xbf16>,
    %307 = vector.extract_strided_slice %266 {offsets = [6, 0], sizes = [4, 8], strides = [1, 1]} : vector<72x8xf32> to vector<4x8xf32>
    %308 = vector.extract_strided_slice %266 {offsets = [7, 0], sizes = [4, 8], strides = [1, 1]} : vector<72x8xf32> to vector<4x8xf32>
    %309 = vector.extract_strided_slice %266 {offsets = [8, 0], sizes = [4, 8], strides = [1, 1]} : vector<72x8xf32> to vector<4x8xf32>
    %310 = vector.extract_strided_slice %266 {offsets = [12, 0], sizes = [4, 8], strides = [1, 1]} : vector<72x8xf32> to vector<4x8xf32>
    %311 = vector.extract_strided_slice %266 {offsets = [13, 0], sizes = [4, 8], strides = [1, 1]} : vector<72x8xf32> to vector<4x8xf32>
    %312 = vector.extract_strided_slice %266 {offsets = [14, 0], sizes = [4, 8], strides = [1, 1]} : vector<72x8xf32> to vector<4x8xf32>
    %313 = vector.extract_strided_slice %266 {offsets = [18, 0], sizes = [4, 8], strides = [1, 1]} : vector<72x8xf32> to vector<4x8xf32>
    %314 = vector.extract_strided_slice %266 {offsets = [19, 0], sizes = [4, 8], strides = [1, 1]} : vector<72x8xf32> to vector<4x8xf32>
    %315 = vector.extract_strided_slice %266 {offsets = [20, 0], sizes = [4, 8], strides = [1, 1]} : vector<72x8xf32> to vector<4x8xf32>
    %316 = tpu.concatenate %307, %308, %309, %310, %311, %312, %313, %314, %315 in 1 : vector<4x8xf32>, vector<4x8xf32>, vector<4x8xf32>, vector<4x8xf32>, vector<4x8xf32>, vector<4x8xf32>, vector<4x8xf32>, vector<4x8xf32>, vector<4x8xf32> -> vector<4x72xf32>
    %317 = arith.truncf %316 : vector<4x72xf32> to vector<4x72xbf16>
    %c4 = arith.constant 4 : index
    %c0_65 = arith.constant 0 : index
    %318 = vector.load %arg14[%c4, %c0_65] : memref<32x72xbf16, #tpu.memory_space<vmem>>, vector<4x72xbf16>
    tpu.vector_store %arg14[%c4, %c0_65], %317 {strides = array<i32>} : memref<32x72xbf16, #tpu.memory_space<vmem>>, vector<4x72xbf16>,
    %319 = vector.extract_strided_slice %266 {offsets = [12, 0], sizes = [4, 8], strides = [1, 1]} : vector<72x8xf32> to vector<4x8xf32>
    %320 = vector.extract_strided_slice %266 {offsets = [13, 0], sizes = [4, 8], strides = [1, 1]} : vector<72x8xf32> to vector<4x8xf32>
    %321 = vector.extract_strided_slice %266 {offsets = [14, 0], sizes = [4, 8], strides = [1, 1]} : vector<72x8xf32> to vector<4x8xf32>
    %322 = vector.extract_strided_slice %266 {offsets = [18, 0], sizes = [4, 8], strides = [1, 1]} : vector<72x8xf32> to vector<4x8xf32>
    %323 = vector.extract_strided_slice %266 {offsets = [19, 0], sizes = [4, 8], strides = [1, 1]} : vector<72x8xf32> to vector<4x8xf32>
    %324 = vector.extract_strided_slice %266 {offsets = [20, 0], sizes = [4, 8], strides = [1, 1]} : vector<72x8xf32> to vector<4x8xf32>
    %325 = vector.extract_strided_slice %266 {offsets = [24, 0], sizes = [4, 8], strides = [1, 1]} : vector<72x8xf32> to vector<4x8xf32>
    %326 = vector.extract_strided_slice %266 {offsets = [25, 0], sizes = [4, 8], strides = [1, 1]} : vector<72x8xf32> to vector<4x8xf32>
    %327 = vector.extract_strided_slice %266 {offsets = [26, 0], sizes = [4, 8], strides = [1, 1]} : vector<72x8xf32> to vector<4x8xf32>
    %328 = tpu.concatenate %319, %320, %321, %322, %323, %324, %325, %326, %327 in 1 : vector<4x8xf32>, vector<4x8xf32>, vector<4x8xf32>, vector<4x8xf32>, vector<4x8xf32>, vector<4x8xf32>, vector<4x8xf32>, vector<4x8xf32>, vector<4x8xf32> -> vector<4x72xf32>
    %329 = arith.truncf %328 : vector<4x72xf32> to vector<4x72xbf16>
    %c8 = arith.constant 8 : index
    %c0_66 = arith.constant 0 : index
    %330 = vector.load %arg14[%c8, %c0_66] : memref<32x72xbf16, #tpu.memory_space<vmem>>, vector<4x72xbf16>
    tpu.vector_store %arg14[%c8, %c0_66], %329 {strides = array<i32>} : memref<32x72xbf16, #tpu.memory_space<vmem>>, vector<4x72xbf16>,
    %331 = vector.extract_strided_slice %266 {offsets = [18, 0], sizes = [4, 8], strides = [1, 1]} : vector<72x8xf32> to vector<4x8xf32>
    %332 = vector.extract_strided_slice %266 {offsets = [19, 0], sizes = [4, 8], strides = [1, 1]} : vector<72x8xf32> to vector<4x8xf32>
    %333 = vector.extract_strided_slice %266 {offsets = [20, 0], sizes = [4, 8], strides = [1, 1]} : vector<72x8xf32> to vector<4x8xf32>
    %334 = vector.extract_strided_slice %266 {offsets = [24, 0], sizes = [4, 8], strides = [1, 1]} : vector<72x8xf32> to vector<4x8xf32>
    %335 = vector.extract_strided_slice %266 {offsets = [25, 0], sizes = [4, 8], strides = [1, 1]} : vector<72x8xf32> to vector<4x8xf32>
    %336 = vector.extract_strided_slice %266 {offsets = [26, 0], sizes = [4, 8], strides = [1, 1]} : vector<72x8xf32> to vector<4x8xf32>
    %337 = vector.extract_strided_slice %266 {offsets = [30, 0], sizes = [4, 8], strides = [1, 1]} : vector<72x8xf32> to vector<4x8xf32>
    %338 = vector.extract_strided_slice %266 {offsets = [31, 0], sizes = [4, 8], strides = [1, 1]} : vector<72x8xf32> to vector<4x8xf32>
    %339 = vector.extract_strided_slice %266 {offsets = [32, 0], sizes = [4, 8], strides = [1, 1]} : vector<72x8xf32> to vector<4x8xf32>
    %340 = tpu.concatenate %331, %332, %333, %334, %335, %336, %337, %338, %339 in 1 : vector<4x8xf32>, vector<4x8xf32>, vector<4x8xf32>, vector<4x8xf32>, vector<4x8xf32>, vector<4x8xf32>, vector<4x8xf32>, vector<4x8xf32>, vector<4x8xf32> -> vector<4x72xf32>
    %341 = arith.truncf %340 : vector<4x72xf32> to vector<4x72xbf16>
    %c12_67 = arith.constant 12 : index
    %c0_68 = arith.constant 0 : index
    %342 = vector.load %arg14[%c12_67, %c0_68] : memref<32x72xbf16, #tpu.memory_space<vmem>>, vector<4x72xbf16>
    tpu.vector_store %arg14[%c12_67, %c0_68], %341 {strides = array<i32>} : memref<32x72xbf16, #tpu.memory_space<vmem>>, vector<4x72xbf16>,
    %343 = vector.extract_strided_slice %266 {offsets = [36, 0], sizes = [4, 8], strides = [1, 1]} : vector<72x8xf32> to vector<4x8xf32>
    %344 = vector.extract_strided_slice %266 {offsets = [37, 0], sizes = [4, 8], strides = [1, 1]} : vector<72x8xf32> to vector<4x8xf32>
    %345 = vector.extract_strided_slice %266 {offsets = [38, 0], sizes = [4, 8], strides = [1, 1]} : vector<72x8xf32> to vector<4x8xf32>
    %346 = vector.extract_strided_slice %266 {offsets = [42, 0], sizes = [4, 8], strides = [1, 1]} : vector<72x8xf32> to vector<4x8xf32>
    %347 = vector.extract_strided_slice %266 {offsets = [43, 0], sizes = [4, 8], strides = [1, 1]} : vector<72x8xf32> to vector<4x8xf32>
    %348 = vector.extract_strided_slice %266 {offsets = [44, 0], sizes = [4, 8], strides = [1, 1]} : vector<72x8xf32> to vector<4x8xf32>
    %349 = vector.extract_strided_slice %266 {offsets = [48, 0], sizes = [4, 8], strides = [1, 1]} : vector<72x8xf32> to vector<4x8xf32>
    %350 = vector.extract_strided_slice %266 {offsets = [49, 0], sizes = [4, 8], strides = [1, 1]} : vector<72x8xf32> to vector<4x8xf32>
    %351 = vector.extract_strided_slice %266 {offsets = [50, 0], sizes = [4, 8], strides = [1, 1]} : vector<72x8xf32> to vector<4x8xf32>
    %352 = tpu.concatenate %343, %344, %345, %346, %347, %348, %349, %350, %351 in 1 : vector<4x8xf32>, vector<4x8xf32>, vector<4x8xf32>, vector<4x8xf32>, vector<4x8xf32>, vector<4x8xf32>, vector<4x8xf32>, vector<4x8xf32>, vector<4x8xf32> -> vector<4x72xf32>
    %353 = arith.truncf %352 : vector<4x72xf32> to vector<4x72xbf16>
    %c16 = arith.constant 16 : index
    %c0_69 = arith.constant 0 : index
    %354 = vector.load %arg14[%c16, %c0_69] : memref<32x72xbf16, #tpu.memory_space<vmem>>, vector<4x72xbf16>
    tpu.vector_store %arg14[%c16, %c0_69], %353 {strides = array<i32>} : memref<32x72xbf16, #tpu.memory_space<vmem>>, vector<4x72xbf16>,
    %355 = vector.extract_strided_slice %266 {offsets = [42, 0], sizes = [4, 8], strides = [1, 1]} : vector<72x8xf32> to vector<4x8xf32>
    %356 = vector.extract_strided_slice %266 {offsets = [43, 0], sizes = [4, 8], strides = [1, 1]} : vector<72x8xf32> to vector<4x8xf32>
    %357 = vector.extract_strided_slice %266 {offsets = [44, 0], sizes = [4, 8], strides = [1, 1]} : vector<72x8xf32> to vector<4x8xf32>
    %358 = vector.extract_strided_slice %266 {offsets = [48, 0], sizes = [4, 8], strides = [1, 1]} : vector<72x8xf32> to vector<4x8xf32>
    %359 = vector.extract_strided_slice %266 {offsets = [49, 0], sizes = [4, 8], strides = [1, 1]} : vector<72x8xf32> to vector<4x8xf32>
    %360 = vector.extract_strided_slice %266 {offsets = [50, 0], sizes = [4, 8], strides = [1, 1]} : vector<72x8xf32> to vector<4x8xf32>
    %361 = vector.extract_strided_slice %266 {offsets = [54, 0], sizes = [4, 8], strides = [1, 1]} : vector<72x8xf32> to vector<4x8xf32>
    %362 = vector.extract_strided_slice %266 {offsets = [55, 0], sizes = [4, 8], strides = [1, 1]} : vector<72x8xf32> to vector<4x8xf32>
    %363 = vector.extract_strided_slice %266 {offsets = [56, 0], sizes = [4, 8], strides = [1, 1]} : vector<72x8xf32> to vector<4x8xf32>
    %364 = tpu.concatenate %355, %356, %357, %358, %359, %360, %361, %362, %363 in 1 : vector<4x8xf32>, vector<4x8xf32>, vector<4x8xf32>, vector<4x8xf32>, vector<4x8xf32>, vector<4x8xf32>, vector<4x8xf32>, vector<4x8xf32>, vector<4x8xf32> -> vector<4x72xf32>
    %365 = arith.truncf %364 : vector<4x72xf32> to vector<4x72xbf16>
    %c20 = arith.constant 20 : index
    %c0_70 = arith.constant 0 : index
    %366 = vector.load %arg14[%c20, %c0_70] : memref<32x72xbf16, #tpu.memory_space<vmem>>, vector<4x72xbf16>
    tpu.vector_store %arg14[%c20, %c0_70], %365 {strides = array<i32>} : memref<32x72xbf16, #tpu.memory_space<vmem>>, vector<4x72xbf16>,
    %367 = vector.extract_strided_slice %266 {offsets = [48, 0], sizes = [4, 8], strides = [1, 1]} : vector<72x8xf32> to vector<4x8xf32>
    %368 = vector.extract_strided_slice %266 {offsets = [49, 0], sizes = [4, 8], strides = [1, 1]} : vector<72x8xf32> to vector<4x8xf32>
    %369 = vector.extract_strided_slice %266 {offsets = [50, 0], sizes = [4, 8], strides = [1, 1]} : vector<72x8xf32> to vector<4x8xf32>
    %370 = vector.extract_strided_slice %266 {offsets = [54, 0], sizes = [4, 8], strides = [1, 1]} : vector<72x8xf32> to vector<4x8xf32>
    %371 = vector.extract_strided_slice %266 {offsets = [55, 0], sizes = [4, 8], strides = [1, 1]} : vector<72x8xf32> to vector<4x8xf32>
    %372 = vector.extract_strided_slice %266 {offsets = [56, 0], sizes = [4, 8], strides = [1, 1]} : vector<72x8xf32> to vector<4x8xf32>
    %373 = vector.extract_strided_slice %266 {offsets = [60, 0], sizes = [4, 8], strides = [1, 1]} : vector<72x8xf32> to vector<4x8xf32>
    %374 = vector.extract_strided_slice %266 {offsets = [61, 0], sizes = [4, 8], strides = [1, 1]} : vector<72x8xf32> to vector<4x8xf32>
    %375 = vector.extract_strided_slice %266 {offsets = [62, 0], sizes = [4, 8], strides = [1, 1]} : vector<72x8xf32> to vector<4x8xf32>
    %376 = tpu.concatenate %367, %368, %369, %370, %371, %372, %373, %374, %375 in 1 : vector<4x8xf32>, vector<4x8xf32>, vector<4x8xf32>, vector<4x8xf32>, vector<4x8xf32>, vector<4x8xf32>, vector<4x8xf32>, vector<4x8xf32>, vector<4x8xf32> -> vector<4x72xf32>
    %377 = arith.truncf %376 : vector<4x72xf32> to vector<4x72xbf16>
    %c24_71 = arith.constant 24 : index
    %c0_72 = arith.constant 0 : index
    %378 = vector.load %arg14[%c24_71, %c0_72] : memref<32x72xbf16, #tpu.memory_space<vmem>>, vector<4x72xbf16>
    tpu.vector_store %arg14[%c24_71, %c0_72], %377 {strides = array<i32>} : memref<32x72xbf16, #tpu.memory_space<vmem>>, vector<4x72xbf16>,
    %379 = vector.extract_strided_slice %266 {offsets = [54, 0], sizes = [4, 8], strides = [1, 1]} : vector<72x8xf32> to vector<4x8xf32>
    %380 = vector.extract_strided_slice %266 {offsets = [55, 0], sizes = [4, 8], strides = [1, 1]} : vector<72x8xf32> to vector<4x8xf32>
    %381 = vector.extract_strided_slice %266 {offsets = [56, 0], sizes = [4, 8], strides = [1, 1]} : vector<72x8xf32> to vector<4x8xf32>
    %382 = vector.extract_strided_slice %266 {offsets = [60, 0], sizes = [4, 8], strides = [1, 1]} : vector<72x8xf32> to vector<4x8xf32>
    %383 = vector.extract_strided_slice %266 {offsets = [61, 0], sizes = [4, 8], strides = [1, 1]} : vector<72x8xf32> to vector<4x8xf32>
    %384 = vector.extract_strided_slice %266 {offsets = [62, 0], sizes = [4, 8], strides = [1, 1]} : vector<72x8xf32> to vector<4x8xf32>
    %385 = vector.extract_strided_slice %266 {offsets = [66, 0], sizes = [4, 8], strides = [1, 1]} : vector<72x8xf32> to vector<4x8xf32>
    %386 = vector.extract_strided_slice %266 {offsets = [67, 0], sizes = [4, 8], strides = [1, 1]} : vector<72x8xf32> to vector<4x8xf32>
    %387 = vector.extract_strided_slice %266 {offsets = [68, 0], sizes = [4, 8], strides = [1, 1]} : vector<72x8xf32> to vector<4x8xf32>
    %388 = tpu.concatenate %379, %380, %381, %382, %383, %384, %385, %386, %387 in 1 : vector<4x8xf32>, vector<4x8xf32>, vector<4x8xf32>, vector<4x8xf32>, vector<4x8xf32>, vector<4x8xf32>, vector<4x8xf32>, vector<4x8xf32>, vector<4x8xf32> -> vector<4x72xf32>
    %389 = arith.truncf %388 : vector<4x72xf32> to vector<4x72xbf16>
    %c28 = arith.constant 28 : index
    %c0_73 = arith.constant 0 : index
    %390 = vector.load %arg14[%c28, %c0_73] : memref<32x72xbf16, #tpu.memory_space<vmem>>, vector<4x72xbf16>
    tpu.vector_store %arg14[%c28, %c0_73], %389 {strides = array<i32>} : memref<32x72xbf16, #tpu.memory_space<vmem>>, vector<4x72xbf16>,
    %c0_74 = arith.constant 0 : index
    %c0_75 = arith.constant 0 : index
    %391 = vector.load %arg14[%c0_74, %c0_75] : memref<32x72xbf16, #tpu.memory_space<vmem>>, vector<32x72xbf16>
    "tpu.trace_start"() <{level = 10 : i32, message = "mk,ck->mc"}> : () -> ()
    %cst_76 = arith.constant dense<0.000000e+00> : vector<32x8xf32>
    %392 = tpu.matmul %391, %291, %cst_76 {dimension_numbers = #tpu.dot_dimension_numbers<[1], [1], [0], [0], [0, 0, 1, 0], [], []>} : vector<32x72xbf16>, vector<8x72xbf16>, vector<32x8xf32> -> vector<32x8xf32>
    "tpu.trace_stop"() : () -> ()
    %393 = vector.broadcast %294 : vector<1x8xf32> to vector<32x8xf32>
    %394 = arith.addf %392, %393 : vector<32x8xf32>
    %cst_77 = arith.constant 0.000000e+00 : f32
    %395 = vector.broadcast %cst_77 : f32 to vector<32x8xf32>
    %396 = arith.maximumf %394, %395 : vector<32x8xf32>
    %c0_78 = arith.constant 0 : index
    %c0_79 = arith.constant 0 : index
    %397 = vector.load %arg12[%c0_78, %c0_79] : memref<32x8xf32, #tpu.memory_space<vmem>>, vector<32x8xf32>
    tpu.vector_store %arg12[%c0_78, %c0_79], %396 {strides = array<i32>} : memref<32x8xf32, #tpu.memory_space<vmem>>, vector<32x8xf32>,
    return
  }
}

</mosaic_0001>

<bundles_post_ra>
// kernel: tpu_custom_call.1
= control target key start
LH: loop header
LB: loop body
LE: loop exit
PB: predicated region body
PF: predicated region fallthrough
CT: control target
= control target key end

     0   :  { %s2385_s29 = smov 12   ;;  %s2386_s24 = smov 4   ;;  %vm154_vm0 = vcmask 31744   ;;  %vm378_vm1 = vcmask 293888   ;;  %vm319_vm2 = vcmask 64512   ;;  %vm321_vm3 = vcmask 97280   ;;  %s3777_s0 = inlined_call_operand.vmem [shape: f32[2,8,8,4], index: 0, kind: input, shape index: {}]   ;;  %s3778_s1 = inlined_call_operand.vmem [shape: f32[2,8,8,4], index: 1, kind: input, shape index: {}]   ;;  %s3779_s2 = inlined_call_operand.vmem [shape: f32[2,8,8,4], index: 2, kind: input, shape index: {}]   ;;  %s3780_s3 = inlined_call_operand.vmem [shape: f32[2,8,8,4], index: 3, kind: input, shape index: {}]   ;;  %s3781_s4 = inlined_call_operand.vmem [shape: f32[1,4], index: 4, kind: input, shape index: {}]   ;;  %s3782_s5 = inlined_call_operand.vmem [shape: f32[1,4], index: 5, kind: input, shape index: {}]   ;;  %s3783_s6 = inlined_call_operand.vmem [shape: f32[8,36], index: 6, kind: input, shape index: {}]   ;;  %s3784_s7 = inlined_call_operand.vmem [shape: f32[1,8], index: 7, kind: input, shape index: {}]   ;;  %s3785_s8 = inlined_call_operand.vmem [shape: f32[1,8], index: 8, kind: input, shape index: {}]   ;;  %s3786_s9 = inlined_call_operand.vmem [shape: f32[1,8], index: 9, kind: input, shape index: {}]   ;;  %s3787_s10 = inlined_call_operand.vmem [shape: f32[8,72], index: 10, kind: input, shape index: {}]   ;;  %s3788_s11 = inlined_call_operand.vmem [shape: f32[1,8], index: 11, kind: input, shape index: {}]   ;;  %s3789_s12 = inlined_call_operand.vmem [shape: f32[32,8], index: 12, kind: output, shape index: {}]  }
   0x1   :  { %v45_v0 = vld [vmem:[%s3777_s0 + $0x18] sm:$0xff]  ;;  %v46_v1 = vld [vmem:[%s3777_s0 + $0x20] sm:$0xff]  ;;  %v44_v10 = vld [vmem:[%s3777_s0 + $0x10] sm:$0xff]  ;;  %s2387_s25 = smov 8   ;;  %s2388_s19 = smov 20   ;;  %vm2394_vm4 = vmmov 0  }
   0x2   :  { %v61_v2 = vld [vmem:[%s3778_s1 + $0x18] sm:$0xff]  ;;  %v62_v3 = vld [vmem:[%s3778_s1 + $0x20] sm:$0xff]  ;;  %v60_v13 = vld [vmem:[%s3778_s1 + $0x10] sm:$0xff]  ;;  %s2389_s13 = smov 16   ;;  %s2390_s14 = smov 24   ;;  %vm323_vm5 = vcmask 130048  }
   0x3   :  { %v77_v4 = vmax.f32 %v45_v0, %v61_v2  ;;  %v93_v5 = vld [vmem:[%s3779_s2 + $0x18] sm:$0xff]  ;;  %v94_v6 = vld [vmem:[%s3779_s2 + $0x20] sm:$0xff]  ;;  %v78_v7 = vmax.f32 %v46_v1, %v62_v3  ;;  %v92_v14 = vld [vmem:[%s3779_s2 + $0x10] sm:$0xff]  ;;  %v76_v16 = vmax.f32 %v44_v10, %v60_v13  ;;  %vm325_vm6 = vcmask 162816  }
   0x4   :  { %v109_v8 = vld [vmem:[%s3780_s3 + $0x18] sm:$0xff]  ;;  %v110_v9 = vld [vmem:[%s3780_s3 + $0x20] sm:$0xff]  ;;  %v108_v15 = vld [vmem:[%s3780_s3 + $0x10] sm:$0xff]  ;;  %vm327_vm7 = vcmask 195584   ;;  %vm329_vm8 = vcmask 228352   ;;  %vm331_vm9 = vcmask 261120  }
   0x5   :  { %v125_v11 = vmax.f32 %v93_v5, %v109_v8  ;;  %v126_v12 = vmax.f32 %v94_v6, %v110_v9  ;;  %v124_v17 = vmax.f32 %v92_v14, %v108_v15  ;;  %v47_v18 = vld [vmem:[%s3777_s0 + $0x28] sm:$0xff]  ;;  %v48_v27 = vld [vmem:[%s3777_s0 + $0x30] sm:$0xff]  ;;  %v50_v38 = vld [vmem:[%s3777_s0 + $0x40] sm:$0xff]  ;;  %vm590_vm10 = vcmask 289794  }
   0x6   :  { %v63_v19 = vld [vmem:[%s3778_s1 + $0x28] sm:$0xff]  ;;  %v64_v28 = vld [vmem:[%s3778_s1 + $0x30] sm:$0xff]  ;;  %v66_v42 = vld [vmem:[%s3778_s1 + $0x40] sm:$0xff]  ;;  %vm592_vm11 = vcmask 286720   ;;  %vm635_vm12 = vcmask 289793   ;;  %vm498_vm13 = vcmask 288768  }
   0x7   :  { %v95_v20 = vld [vmem:[%s3779_s2 + $0x28] sm:$0xff]  ;;  %v2509_v21 = vmax.f32 %v77_v4, %v125_v11  ;;  %v2511_v22 = vmax.f32 %v78_v7, %v126_v12  ;;  %v79_v23 = vmax.f32 %v47_v18, %v63_v19  ;;  %v2516_v25 = vmax.f32 %v76_v16, %v124_v17  ;;  %v96_v31 = vld [vmem:[%s3779_s2 + $0x30] sm:$0xff]  ;;  %v98_v47 = vld [vmem:[%s3779_s2 + $0x40] sm:$0xff] }
   0x8   :  { %v111_v24 = vld [vmem:[%s3780_s3 + $0x28] sm:$0xff]  ;;  %v112_v32 = vld [vmem:[%s3780_s3 + $0x30] sm:$0xff]  ;;  %v80_v40 = vmax.f32 %v48_v27, %v64_v28  ;;  %v114_v49 = vld [vmem:[%s3780_s3 + $0x40] sm:$0xff]  ;;  %v82_v56 = vmax.f32 %v50_v38, %v66_v42  ;;  %vm543_vm14 = vcmask 289795   ;;  %vm545_vm15 = vcmask 287744  }
   0x9   :  { %v127_v26 = vmax.f32 %v95_v20, %v111_v24  ;;  %v1994_v29 = vpack.i.bf16 %v2511_v22, %v2509_v21  ;;  %v2527_v30 = vrot.slane %v2509_v21, 1  ;;  %v2536_v33 = vrot.slane %v2516_v25, 1  ;;  %v43_v37 = vld [vmem:[%s3777_s0 + $0x8] sm:$0xff]  ;;  %v42_v4 = vld [vmem:[%s3777_s0] sm:$0xff]  ;;  %v2636_v11 = vld [vmem:[%s3777_s0 + $0x70] sm:$0xff] }
   0xa   :  { %v2541_v35 = vrot.slane %v2511_v22, 2  ;;  %v2544_v36 = vrot.slane %v2516_v25, 2  ;;  %v2554_v39 = vrot.slane %v2509_v21, 2  ;;  %v59_v41 = vld [vmem:[%s3778_s1 + $0x8] sm:$0xff]  ;;  %v128_v46 = vmax.f32 %v96_v31, %v112_v32  ;;  %v58_v8 = vld [vmem:[%s3778_s1] sm:$0xff]  ;;  %v52_v12 = vld [vmem:[%s3777_s0 + $0x50] sm:$0xff] }
   0xb   :  { %v2538_v34 = vmax.f32 %v79_v23, %v127_v26  ;;  %1995 = vrot.lane.b32.xlu1 %v1994_v29, %s2385_s29  ;;  %v91_v43 = vld [vmem:[%s3779_s2 + $0x8] sm:$0xff]  ;;  %v1999_v44 = vpack.i.bf16 %v2527_v30, %v2536_v33  ;;  %v2580_v50 = vrot.slane %v2511_v22, 1  ;;  %v75_v55 = vmax.f32 %v43_v37, %v59_v41  ;;  %v90_v9 = vld [vmem:[%s3779_s2] sm:$0xff]  ;;  %v68_v16 = vld [vmem:[%s3778_s1 + $0x50] sm:$0xff] }
   0xc   :  { %v107_v48 = vld [vmem:[%s3780_s3 + $0x8] sm:$0xff]  ;;  %v2004_v53 = vpack.i.bf16 %v2554_v39, %v2544_v36  ;;  %v2590_v54 = vmax.f32 %v80_v40, %v128_v46  ;;  %v130_v58 = vmax.f32 %v98_v47, %v114_v49  ;;  %v2024_v59 = vpack.i.bf16 %v2541_v35, %v2554_v39  ;;  %v106_v10 = vld [vmem:[%s3780_s3] sm:$0xff]  ;;  %v100_v17 = vld [vmem:[%s3779_s2 + $0x50] sm:$0xff] }
   0xd   :  { %v2568_v45 = vrot.slane %v2538_v34, 2  ;;  %v2583_v51 = vrot.slane %v2538_v34, 1  ;;  %2000 = vrot.lane.b32.xlu0 %v1999_v44, %s2386_s24  ;;  %v123_v57 = vmax.f32 %v91_v43, %v107_v48  ;;  %v51_v0 = vld [vmem:[%s3777_s0 + $0x48] sm:$0xff]  ;;  %v2014_v13 = vpack.i.bf16 %v2580_v50, %v2527_v30  ;;  %v116_v18 = vld [vmem:[%s3780_s3 + $0x50] sm:$0xff]  ;;  %v49_v31 = vld [vmem:[%s3777_s0 + $0x38] sm:$0xff] }
   0xe   :  { %v656_v60 = vrot.slane %v2590_v54, 1  ;;  %v2601_v63 = vmax.f32 %v82_v56, %v130_v58  ;;  %v67_v1 = vld [vmem:[%s3778_s1 + $0x48] sm:$0xff]  ;;  %v72_v19 = vld [vmem:[%s3778_s1 + $0x70] sm:$0xff]  ;;  %v660_v24 = vrot.slane %v2590_v54, 2  ;;  %v74_v26 = vmax.f32 %v42_v4, %v58_v8  ;;  %v65_v32 = vld [vmem:[%s3778_s1 + $0x38] sm:$0xff] }
   0xf   :  { %v2019_v52 = vpack.i.bf16 %v2541_v35, %v2568_v45  ;;  %v2009_v61 = vpack.i.bf16 %v2580_v50, %v2583_v51  ;;  %v2599_v62 = vmax.f32 %v75_v55, %v123_v57  ;;  %v99_v2 = vld [vmem:[%s3779_s2 + $0x48] sm:$0xff]  ;;  %v83_v14 = vmax.f32 %v51_v0, %v67_v1  ;;  %v104_v20 = vld [vmem:[%s3779_s2 + $0x70] sm:$0xff]  ;;  %v97_v44 = vld [vmem:[%s3779_s2 + $0x38] sm:$0xff] }
  0x10   :  { %v115_v3 = vld [vmem:[%s3780_s3 + $0x48] sm:$0xff]  ;;  %v2039_v5 = vpack.i.bf16 %v2583_v51, %v656_v60  ;;  %v720_v7 = vrot.slane %v2601_v63, 1  ;;  %v120_v23 = vld [vmem:[%s3780_s3 + $0x70] sm:$0xff]  ;;  %v122_v27 = vmax.f32 %v90_v9, %v106_v10  ;;  %v84_v38 = vmax.f32 %v52_v12, %v68_v16  ;;  %v113_v46 = vld [vmem:[%s3780_s3 + $0x38] sm:$0xff] }
  0x11   :  { %2020 = vrot.lane.b32.xlu1 %v2019_v52, %s2387_s25  ;;  %2005 = vrot.lane.b32.xlu0 %v2004_v53, %s2387_s25  ;;  %v469_v6 = vrot.slane %v2599_v62, 1  ;;  %v131_v15 = vmax.f32 %v99_v2, %v115_v3  ;;  %v158_v37 = vsel %vm154_vm0, %v2599_v62, 0.0  ;;  %v132_v40 = vmax.f32 %v100_v17, %v116_v18  ;;  %v57_v49 = vld [vmem:[%s3777_s0 + $0x78] sm:$0xff]  ;;  %v54_v12 = vld [vmem:[%s3777_s0 + $0x60] sm:$0xff] }
  0x12   :  { %v88_v41 = vmax.f32 %v2636_v11, %v72_v19  ;;  %v136_v42 = vmax.f32 %v104_v20, %v120_v23  ;;  %v2029_v43 = vpack.i.bf16 %v2538_v34, %v2590_v54  ;;  %v156_v47 = vsel %vm154_vm0, %v2601_v63, 0.0  ;;  %v73_v57 = vld [vmem:[%s3778_s1 + $0x78] sm:$0xff]  ;;  %v70_v17 = vld [vmem:[%s3778_s1 + $0x60] sm:$0xff] }
  0x13   :  { %v2044_v28 = vpack.i.bf16 %v720_v7, %v469_v6  ;;  %v2666_v29 = vmax.f32 %v83_v14, %v131_v15  ;;  %v2054_v48 = vpack.i.bf16 %v2568_v45, %v660_v24  ;;  %v2694_v52 = vmax.f32 %v74_v26, %v122_v27  ;;  %v69_v7 = vld [vmem:[%s3778_s1 + $0x58] sm:$0xff]  ;;  %v102_v18 = vld [vmem:[%s3779_s2 + $0x60] sm:$0xff] }
  0x14   :  { %v473_v55 = vrot.slane %v2599_v62, 2  ;;  %v724_v56 = vrot.slane %v2601_v63, 2  ;;  %v81_v58 = vmax.f32 %v49_v31, %v65_v32  ;;  %v129_v1 = vmax.f32 %v97_v44, %v113_v46  ;;  %v101_v10 = vld [vmem:[%s3779_s2 + $0x58] sm:$0xff]  ;;  %v118_v19 = vld [vmem:[%s3780_s3 + $0x60] sm:$0xff]  ;;  %v119_v44 = vld [vmem:[%s3780_s3 + $0x68] sm:$0xff] }
  0x15   :  { %2025 = vrot.lane.b32.xlu1 %v2024_v59, %s2388_s19  ;;  %2010 = vrot.lane.b32.xlu0 %v2009_v61, %s2386_s24  ;;  %v159_v53 = vsel %vm154_vm0, %v2666_v29, 0.0  ;;  %v105_v59 = vld [vmem:[%s3779_s2 + $0x78] sm:$0xff]  ;;  %v155_v2 = vsel %vm154_vm0, %v2694_v52, 0.0  ;;  %v2712_v3 = vmax.f32 %v84_v38, %v132_v40  ;;  %v161_v4 = vsel %vm154_vm0, %v2516_v25, 0.0  ;;  %v71_v40 = vld [vmem:[%s3778_s1 + $0x68] sm:$0xff]  ;;  %s2391_s1 = smov 28  }
  0x16   :  { %v121_v61 = vld [vmem:[%s3780_s3 + $0x78] sm:$0xff]  ;;  %v160_v0 = vadd.f32 %v159_v53, %v158_v37  ;;  %v2034_v8 = vpack.i.bf16 %v2538_v34, %v2511_v22  ;;  %v157_v9 = vadd.f32 %v156_v47, %v155_v2  ;;  %v2059_v20 = vpack.i.bf16 %v724_v56, %v473_v55 }
  0x17   :  { %v117_v11 = vld [vmem:[%s3780_s3 + $0x58] sm:$0xff]  ;;  %v137_v14 = vmax.f32 %v105_v59, %v121_v61  ;;  %v162_v16 = vsel %vm154_vm0, %v2712_v3, 0.0  ;;  %v167_v31 = vsel %vm154_vm0, %v2511_v22, 0.0  ;;  %v2755_v32 = vmax.f32 %v88_v41, %v136_v42 }
  0x18   :  { %v180_v15 = vsel %vm154_vm0, %v160_v0, 0.0  ;;  %v179_v23 = vsel %vm154_vm0, %v157_v9, 0.0  ;;  %v163_v26 = vadd.f32 %v162_v16, %v161_v4  ;;  %v2049_v37 = vpack.i.bf16 %v2583_v51, %v2580_v50 }
  0x19   :  { %2040 = vrot.lane.b32.xlu1 %v2039_v5, %s2389_s13  ;;  %2015 = vrot.lane.b32.xlu0 %v2014_v13, %s2389_s13  ;;  %v53_v5 = vld [vmem:[%s3777_s0 + $0x58] sm:$0xff]  ;;  %v89_v13 = vmax.f32 %v57_v49, %v73_v57  ;;  %v2759_v38 = vmax.f32 %v81_v58, %v129_v1  ;;  %v181_v41 = vadd.f32 %v180_v15, %v179_v23  ;;  %v164_v46 = vsel %vm154_vm0, %v2509_v21, 0.0 }
  0x1a   :  { %v85_v27 = vmax.f32 %v53_v5, %v69_v7  ;;  %v133_v42 = vmax.f32 %v101_v10, %v117_v11  ;;  %v86_v50 = vmax.f32 %v54_v12, %v70_v17  ;;  %v134_v51 = vmax.f32 %v102_v18, %v118_v19 }
  0x1b   :  { %v2773_v47 = vmax.f32 %v89_v13, %v137_v14  ;;  %v182_v49 = vsel %vm154_vm0, %v163_v26, 0.0  ;;  %v173_v59 = vsel %vm154_vm0, %v2590_v54, 0.0  ;;  %v174_v61 = vsel %vm154_vm0, %v2755_v32, 0.0 }
  0x1c   :  { %v2779_v53 = vmax.f32 %v85_v27, %v133_v42  ;;  %v2781_v56 = vmax.f32 %v86_v50, %v134_v51  ;;  %v176_v0 = vsel %vm154_vm0, %v2759_v38, 0.0  ;;  %v2064_v1 = vpack.i.bf16 %v2568_v45, %v2541_v35 }
  0x1d   :  { %2045 = vrot.lane.b32.xlu1 %v2044_v28, %s2386_s24  ;;  %2030 = vrot.lane.b32.xlu0 %v2029_v43, %s2385_s29  ;;  %v55_v28 = vld [vmem:[%s3777_s0 + $0x68] sm:$0xff]  ;;  %v693_v2 = vrot.slane %v2759_v38, 1  ;;  %v183_v4 = vadd.f32 %v182_v49, %v181_v41  ;;  %v697_v9 = vrot.slane %v2759_v38, 2  ;;  %v2074_v35 = vpack.i.bf16 %v2666_v29, %v2516_v25 }
  0x1e   :  { %v103_v43 = vld [vmem:[%s3779_s2 + $0x68] sm:$0xff]  ;;  %v87_v57 = vmax.f32 %v55_v28, %v71_v40  ;;  %v165_v5 = vsel %vm154_vm0, %v2779_v53, 0.0  ;;  %v168_v7 = vsel %vm154_vm0, %v2781_v56, 0.0  ;;  %v170_v12 = vsel %vm154_vm0, %v2538_v34, 0.0  ;;  %s2392_s2 = smov 32  }
  0x1f   :  { %v135_v58 = vmax.f32 %v103_v43, %v119_v44  ;;  %v166_v10 = vadd.f32 %v165_v5, %v164_v46  ;;  %v169_v11 = vadd.f32 %v168_v7, %v167_v31  ;;  %v175_v13 = vadd.f32 %v174_v61, %v173_v59 }
  0x20   :  { %v732_v14 = vrot.slane %v2666_v29, 1  ;;  %v2079_v18 = vpack.i.bf16 %v656_v60, %v693_v2  ;;  %v2089_v23 = vpack.i.bf16 %v660_v24, %v697_v9  ;;  %v736_v26 = vrot.slane %v2666_v29, 2 }
  0x21   :  { %2055 = vrot.lane.b32.xlu1 %v2054_v48, %s2388_s19  ;;  %2035 = vrot.lane.b32.xlu0 %v2034_v8, %s2390_s14  ;;  %v2069_v48 = vpack.i.bf16 %v2590_v54, %v2759_v38  ;;  %v177_v8 = vsel %vm154_vm0, %v2773_v47, 0.0  ;;  %v2803_v45 = vmax.f32 %v87_v57, %v135_v58  ;;  %v184_v15 = vsel %vm154_vm0, %v166_v10, 0.0 }
  0x22   :  { %v186_v16 = vsel %vm154_vm0, %v169_v11, 0.0  ;;  %v178_v17 = vadd.f32 %v177_v8, %v176_v0  ;;  %v185_v19 = vadd.f32 %v184_v15, %v183_v4  ;;  %v2819_v27 = vrot.slane %v2712_v3, 2 }
  0x23   :  { %v2826_v60 = vrot.slane %v2803_v45, 2  ;;  %v913_v40 = vrot.slane %v2755_v32, 1  ;;  %v190_v43 = vsel %vm154_vm0, %v175_v13, 0.0  ;;  %v2084_v24 = vpack.i.bf16 %v732_v14, %v2536_v33 }
  0x24   :  { %v187_v31 = vadd.f32 %v186_v16, %v185_v19  ;;  %v457_v41 = vrot.slane %v2694_v52, 1  ;;  %v192_v46 = vsel %vm154_vm0, %v178_v17, 0.0  ;;  %v2099_v49 = vpack.i.bf16 %v736_v26, %v2544_v36 }
  0x25   :  { %2060 = vrot.lane.b32.xlu1 %v2059_v20, %s2387_s25  ;;  %2050 = vrot.lane.b32.xlu0 %v2049_v37, %s2391_s1  ;;  %v171_v20 = vsel %vm154_vm0, %v2803_v45, 0.0  ;;  %v2823_v37 = vrot.slane %v2803_v45, 1  ;;  %v2184_v50 = vpack.i.bf16 %v2826_v60, %v2819_v27  ;;  %v461_v61 = vrot.slane %v2694_v52, 2 }
  0x26   :  { %v172_v28 = vadd.f32 %v171_v20, %v170_v12  ;;  %v2094_v59 = vpack.i.bf16 %v732_v14, %v457_v41  ;;  %v2856_v2 = vrot.slane %v2712_v3, 1  ;;  %v2114_v11 = vpack.i.bf16 %v2712_v3, %v2599_v62 }
  0x27   :  { %v2839_v51 = vpack.i.bf16 %v913_v40, %v2823_v37  ;;  %v2104_v7 = vpack.i.bf16 %v736_v26, %v461_v61  ;;  %v2129_v12 = vpack.i.bf16 %v2819_v27, %v2554_v39  ;;  %v2870_v13 = vrot.slane %v2779_v53, 1 }
  0x28   :  { %v188_v44 = vsel %vm154_vm0, %v172_v28, 0.0  ;;  %v2119_v9 = vpack.i.bf16 %v2856_v2, %v2527_v30  ;;  %v2873_v14 = vrot.slane %v2781_v56, 1  ;;  %v2124_v30 = vpack.i.bf16 %v2856_v2, %v469_v6 }
  0x29   :  { %2070 = vrot.lane.b32.xlu1 %v2069_v48, %s2390_s14  ;;  %2065 = vrot.lane.b32.xlu0 %v2064_v1, %s2392_s2  ;;  %v189_v42 = vadd.f32 %v188_v44, %v187_v31  ;;  %v917_v48 = vrot.slane %v2755_v32, 2  ;;  %v2109_v1 = vpack.i.bf16 %v2712_v3, %v2509_v21  ;;  %v2880_v16 = vrot.slane %v2779_v53, 2 }
  0x2a   :  { %v2149_v39 = vpack.i.bf16 %v2873_v14, %v2870_v13  ;;  %v2134_v6 = vpack.i.bf16 %v2819_v27, %v473_v55  ;;  %v2139_v20 = vpack.i.bf16 %v2779_v53, %v2516_v25 }
  0x2b   :  { %v191_v57 = vadd.f32 %v190_v43, %v189_v42  ;;  %v2848_v58 = vpack.i.bf16 %v917_v48, %v2826_v60  ;;  %v2154_v26 = vpack.i.bf16 %v2880_v16, %v2544_v36 }
  0x2d   :  { %2075 = vrot.lane.b32.xlu1 %v2074_v35, %s2385_s29  ;;  %2080 = vrot.lane.b32.xlu0 %v2079_v18, %s2391_s1  ;;  %v193_v0 = vadd.f32 %v192_v46, %v191_v57  ;;  %v2886_v18 = vrot.slane %v2781_v56, 2 }
  0x2f   :  { %v194_v4 = vsel %vm154_vm0, %v193_v0, 0.0  ;;  %v2179_v36 = vpack.i.bf16 %v2826_v60, %v2886_v18 }
  0x30   :  { %v195_v5 = vrot.slane %v194_v4, 4 }
  0x31   :  { %2090 = vrot.lane.b32.xlu1 %v2089_v23, %s2392_s2  ;;  %2085 = vrot.lane.b32.xlu0 %v2084_v24, %s2389_s13  ;;  %v2144_v23 = vpack.i.bf16 %v2870_v13, %v2536_v33  ;;  %v2159_v33 = vpack.i.bf16 %v2886_v18, %v2880_v16 }
  0x32   :  { %v196_v8 = vadd.f32 %v195_v5, %v194_v4 }
  0x34   :  { %v197_v10 = vrot.slane %v196_v8, 2 }
  0x35   :  { %2100 = vrot.lane.b32.xlu1 %v2099_v49, %s2388_s19  ;;  %2095 = vrot.lane.b32.xlu0 %v2094_v59, %s2386_s24 }
  0x36   :  { %v198_v35 = vadd.f32 %v197_v10, %v196_v8 }
  0x38   :  { %v199_v15 = vrot.slane %v198_v35, 1 }
  0x39   :  { %2110 = vrot.lane.b32.xlu1 %v2109_v1, %s2390_s14  ;;  %2105 = vrot.lane.b32.xlu0 %v2104_v7, %s2387_s25 }
  0x3a   :  { %v200_v17 = vadd.f32 %v199_v15, %v198_v35 }
  0x3c   :  { %v2888_v19 = vmul.f32 0.0078125, %v200_v17 }
  0x3d   :  { %2120 = vrot.lane.b32.xlu1 %v2119_v9, %s2391_s1  ;;  %2115 = vrot.lane.b32.xlu0 %v2114_v11, %s2385_s29 }
  0x3e   :  { %v208_v28 = vsub.f32 %v2538_v34, %v2888_v19  ;;  %v216_v31 = vsub.f32 %v2803_v45, %v2888_v19  ;;  %v203_v55 = vsub.f32 %v2694_v52, %v2888_v19  ;;  %v204_v43 = vsub.f32 %v2599_v62, %v2888_v19 }
  0x3f   :  { %v205_v24 = vsub.f32 %v2516_v25, %v2888_v19  ;;  %v206_v44 = vsub.f32 %v2509_v21, %v2888_v19  ;;  %v207_v41 = vsub.f32 %v2511_v22, %v2888_v19  ;;  %v211_v42 = vsub.f32 %v2601_v63, %v2888_v19 }
  0x40   :  { %v212_v46 = vsub.f32 %v2666_v29, %v2888_v19  ;;  %v213_v49 = vsub.f32 %v2712_v3, %v2888_v19  ;;  %v209_v57 = vsub.f32 %v2590_v54, %v2888_v19  ;;  %v214_v59 = vsub.f32 %v2779_v53, %v2888_v19 }
  0x41   :  { %2130 = vrot.lane.b32.xlu1 %v2129_v12, %s2392_s2  ;;  %2125 = vrot.lane.b32.xlu0 %v2124_v30, %s2389_s13  ;;  %v215_v61 = vsub.f32 %v2781_v56, %v2888_v19  ;;  %v217_v0 = vsub.f32 %v2755_v32, %v2888_v19  ;;  %v224_v1 = vmul.f32 %v208_v28, %v208_v28 }
  0x42   :  { %v232_v4 = vmul.f32 %v216_v31, %v216_v31  ;;  %v219_v5 = vmul.f32 %v203_v55, %v203_v55  ;;  %v220_v7 = vmul.f32 %v204_v43, %v204_v43  ;;  %v210_v8 = vsub.f32 %v2759_v38, %v2888_v19 }
  0x43   :  { %v218_v54 = vsub.f32 %v2773_v47, %v2888_v19  ;;  %v221_v9 = vmul.f32 %v205_v24, %v205_v24  ;;  %v222_v10 = vmul.f32 %v206_v44, %v206_v44  ;;  %v223_v11 = vmul.f32 %v207_v41, %v207_v41 }
  0x44   :  { %v227_v35 = vmul.f32 %v211_v42, %v211_v42  ;;  %v228_v12 = vmul.f32 %v212_v46, %v212_v46  ;;  %v229_v15 = vmul.f32 %v213_v49, %v213_v49  ;;  %v225_v30 = vmul.f32 %v209_v57, %v209_v57 }
  0x45   :  { %2150 = vrot.lane.b32.xlu1 %v2149_v39, %s2386_s24  ;;  %2135 = vrot.lane.b32.xlu0 %v2134_v6, %s2388_s19  ;;  %v230_v17 = vmul.f32 %v214_v59, %v214_v59  ;;  %v231_v39 = vmul.f32 %v215_v61, %v215_v61  ;;  %v233_v6 = vmul.f32 %v217_v0, %v217_v0  ;;  %v238_v28 = vsel %vm154_vm0, %v220_v7, 0.0 }
  0x46   :  { %v236_v38 = vsel %vm154_vm0, %v227_v35, 0.0  ;;  %v239_v31 = vsel %vm154_vm0, %v228_v12, 0.0  ;;  %v241_v43 = vsel %vm154_vm0, %v221_v9, 0.0  ;;  %v242_v24 = vsel %vm154_vm0, %v229_v15, 0.0 }
  0x47   :  { %v243_v44 = vadd.f32 %v242_v24, %v241_v43  ;;  %v244_v41 = vsel %vm154_vm0, %v222_v10, 0.0  ;;  %v247_v42 = vsel %vm154_vm0, %v223_v11, 0.0  ;;  %v248_v49 = vsel %vm154_vm0, %v231_v39, 0.0 }
  0x48   :  { %v250_v57 = vsel %vm154_vm0, %v224_v1, 0.0  ;;  %v251_v59 = vsel %vm154_vm0, %v232_v4, 0.0  ;;  %v226_v61 = vmul.f32 %v210_v8, %v210_v8  ;;  %v234_v0 = vmul.f32 %v218_v54, %v218_v54 }
  0x49   :  { %2155 = vrot.lane.b32.xlu1 %v2154_v26, %s2392_s2  ;;  %2140 = vrot.lane.b32.xlu0 %v2139_v20, %s2390_s14  ;;  %v235_v26 = vsel %vm154_vm0, %v219_v5, 0.0  ;;  %v240_v20 = vadd.f32 %v239_v31, %v238_v28  ;;  %v249_v5 = vadd.f32 %v248_v49, %v247_v42  ;;  %v262_v9 = vsel %vm154_vm0, %v243_v44, 0.0 }
  0x4a   :  { %v237_v55 = vadd.f32 %v236_v38, %v235_v26  ;;  %v2164_v10 = vpack.i.bf16 %v2803_v45, %v2781_v56  ;;  %v253_v11 = vsel %vm154_vm0, %v225_v30, 0.0  ;;  %v254_v1 = vsel %vm154_vm0, %v233_v6, 0.0 }
  0x4b   :  { %v252_v4 = vadd.f32 %v251_v59, %v250_v57  ;;  %v256_v54 = vsel %vm154_vm0, %v226_v61, 0.0  ;;  %v257_v12 = vsel %vm154_vm0, %v234_v0, 0.0  ;;  %v266_v39 = vsel %vm154_vm0, %v249_v5, 0.0 }
  0x4c   :  { %v259_v7 = vsel %vm154_vm0, %v237_v55, 0.0  ;;  %v258_v26 = vadd.f32 %v257_v12, %v256_v54  ;;  %v2174_v31 = vpack.i.bf16 %v2823_v37, %v2856_v2  ;;  %v290_v0 = vlaneseq  ;;  %v282_v2 = vld [vmem:[%s3781_s4] sm:$0x1] }
  0x4d   :  { %2180 = vrot.lane.b32.xlu1 %v2179_v36, %s2388_s19  ;;  %2145 = vrot.lane.b32.xlu0 %v2144_v23, %s2391_s1  ;;  %v245_v36 = vsel %vm154_vm0, %v230_v17, 0.0  ;;  %v260_v23 = vsel %vm154_vm0, %v240_v20, 0.0  ;;  %v255_v17 = vadd.f32 %v254_v1, %v253_v11  ;;  %v268_v6 = vsel %vm154_vm0, %v252_v4, 0.0  ;;  %v286_v54 = vld [vmem:[%s3782_s5] sm:$0x1] }
  0x4e   :  { %v246_v46 = vadd.f32 %v245_v36, %v244_v41  ;;  %v261_v35 = vadd.f32 %v260_v23, %v259_v7  ;;  %v272_v20 = vsel %vm154_vm0, %v258_v26, 0.0 }
  0x4f   :  { %v270_v28 = vsel %vm154_vm0, %v255_v17, 0.0 }
  0x50   :  { %v264_v8 = vsel %vm154_vm0, %v246_v46, 0.0  ;;  %v263_v15 = vadd.f32 %v262_v9, %v261_v35 }
  0x51   :  { %2160 = vrot.lane.b32.xlu0 %v2159_v33, %s2387_s25  ;;  %v2169_v33 = vpack.i.bf16 %v2823_v37, %v2873_v14  ;;  %v291_v37 = vshrl.u32 %v290_v0, 7 }
  0x52   :  { %v265_v30 = vadd.f32 %v264_v8, %v263_v15 }
  0x53   :  { %v2980_v5 = vsub.s32 0, %v291_v37 }
  0x54   :  { %v267_v38 = vadd.f32 %v266_v39, %v265_v30 }
  0x55   :  { %2165 = vrot.lane.b32.xlu0 %v2164_v10, %s2385_s29 }
  0x56   :  { %v269_v55 = vadd.f32 %v268_v6, %v267_v38 }
  0x58   :  { %v271_v43 = vadd.f32 %v270_v28, %v269_v55 }
  0x59   :  { %2170 = vrot.lane.b32.xlu0 %v2169_v33, %s2389_s13  ;;  %v2393_v33 = vmov 0.0  }
  0x5a   :  { %v273_v24 = vadd.f32 %v272_v20, %v271_v43  ;;  %1977 = vmatprep.subr.bf16.mxu1 %v2393_v33  ;;  %1939 = vmatprep.subr.mxu0 %v2393_v33 }
  0x5b   :  { %1950 = vmatprep.mubr.msk.bf16.mxu1 %vm2394_vm4, %v2393_v33  ;;  %1941 = vmatprep.mubr.msk.f32.mxu0 %vm2394_vm4, %v2393_v33 }
  0x5c   :  { %v274_v44 = vsel %vm154_vm0, %v273_v24, 0.0 }
  0x5d   :  { %2175 = vrot.lane.b32.xlu0 %v2174_v31, %s2386_s24  ;;  %v275_v41 = vrot.slane %v274_v44, 4 }
  0x5f   :  { %v276_v36 = vadd.f32 %v275_v41, %v274_v44 }
  0x61   :  { %v277_v42 = vrot.slane %v276_v36, 2 }
  0x63   :  { %v278_v46 = vadd.f32 %v277_v42, %v276_v36 }
  0x65   :  { %v279_v49 = vrot.slane %v278_v46, 1 }
  0x67   :  { %v280_v57 = vadd.f32 %v279_v49, %v278_v46 }
  0x69   :  { %v281_v59 = vmul.f32 0.0078125, %v280_v57 }
  0x6b   :  { %v283_v61 = vadd.f32 1e-05, %v281_v59 }
  0x6d   :  { %2381 = vrsqrt.f32 %v283_v61 }
  0x7a   :  { %v2382_v23 = vpop.eup %2381 }
  0x7b   :  { %v2984_v9 = vmul.f32 %v2382_v23, %v282_v2 }
  0x7d   :  { %v2982_v7 = vpop.permute.xlu1 %1995  ;;  %v293_v11 = vrot.slane %v2984_v9, %v2980_v5  ;;  %v287_v8 = vmul.f32 %v2984_v9, %v2888_v19  ;;  %v3012_v19 = vld [vmem:[%s3783_s6] sm:$0xff] }
  0x7e   :  { %1940 = vmatpush3.xpose.msk.msra.mxu0 %vm378_vm1, %v3012_v19  ;;  %v1998_v41 = vunpack.i.h.bf16 %v2982_v7 }
  0x7f   :  { %v2001_v10 = vpop.permute.xlu0 %2000  ;;  %300 = vrot.lane.b32.xlu0 %v293_v11, %s2385_s29  ;;  %294 = vrot.lane.b32.xlu1 %v293_v11, %s2386_s24  ;;  %v3007_v30 = vsub.f32 %v286_v54, %v287_v8 }
  0x80   :  { %v2003_v15 = vunpack.i.h.bf16 %v2001_v10  ;;  %v2002_v17 = vunpack.i.l.bf16 %v2001_v10  ;;  %1944 = vmatprep.subr.bf16.mxu0 %v2393_v33 }
  0x81   :  { %v3027_v43 = vrot.slane %v3007_v30, %v2980_v5 }
  0x82   :  { %v621_v31 = vsel %vm154_vm0, %v2509_v21, %v2003_v15  ;;  %v574_v55 = vsel %vm154_vm0, %v2516_v25, %v2002_v17  ;;  %v1997_v21 = vunpack.i.l.bf16 %v2982_v7 }
  0x83   :  { %v2988_v1 = vpop.permute.xlu1 %2020  ;;  %v2006_v35 = vpop.permute.xlu0 %2005  ;;  %306 = vrot.lane.b32.xlu0 %v293_v11, %s2388_s19  ;;  %297 = vrot.lane.b32.xlu1 %v293_v11, %s2387_s25 }
  0x84   :  { %v2008_v38 = vunpack.i.h.bf16 %v2006_v35  ;;  %v2007_v28 = vunpack.i.l.bf16 %v2006_v35  ;;  %v2023_v24 = vunpack.i.h.bf16 %v2988_v1  ;;  %v2022_v49 = vunpack.i.l.bf16 %v2988_v1 }
  0x86   :  { %v575_v42 = vsel %vm319_vm2, %v574_v55, %v2007_v28  ;;  %v622_v46 = vsel %vm319_vm2, %v621_v31, %v2008_v38 }
  0x87   :  { %v2992_v4 = vpop.permute.xlu1 %2025  ;;  %v2011_v12 = vpop.permute.xlu0 %2010  ;;  %309 = vrot.lane.b32.xlu0 %v293_v11, %s2390_s14  ;;  %303 = vrot.lane.b32.xlu1 %v293_v11, %s2389_s13  ;;  %v576_v2 = vsel %vm321_vm3, %v575_v42, %v1997_v21  ;;  %v623_v7 = vsel %vm321_vm3, %v622_v46, %v1998_v41 }
  0x88   :  { %v2013_v6 = vunpack.i.h.bf16 %v2011_v12  ;;  %v2012_v44 = vunpack.i.l.bf16 %v2011_v12  ;;  %v2028_v1 = vunpack.i.h.bf16 %v2992_v4  ;;  %v2027_v35 = vunpack.i.l.bf16 %v2992_v4 }
  0x89   :  { %v2189_v12 = vpack.i.bf16 %v2755_v32, %v2803_v45 }
  0x8a   :  { %v664_v25 = vsel %vm154_vm0, %v2511_v22, %v2013_v6  ;;  %v701_v22 = vsel %vm154_vm0, %v2538_v34, %v2012_v44 }
  0x8b   :  { %v3001_v39 = vpop.permute.xlu1 %2040  ;;  %v2016_v26 = vpop.permute.xlu0 %2015  ;;  %312 = vrot.lane.b32.xlu0 %v293_v11, %s2391_s1  ;;  %315 = vrot.lane.b32.xlu1 %v293_v11, %s2392_s2  ;;  %v665_v37 = vsel %vm319_vm2, %v664_v25, %v2023_v24  ;;  %v702_v34 = vsel %vm319_vm2, %v701_v22, %v2022_v49 }
  0x8c   :  { %v2018_v61 = vunpack.i.h.bf16 %v2016_v26  ;;  %v2017_v0 = vunpack.i.l.bf16 %v2016_v26  ;;  %v2043_v10 = vunpack.i.h.bf16 %v3001_v39  ;;  %v2042_v4 = vunpack.i.l.bf16 %v3001_v39 }
  0x8d   :  { %v2194_v39 = vpack.i.bf16 %v2755_v32, %v2779_v53 }
  0x8e   :  { %v577_v15 = vsel %vm323_vm5, %v576_v2, %v2017_v0  ;;  %v624_v17 = vsel %vm323_vm5, %v623_v7, %v2018_v61 }
  0x8f   :  { %v3021_v20 = vpop.permute.xlu1 %2045  ;;  %v2031_v36 = vpop.permute.xlu0 %2030  ;;  %344 = vrot.lane.b32.xlu0 %v3027_v43, %s2385_s29  ;;  %338 = vrot.lane.b32.xlu1 %v3027_v43, %s2386_s24  ;;  %v578_v24 = vsel %vm325_vm6, %v577_v15, %v2027_v35  ;;  %v625_v45 = vsel %vm325_vm6, %v624_v17, %v2028_v1  ;;  %s2397_s24 = smov 56  }
  0x90   :  { %v2033_v57 = vunpack.i.h.bf16 %v2031_v36  ;;  %v2032_v11 = vunpack.i.l.bf16 %v2031_v36 }
  0x92   :  { %v666_v8 = vsel %vm321_vm3, %v665_v37, %v2033_v57  ;;  %v703_v38 = vsel %vm321_vm3, %v702_v34, %v2032_v11  ;;  %v2048_v34 = vunpack.i.h.bf16 %v3021_v20 }
  0x93   :  { %v2056_v59 = vpop.permute.xlu1 %2055  ;;  %v2036_v23 = vpop.permute.xlu0 %2035  ;;  %356 = vrot.lane.b32.xlu0 %v3027_v43, %s2391_s1  ;;  %341 = vrot.lane.b32.xlu1 %v3027_v43, %s2387_s25  ;;  %v667_v28 = vsel %vm323_vm5, %v666_v8, %v2043_v10  ;;  %v704_v36 = vsel %vm323_vm5, %v703_v38, %v2042_v4 }
  0x94   :  { %v2058_v6 = vunpack.i.h.bf16 %v2056_v59  ;;  %v2038_v31 = vunpack.i.h.bf16 %v2036_v23  ;;  %v2037_v55 = vunpack.i.l.bf16 %v2036_v23  ;;  %v2057_v25 = vunpack.i.l.bf16 %v2056_v59 }
  0x96   :  { %v668_v42 = vsel %vm325_vm6, %v667_v28, %v2058_v6  ;;  %v579_v49 = vsel %vm327_vm7, %v578_v24, %v2037_v55  ;;  %v626_v57 = vsel %vm327_vm7, %v625_v45, %v2038_v31  ;;  %v705_v23 = vsel %vm325_vm6, %v704_v36, %v2057_v25 }
  0x97   :  { %v3055_v54 = vpop.permute.xlu1 %2060  ;;  %v2051_v26 = vpop.permute.xlu0 %2050  ;;  %2190 = vrot.lane.b32.xlu0 %v2189_v12, %s2390_s14  ;;  %347 = vrot.lane.b32.xlu1 %v3027_v43, %s2389_s13  ;;  %v2047_v12 = vunpack.i.l.bf16 %v3021_v20 }
  0x98   :  { %v2053_v44 = vunpack.i.h.bf16 %v2051_v26  ;;  %v2052_v41 = vunpack.i.l.bf16 %v2051_v26  ;;  %v2063_v45 = vunpack.i.h.bf16 %v3055_v54 }
  0x9a   :  { %v580_v0 = vsel %vm329_vm8, %v579_v49, %v2052_v41  ;;  %v627_v37 = vsel %vm329_vm8, %v626_v57, %v2053_v44  ;;  %v2062_v44 = vunpack.i.l.bf16 %v3055_v54 }
  0x9b   :  { %v2071_v21 = vpop.permute.xlu1 %2070  ;;  %v2066_v46 = vpop.permute.xlu0 %2065  ;;  %2195 = vrot.lane.b32.xlu0 %v2194_v39, %s2385_s29  ;;  %350 = vrot.lane.b32.xlu1 %v3027_v43, %s2388_s19  ;;  %v527_v39 = vsel %vm154_vm0, %v2599_v62, %v2047_v12  ;;  %s2396_s29 = smov 48  }
  0x9c   :  { %v2068_v22 = vunpack.i.h.bf16 %v2066_v46  ;;  %v2067_v61 = vunpack.i.l.bf16 %v2066_v46  ;;  %v2073_v2 = vunpack.i.h.bf16 %v2071_v21  ;;  %v2072_v7 = vunpack.i.l.bf16 %v2071_v21 }
  0x9d   :  { %v752_v21 = vsel %vm154_vm0, %v2601_v63, %v2048_v34  ;;  %v528_v49 = vsel %vm319_vm2, %v527_v39, %v2062_v44 }
  0x9e   :  { %v581_v10 = vsel %vm331_vm9, %v580_v0, %v2067_v61  ;;  %v628_v11 = vsel %vm331_vm9, %v627_v37, %v2068_v22  ;;  %v669_v4 = vsel %vm327_vm7, %v668_v42, %v2073_v2  ;;  %v706_v6 = vsel %vm327_vm7, %v705_v23, %v2072_v7 }
  0x9f   :  { %v3081_v59 = vpop.permute.xlu1 %2075  ;;  %v1910_v1 = vpack.c.bf16 %v581_v10, %v581_v10  ;;  %v1911_v35 = vpack.c.bf16 %v628_v11, %v628_v11  ;;  %v2081_v8 = vpop.permute.xlu0 %2080  ;;  %821 = vrot.lane.b32.xlu0 %v2870_v13, %s2389_s13  ;;  %353 = vrot.lane.b32.xlu1 %v3027_v43, %s2390_s14  ;;  %v753_v57 = vsel %vm319_vm2, %v752_v21, %v2063_v45 }
  0xa0   :  { %v2083_v15 = vunpack.i.h.bf16 %v2081_v8  ;;  %v2082_v17 = vunpack.i.l.bf16 %v2081_v8  ;;  %v2078_v63 = vunpack.i.h.bf16 %v3081_v59  ;;  %v2077_v62 = vunpack.i.l.bf16 %v3081_v59 }
  0xa1   :  { %v586_v26 = vrot.slane %v1910_v1, 6  ;;  %v633_v38 = vrot.slane %v1911_v35, 7 }
  0xa2   :  { %v670_v31 = vsel %vm329_vm8, %v669_v4, %v2083_v15  ;;  %v707_v55 = vsel %vm329_vm8, %v706_v6, %v2082_v17  ;;  %v754_v37 = vsel %vm321_vm3, %v753_v57, %v2078_v63  ;;  %v962_v15 = vrot.slane %v2773_v47, 2 }
  0xa3   :  { %v2091_v28 = vpop.permute.xlu1 %2090  ;;  %v587_v41 = vrot.slane %v586_v26, 4  ;;  %591 = vst.msk [vmem:[#allocation2 + $0x4] sm:$0xc] %vm590_vm10, %v586_v26  ;;  %v2086_v13 = vpop.permute.xlu0 %2085  ;;  %824 = vrot.lane.b32.xlu0 %v2880_v16, %s2388_s19  ;;  %2185 = vrot.lane.b32.xlu1 %v2184_v50, %s2387_s25  ;;  %v529_v50 = vsel %vm321_vm3, %v528_v49, %v2077_v62 }
  0xa4   :  { %v2093_v20 = vunpack.i.h.bf16 %v2091_v28  ;;  %v2092_v24 = vunpack.i.l.bf16 %v2091_v28  ;;  %636 = vst.msk [vmem:[#allocation2 + $0x8] sm:$0xe] %vm635_vm12, %v633_v38  ;;  %v2088_v0 = vunpack.i.h.bf16 %v2086_v13  ;;  %v2087_v27 = vunpack.i.l.bf16 %v2086_v13 }
  0xa5   :  { %593 = vst.msk [vmem:[#allocation2 + $0x8] sm:$0x1] %vm592_vm11, %v587_v41 }
  0xa6   :  { %v671_v25 = vsel %vm331_vm9, %v670_v31, %v2093_v20  ;;  %v708_v36 = vsel %vm331_vm9, %v707_v55, %v2092_v24  ;;  %v530_v23 = vsel %vm323_vm5, %v529_v50, %v2087_v27  ;;  %v755_v10 = vsel %vm323_vm5, %v754_v37, %v2088_v0 }
  0xa7   :  { %v672_v54 = vpack.c.bf16 %v671_v25, %v671_v25  ;;  %v1912_v42 = vpack.c.bf16 %v708_v36, %v708_v36  ;;  %v2101_v46 = vpop.permute.xlu1 %2100  ;;  %v2096_v61 = vpop.permute.xlu0 %2095  ;;  %832 = vrot.lane.b32.xlu0 %v2873_v14, %s2391_s1  ;;  %359 = vrot.lane.b32.xlu1 %v3027_v43, %s2392_s2 }
  0xa8   :  { %v2103_v7 = vunpack.i.h.bf16 %v2101_v46  ;;  %v2102_v59 = vunpack.i.l.bf16 %v2101_v46  ;;  %v2098_v11 = vunpack.i.h.bf16 %v2096_v61  ;;  %v2097_v1 = vunpack.i.l.bf16 %v2096_v61 }
  0xa9   :  { %673 = vst.msk [vmem:[#allocation2 + $0xc] sm:$0x7] %vm498_vm13, %v672_v54  ;;  %v713_v22 = vrot.slane %v1912_v42, 5 }
  0xaa   :  { %v531_v17 = vsel %vm325_vm6, %v530_v23, %v2102_v59  ;;  %v756_v4 = vsel %vm325_vm6, %v755_v10, %v2103_v7  ;;  %v797_v6 = vsel %vm154_vm0, %v2666_v29, %v2098_v11 }
  0xab   :  { %v714_v16 = vrot.slane %v713_v22, 4  ;;  %717 = vst.msk [vmem:[#allocation2 + $0xc] sm:$0x8] %vm543_vm14, %v713_v22  ;;  %v2111_v60 = vpop.permute.xlu1 %2110  ;;  %v2106_v2 = vpop.permute.xlu0 %2105  ;;  %948 = vrot.lane.b32.xlu0 %v913_v40, %s2389_s13  ;;  %2200 = vrot.lane.b32.xlu1 %v2839_v51, %s2391_s1  ;;  %v489_v40 = vsel %vm154_vm0, %v2694_v52, %v2097_v1 }
  0xac   :  { %v2113_v14 = vunpack.i.h.bf16 %v2111_v60  ;;  %v2112_v43 = vunpack.i.l.bf16 %v2111_v60  ;;  %v2108_v26 = vunpack.i.h.bf16 %v2106_v2  ;;  %v2107_v38 = vunpack.i.l.bf16 %v2106_v2 }
  0xad   :  { %718 = vst.msk [vmem:[#allocation2 + $0x10] sm:$0x3] %vm545_vm15, %v714_v16 }
  0xae   :  { %v532_v28 = vsel %vm327_vm7, %v531_v17, %v2112_v43  ;;  %v757_v31 = vsel %vm327_vm7, %v756_v4, %v2113_v14  ;;  %v490_v13 = vsel %vm319_vm2, %v489_v40, %v2107_v38  ;;  %v798_v21 = vsel %vm319_vm2, %v797_v6, %v2108_v26 }
  0xaf   :  { %v2121_v35 = vpop.permute.xlu1 %2120  ;;  %v2116_v12 = vpop.permute.xlu0 %2115  ;;  %2205 = vrot.lane.b32.xlu1 %v2848_v58, %s2392_s2  ;;  %955 = vrot.lane.b32.xlu0 %v2773_v47, %s2390_s14 }
  0xb0   :  { %v2123_v8 = vunpack.i.h.bf16 %v2121_v35  ;;  %v2122_v34 = vunpack.i.l.bf16 %v2121_v35  ;;  %v2118_v45 = vunpack.i.h.bf16 %v2116_v12  ;;  %v2117_v44 = vunpack.i.l.bf16 %v2116_v12 }
  0xb2   :  { %v533_v29 = vsel %vm329_vm8, %v532_v28, %v2122_v34  ;;  %v758_v24 = vsel %vm329_vm8, %v757_v31, %v2123_v8  ;;  %v491_v49 = vsel %vm321_vm3, %v490_v13, %v2117_v44  ;;  %v799_v57 = vsel %vm321_vm3, %v798_v21, %v2118_v45 }
  0xb3   :  { %v2131_v51 = vpop.permute.xlu1 %2130  ;;  %v2126_v52 = vpop.permute.xlu0 %2125  ;;  %828 = vrot.lane.b32.xlu1 %v2781_v56, %s2390_s14  ;;  %963 = vrot.lane.b32.xlu0 %v962_v15, %s2392_s2 }
  0xb4   :  { %v2133_v55 = vunpack.i.h.bf16 %v2131_v51  ;;  %v2132_v20 = vunpack.i.l.bf16 %v2131_v51  ;;  %v2128_v46 = vunpack.i.h.bf16 %v2126_v52  ;;  %v2127_v63 = vunpack.i.l.bf16 %v2126_v52 }
  0xb6   :  { %v534_v41 = vsel %vm331_vm9, %v533_v29, %v2132_v20  ;;  %v759_v58 = vsel %vm331_vm9, %v758_v24, %v2133_v55  ;;  %v492_v27 = vsel %vm323_vm5, %v491_v49, %v2127_v63  ;;  %v800_v60 = vsel %vm323_vm5, %v799_v57, %v2128_v46 }
  0xb7   :  { %v1909_v39 = vpack.c.bf16 %v534_v41, %v534_v41  ;;  %v1913_v25 = vpack.c.bf16 %v759_v58, %v759_v58  ;;  %v3158_v36 = vpop.permute.xlu1 %2150  ;;  %v2136_v62 = vpop.permute.xlu0 %2135  ;;  %836 = vrot.lane.b32.xlu1 %v2886_v18, %s2392_s2  ;;  %v958_v18 = vrot.slane %v2773_v47, 1 }
  0xb8   :  { %v2138_v16 = vunpack.i.h.bf16 %v2136_v62  ;;  %v2137_v0 = vunpack.i.l.bf16 %v2136_v62 }
  0xb9   :  { %v539_v54 = vrot.slane %v1909_v39, 5  ;;  %v764_v42 = vrot.slane %v1913_v25, 6 }
  0xba   :  { %v493_v59 = vsel %vm325_vm6, %v492_v27, %v2137_v0  ;;  %v801_v23 = vsel %vm325_vm6, %v800_v60, %v2138_v16  ;;  %v2374_v16 = vld [vmem:[#allocation2 + $0x8] sm:$0xff]  }
  0xbb   :  { %v540_v22 = vrot.slane %v539_v54, 4  ;;  %544 = vst.msk [vmem:[#allocation2] sm:$0x8] %vm543_vm14, %v539_v54  ;;  %v765_v61 = vrot.slane %v764_v42, 4  ;;  %v2141_v50 = vpop.permute.xlu0 %2140  ;;  %v2156_v37 = vpop.permute.xlu1 %2155  ;;  %951 = vrot.lane.b32.xlu1 %v917_v48, %s2388_s19  ;;  %s2398_s19 = smov 64  }
  0xbc   :  { %768 = vst.msk [vmem:[#allocation2 + $0x10] sm:$0xc] %vm590_vm10, %v764_v42  ;;  %v2143_v2 = vunpack.i.h.bf16 %v2141_v50  ;;  %v2142_v7 = vunpack.i.l.bf16 %v2141_v50  ;;  %v2158_v11 = vunpack.i.h.bf16 %v2156_v37  ;;  %v2157_v1 = vunpack.i.l.bf16 %v2156_v37 }
  0xbd   :  { %546 = vst.msk [vmem:[#allocation2 + $0x4] sm:$0x3] %vm545_vm15, %v540_v22  ;;  %v2152_v37 = vunpack.i.l.bf16 %v3158_v36 }
  0xbe   :  { %769 = vst.msk [vmem:[#allocation2 + $0x14] sm:$0x1] %vm592_vm11, %v765_v61  ;;  %v494_v43 = vsel %vm327_vm7, %v493_v59, %v2142_v7  ;;  %v802_v8 = vsel %vm327_vm7, %v801_v23, %v2143_v2 }
  0xbf   :  { %v2146_v10 = vpop.permute.xlu0 %2145  ;;  %959 = vrot.lane.b32.xlu1 %v958_v18, %s2391_s1  ;;  %v3191_v38 = vpop.permute.xlu1 %2180 }
  0xc0   :  { %v2148_v35 = vunpack.i.h.bf16 %v2146_v10  ;;  %v2147_v14 = vunpack.i.l.bf16 %v2146_v10 }
  0xc2   :  { %v495_v32 = vsel %vm329_vm8, %v494_v43, %v2147_v14  ;;  %v803_v48 = vsel %vm329_vm8, %v802_v8, %v2148_v35 }
  0xc3   :  { %v496_v47 = vsel %vm331_vm9, %v495_v32, %v2157_v1  ;;  %v804_v34 = vsel %vm331_vm9, %v803_v48, %v2158_v11  ;;  %v2161_v4 = vpop.permute.xlu0 %2160  ;;  %v876_v1 = vsel %vm154_vm0, %v2779_v53, %v2152_v37 }
  0xc4   :  { %v497_v12 = vpack.c.bf16 %v496_v47, %v496_v47  ;;  %v1914_v15 = vpack.c.bf16 %v804_v34, %v804_v34  ;;  %v2163_v7 = vunpack.i.h.bf16 %v2161_v4  ;;  %v2162_v23 = vunpack.i.l.bf16 %v2161_v4 }
  0xc6   :  { %499 = vst.msk [vmem:[#allocation2] sm:$0x7] %vm498_vm13, %v497_v12  ;;  %v809_v17 = vrot.slane %v1914_v15, 7  ;;  %v877_v53 = vsel %vm319_vm2, %v876_v1, %v2162_v23 }
  0xc7   :  { %v3185_v6 = vpop.permute.xlu0 %2165 }
  0xc8   :  { %811 = vst.msk [vmem:[#allocation2 + $0x14] sm:$0xe] %vm635_vm12, %v809_v17  ;;  %vm1227_vm12 = vcmask 392192  }
  0xcb   :  { %v3187_v40 = vpop.permute.xlu0 %2170 }
  0xcc   :  { %v2173_v47 = vunpack.i.h.bf16 %v3187_v40  ;;  %v2172_v17 = vunpack.i.l.bf16 %v3187_v40 }
  0xcf   :  { %v3189_v26 = vpop.permute.xlu0 %2175  ;;  %v2375_v11 = vld [vmem:[#allocation2 + $0x10] sm:$0xff]  }
  0xd0   :  { %v2177_v32 = vunpack.i.l.bf16 %v3189_v26 }
  0xf1   :  { %v301_v51 = vpop.permute.xlu0 %300  ;;  %v295_v28 = vpop.permute.xlu1 %294 }
  0xf2   :  { %v318_v31 = vsel %vm154_vm0, %v2984_v9, %v295_v28 }
  0xf5   :  { %v307_v55 = vpop.permute.xlu0 %306  ;;  %v298_v20 = vpop.permute.xlu1 %297 }
  0xf6   :  { %v320_v29 = vsel %vm319_vm2, %v318_v31, %v298_v20  ;;  %v2183_v31 = vunpack.i.h.bf16 %v3191_v38  ;;  %v2182_v20 = vunpack.i.l.bf16 %v3191_v38 }
  0xf7   :  { %v322_v52 = vsel %vm321_vm3, %v320_v29, %v301_v51  ;;  %v839_v51 = vsel %vm154_vm0, %v2712_v3, %v2177_v32 }
  0xf9   :  { %v310_v24 = vpop.permute.xlu0 %309  ;;  %v304_v45 = vpop.permute.xlu1 %303 }
  0xfa   :  { %v324_v44 = vsel %vm323_vm5, %v322_v52, %v304_v45 }
  0xfb   :  { %v326_v41 = vsel %vm325_vm6, %v324_v44, %v307_v55 }
  0xfc   :  { %v328_v58 = vsel %vm327_vm7, %v326_v41, %v310_v24 }
  0xfd   :  { %v313_v13 = vpop.permute.xlu0 %312  ;;  %v316_v21 = vpop.permute.xlu1 %315 }
  0xfe   :  { %v330_v39 = vsel %vm329_vm8, %v328_v58, %v313_v13 }
  0xff   :  { %v332_v9 = vsel %vm331_vm9, %v330_v39, %v316_v21 }
 0x100   :  { %v374_v25 = vrot.slane %v332_v9, %v2980_v5  ;;  %v2376_v9 = vld [vmem:[#allocation2] sm:$0xff]  }
 0x101   :  { %v345_v54 = vpop.permute.xlu0 %344  ;;  %v339_v42 = vpop.permute.xlu1 %338 }
 0x102   :  { %v375_v46 = vmul.f32 %v374_v25, %v3012_v19  ;;  %v362_v60 = vsel %vm154_vm0, %v3007_v30, %v339_v42  ;;  %v2153_v19 = vunpack.i.h.bf16 %v3158_v36  ;;  %v2168_v36 = vunpack.i.h.bf16 %v3185_v6 }
 0x104   :  { %v376_v63 = vpack.c.bf16 %v375_v46, %v375_v46  ;;  %v921_v59 = vsel %vm154_vm0, %v2781_v56, %v2153_v19  ;;  %v2167_v56 = vunpack.i.l.bf16 %v3185_v6  ;;  %vm1411_vm0 = vcmask 1046528  }
 0x105   :  { %v357_v62 = vpop.permute.xlu0 %356  ;;  %v342_v49 = vpop.permute.xlu1 %341  ;;  %v922_v8 = vsel %vm319_vm2, %v921_v59, %v2163_v7 }
 0x106   :  { %v1035_v57 = vsel %vm378_vm1, %v376_v63, 0  ;;  %v363_v50 = vsel %vm319_vm2, %v362_v60, %v342_v49  ;;  %v923_v15 = vsel %vm321_vm3, %v922_v8, %v2168_v36  ;;  %v878_v26 = vsel %vm321_vm3, %v877_v53, %v2167_v56 }
 0x107   :  { %1978 = vmatpush3.bf16.xpose.msra.mxu1 %v1035_v57  ;;  %v364_v18 = vsel %vm321_vm3, %v363_v50, %v345_v54  ;;  %v924_v40 = vsel %vm323_vm5, %v923_v15, %v2173_v47  ;;  %v879_v3 = vsel %vm323_vm5, %v878_v26, %v2172_v17 }
 0x108   :  { %v925_v58 = vsel %vm325_vm6, %v924_v40, %v2183_v31  ;;  %v880_v21 = vsel %vm325_vm6, %v879_v3, %v2182_v20 }
 0x109   :  { %v3205_v22 = vpop.permute.xlu0 %2190  ;;  %v348_v61 = vpop.permute.xlu1 %347 }
 0x10a   :  { %v365_v10 = vsel %vm323_vm5, %v364_v18, %v348_v61  ;;  %v2193_v29 = vunpack.i.h.bf16 %v3205_v22  ;;  %v2192_v52 = vunpack.i.l.bf16 %v3205_v22 }
 0x10c   :  { %v926_v38 = vsel %vm327_vm7, %v925_v58, %v2193_v29  ;;  %v881_v25 = vsel %vm327_vm7, %v880_v21, %v2192_v52 }
 0x10d   :  { %v351_v0 = vpop.permute.xlu1 %350  ;;  %v2196_v27 = vpop.permute.xlu0 %2195 }
 0x10e   :  { %1951 = vmatmul.mubr.msk.bf16.vlgmr.msra.gmra.mxu1 %vm378_vm1, %v2374_v16  ;;  %v366_v35 = vsel %vm325_vm6, %v365_v10, %v351_v0  ;;  %v2197_v28 = vunpack.i.l.bf16 %v2196_v27 }
 0x10f   :  { %1954 = vmatprep.mubr.msk.bf16.mxu1 %vm2394_vm4, %v2393_v33 }
 0x111   :  { %v354_v2 = vpop.permute.xlu1 %353  ;;  %v822_v30 = vpop.permute.xlu0 %821 }
 0x112   :  { %v367_v43 = vsel %vm327_vm7, %v366_v35, %v354_v2 }
 0x113   :  { %v368_v34 = vsel %vm329_vm8, %v367_v43, %v357_v62 }
 0x115   :  { %v2186_v14 = vpop.permute.xlu1 %2185  ;;  %v825_v4 = vpop.permute.xlu0 %824 }
 0x116   :  { %1955 = vmatmul.mubr.msk.bf16.gmra.mxu1 %vm378_vm1, %v2375_v11  ;;  %v2187_v48 = vunpack.i.l.bf16 %v2186_v14 }
 0x117   :  { %1958 = vmatprep.mubr.msk.bf16.mxu1 %vm2394_vm4, %v2393_v33 }
 0x118   :  { %v840_v55 = vsel %vm319_vm2, %v839_v51, %v2187_v48  ;;  %v377_v48 = vld [vmem:[%s3784_s7] sm:$0x1]  ;;  %s2395_s7 = smov 40  }
 0x119   :  { %v360_v12 = vpop.permute.xlu1 %359  ;;  %v841_v41 = vsel %vm321_vm3, %v840_v55, %v2197_v28  ;;  %v833_v13 = vpop.permute.xlu0 %832  ;;  %vm1373_vm3 = vcmask 1040384  }
 0x11a   :  { %v369_v6 = vsel %vm331_vm9, %v368_v34, %v360_v12  ;;  %v842_v46 = vsel %vm323_vm5, %v841_v41, %v822_v30 }
 0x11b   :  { %1942 = vmatmul.mubr.msk.f32.vlgmr.msra.gmra.mxu0 %vm378_vm1, %v369_v6  ;;  %v843_v0 = vsel %vm325_vm6, %v842_v46, %v825_v4  ;;  %vm1543_vm6 = vcmask 1043456  }
 0x11c   :  { %1945 = vmatpush3.bf16.xpose.msra.mxu0 %v1035_v57  ;;  %1946 = vmatprep.mubr.msk.bf16.mxu0 %vm2394_vm4, %v2393_v33 }
 0x11d   :  { %v2201_v24 = vpop.permute.xlu1 %2200  ;;  %1966 = vmatprep.subr.mxu0 %v2393_v33  ;;  %v949_v27 = vpop.permute.xlu0 %948 }
 0x11e   :  { %v2203_v45 = vunpack.i.h.bf16 %v2201_v24  ;;  %v2202_v44 = vunpack.i.l.bf16 %v2201_v24 }
 0x120   :  { %v927_v63 = vsel %vm329_vm8, %v926_v38, %v2203_v45  ;;  %v882_v62 = vsel %vm329_vm8, %v881_v25, %v2202_v44 }
 0x121   :  { %v2206_v39 = vpop.permute.xlu1 %2205  ;;  %v956_v23 = vpop.permute.xlu0 %955 }
 0x122   :  { %v2208_v54 = vunpack.i.h.bf16 %v2206_v39  ;;  %v2207_v42 = vunpack.i.l.bf16 %v2206_v39 }
 0x123   :  { %1947 = vmatmul.mubr.msk.bf16.vlgmr.msra.gmra.mxu0 %vm378_vm1, %v2376_v9 }
 0x124   :  { %v883_v49 = vsel %vm331_vm9, %v882_v62, %v2207_v42  ;;  %v928_v57 = vsel %vm331_vm9, %v927_v63, %v2208_v54  ;;  %1968 = vmatprep.mubr.msk.f32.mxu0 %vm2394_vm4, %v2393_v33 }
 0x125   :  { %v1915_v22 = vpack.c.bf16 %v883_v49, %v883_v49  ;;  %v1916_v61 = vpack.c.bf16 %v928_v57, %v928_v57  ;;  %v829_v16 = vpop.permute.xlu1 %828  ;;  %v964_v11 = vpop.permute.xlu0 %963 }
 0x126   :  { %v844_v60 = vsel %vm327_vm7, %v843_v0, %v829_v16 }
 0x127   :  { %v888_v19 = vrot.slane %v1915_v22, 5  ;;  %v933_v50 = vrot.slane %v1916_v61, 6  ;;  %v845_v18 = vsel %vm329_vm8, %v844_v60, %v833_v13  ;;  %vm1388_vm8 = vcmask 1042432  }
 0x129   :  { %v889_v37 = vrot.slane %v888_v19, 4  ;;  %892 = vst.msk [vmem:[#allocation2 + $0x18] sm:$0x8] %vm543_vm14, %v888_v19  ;;  %v934_v2 = vrot.slane %v933_v50, 4  ;;  %v837_v7 = vpop.permute.xlu1 %836  ;;  %vm1231_vm14 = vcmask 523264  }
 0x12a   :  { %937 = vst.msk [vmem:[#allocation2 + $0x1c] sm:$0xc] %vm590_vm10, %v933_v50  ;;  %v846_v59 = vsel %vm331_vm9, %v845_v18, %v837_v7  ;;  %vm1278_vm10 = vcmask 588800  }
 0x12b   :  { %893 = vst.msk [vmem:[#allocation2 + $0x1c] sm:$0x3] %vm545_vm15, %v889_v37  ;;  %v847_v10 = vpack.c.bf16 %v846_v59, %v846_v59  ;;  %vm1471_vm15 = vcmask 1046532  }
 0x12c   :  { %938 = vst.msk [vmem:[#allocation2 + $0x20] sm:$0x1] %vm592_vm11, %v934_v2  ;;  %vm1225_vm11 = vcmask 326656  }
 0x12d   :  { %848 = vst.msk [vmem:[#allocation2 + $0x18] sm:$0x7] %vm498_vm13, %v847_v10  ;;  %v952_v30 = vpop.permute.xlu1 %951  ;;  %vm1229_vm13 = vcmask 457728  }
 0x131   :  { %v960_v1 = vpop.permute.xlu1 %959 }
 0x133   :  { %v2378_v14 = vld [vmem:[#allocation2 + $0x20] ss:$0 sps:$4 sm:$0xff]  }
 0x134   :  { %v2377_v35 = vld [vmem:[#allocation2 + $0x18] sm:$0xff]  }
 0x135   :  { %1959 = vmatmul.mubr.msk.bf16.gmra.mxu1 %vm378_vm1, %v2377_v35 }
 0x136   :  { %1962 = vmatprep.mubr.msk.bf16.mxu1 %vm2394_vm4, %v2393_v33  ;;  %vm1485_vm4 = vcmask 1045504  }
 0x13d   :  { %1963 = vmatmul.mubr.msk.bf16.gmra.mxu1 %vm378_vm1, %v2378_v14  ;;  %vm1366_vm1 = vcmask 1041408  }
 0x1ce   :  { %v1079_v36 = vpop.f32.mrf.mxu1 }
 0x1d0   :  { %v1952_v43 = vpop.f32.mrf.mxu1 }
 0x1d2   :  { %v1082_v8 = vpop.f32.mrf.mxu1 }
 0x1d4   :  { %v1953_v56 = vpop.f32.mrf.mxu1 }
 0x1d6   :  { %v1087_v32 = vpop.f32.mrf.mxu1 }
 0x1d8   :  { %v1956_v53 = vpop.f32.mrf.mxu1 }
 0x1da   :  { %v1090_v47 = vpop.f32.mrf.mxu1 }
 0x1db   :  { %v451_v34 = vpop.f32.mrf.mxu0 }
 0x1dc   :  { %v455_v12 = vadd.f32 %v451_v34, %v377_v48  ;;  %v1957_v15 = vpop.f32.mrf.mxu1 }
 0x1dd   :  { %v1943_v17 = vpop.f32.mrf.mxu0 }
 0x1de   :  { %v3280_v33 = vrot.slane %v455_v12, %v2980_v5 }
 0x1e0   :  { %v1080_v4 = vadd.f32 %v1079_v36, %v3280_v33  ;;  %v1083_v6 = vadd.f32 %v1082_v8, %v3280_v33  ;;  %v1088_v44 = vadd.f32 %v1087_v32, %v3280_v33  ;;  %v1091_v58 = vadd.f32 %v1090_v47, %v3280_v33 }
 0x1e2   :  { %v3284_v26 = vmax.f32 %v1080_v4, 0.0  ;;  %v3286_v51 = vmax.f32 %v1083_v6, 0.0  ;;  %v3306_v9 = vmax.f32 %v1088_v44, 0.0  ;;  %v3318_v57 = vmax.f32 %v1091_v58, 0.0 }
 0x1e3   :  { %v1071_v28 = vpop.f32.mrf.mxu0 }
 0x1e4   :  { %v1072_v31 = vadd.f32 %v1071_v28, %v3280_v33  ;;  %v1427_v55 = vrot.slane %v3284_v26, 7  ;;  %v1535_v40 = vrot.slane %v3286_v51, 7  ;;  %v1395_v54 = vrot.slane %v3284_v26, 6 }
 0x1e5   :  { %v1948_v20 = vpop.f32.mrf.mxu0  ;;  %v1480_v42 = vrot.slane %v3284_v26, 1  ;;  %v1438_v62 = vrot.slane %v3284_v26, 4  ;;  %v1498_v49 = vrot.slane %v3286_v51, 4  ;;  %v1390_v60 = vrot.slane %v3284_v26, 5 }
 0x1e6   :  { %v2219_v29 = vpack.i.bf16 %v1535_v40, %v1427_v55  ;;  %v3291_v3 = vmax.f32 %v1072_v31, 0.0  ;;  %v1502_v50 = vrot.slane %v3286_v51, 5  ;;  %v1580_v37 = vrot.slane %v3306_v9, 2 }
 0x1e7   :  { %v1074_v24 = vpop.f32.mrf.mxu0  ;;  %v2224_v7 = vpack.i.bf16 %v1498_v49, %v1438_v62  ;;  %v1581_v59 = vrot.slane %v3318_v57, 2  ;;  %v1121_v23 = vsel %vm319_vm2, %v3284_v26, 0.0  ;;  %v1506_v43 = vrot.slane %v3286_v51, 6 }
 0x1e8   :  { %v1075_v52 = vadd.f32 %v1074_v24, %v3280_v33  ;;  %2220 = vrot.lane.b32.xlu1 %v2219_v29, %s2392_s2  ;;  %v1357_v21 = vrot.slane %v3291_v3, 1  ;;  %v1118_v22 = vsel %vm319_vm2, %v3291_v3, 0.0  ;;  %v2229_v35 = vpack.i.bf16 %v1502_v50, %v1390_v60 }
 0x1e9   :  { %v1949_v45 = vpop.f32.mrf.mxu0  ;;  %v1582_v36 = vsel %vm1485_vm4, %v1580_v37, %v1581_v59  ;;  %v1123_v8 = vsel %vm319_vm2, %v3286_v51, 0.0  ;;  %v1486_v47 = vrot.slane %v3284_v26, 2  ;;  %v1361_v15 = vrot.slane %v3291_v3, 2 }
 0x1ea   :  { %v3296_v41 = vmax.f32 %v1075_v52, 0.0  ;;  %v2264_v12 = vpack.i.bf16 %v1581_v59, %v1582_v36  ;;  %v2234_v4 = vpack.i.bf16 %v1506_v43, %v1395_v54  ;;  %v1125_v28 = vsel %vm319_vm2, %v3306_v9, 0.0 }
 0x1eb   :  { %v1574_v31 = vrot.slane %v3306_v9, 1  ;;  %v1575_v29 = vrot.slane %v3318_v57, 1  ;;  %v1127_v45 = vsel %vm319_vm2, %v3318_v57, 0.0 }
 0x1ec   :  { %v2209_v13 = vpack.i.bf16 %v3284_v26, %v3296_v41  ;;  %v1412_v38 = vrot.slane %v3296_v41, 1  ;;  %v3304_v39 = vrot.slane %v3296_v41, 6  ;;  %v1119_v46 = vsel %vm319_vm2, %v3296_v41, 0.0 }
 0x1ed   :  { %v3325_v0 = vrot.slane %v3296_v41, 7  ;;  %v1120_v27 = vadd.f32 %v1119_v46, %v1118_v22  ;;  %v1420_v32 = vrot.slane %v3296_v41, 2 }
 0x1ee   :  { %2210 = vrot.lane.b32.xlu0 %v2209_v13, %s2395_s7  ;;  %v1413_v25 = vsel %vm1411_vm0, %v1357_v21, %v1412_v38  ;;  %v2214_v61 = vpack.i.bf16 %v1395_v54, %v3304_v39  ;;  %v1481_v16 = vsel %vm1411_vm0, %v1412_v38, %v1480_v42  ;;  %v3334_v2 = vsel %vm1366_vm1, %v3304_v39, %v1395_v54 }
 0x1ef   :  { %v2239_v63 = vpack.i.bf16 %v1412_v38, %v1413_v25  ;;  %v2249_v19 = vpack.i.bf16 %v1480_v42, %v1481_v16  ;;  %v1428_v18 = vsel %vm1373_vm3, %v3325_v0, %v1427_v55  ;;  %v1122_v10 = vadd.f32 %v1121_v23, %v1120_v27 }
 0x1f0   :  { %v2254_v1 = vpack.i.bf16 %v1428_v18, %v3325_v0  ;;  %v1487_v40 = vsel %vm1485_vm4, %v1420_v32, %v1486_v47  ;;  %v1576_v38 = vsel %vm1411_vm0, %v1574_v31, %v1575_v29  ;;  %v1367_v23 = vrot.slane %v3291_v3, 6 }
 0x1f1   :  { %2240 = vrot.lane.b32.xlu1 %v2239_v63, %s2387_s25  ;;  %v1124_v53 = vadd.f32 %v1123_v8, %v1122_v10  ;;  %v2244_v52 = vpack.i.bf16 %v1487_v40, %v1420_v32  ;;  %v1549_v40 = vrot.slane %v3306_v9, 5 }
 0x1f2   :  { %2215 = vrot.lane.b32.xlu0 %v2214_v61, %s2390_s14  ;;  %v2259_v61 = vpack.i.bf16 %v1575_v29, %v1576_v38 }
 0x1f3   :  { %v1126_v20 = vadd.f32 %v1125_v28, %v1124_v53  ;;  %v1374_v53 = vrot.slane %v3291_v3, 7 }
 0x1f5   :  { %2250 = vrot.lane.b32.xlu1 %v2249_v19, %s2387_s25  ;;  %v1095_v30 = vpop.f32.mrf.mxu1  ;;  %v1128_v13 = vadd.f32 %v1127_v45, %v1126_v20 }
 0x1f6   :  { %2225 = vrot.lane.b32.xlu0 %v2224_v7, %s2396_s29  ;;  %v1096_v11 = vadd.f32 %v1095_v30, %v3280_v33 }
 0x1f7   :  { %v1960_v14 = vpop.f32.mrf.mxu1 }
 0x1f8   :  { %v3355_v56 = vmax.f32 %v1096_v11, 0.0 }
 0x1f9   :  { %2255 = vrot.lane.b32.xlu1 %v2254_v1, %s2392_s2  ;;  %v1098_v48 = vpop.f32.mrf.mxu1 }
 0x1fa   :  { %2230 = vrot.lane.b32.xlu0 %v2229_v35, %s2397_s24  ;;  %v1099_v34 = vadd.f32 %v1098_v48, %v3280_v33  ;;  %v1676_v17 = vrot.slane %v3355_v56, 2  ;;  %v1129_v44 = vsel %vm319_vm2, %v3355_v56, 0.0  ;;  %v3398_v37 = vrot.slane %v3355_v56, 6 }
 0x1fb   :  { %v1961_v6 = vpop.f32.mrf.mxu1  ;;  %v1130_v42 = vadd.f32 %v1129_v44, %v1128_v13  ;;  %v1672_v30 = vrot.slane %v3355_v56, 1  ;;  %v1369_v35 = vsel %vm1366_vm1, %v1367_v23, %v3304_v39  ;;  %v1635_v14 = vrot.slane %v3355_v56, 7 }
 0x1fc   :  { %v2274_v55 = vpack.i.bf16 %v1676_v17, %v1361_v15  ;;  %v3372_v24 = vmax.f32 %v1099_v34, 0.0  ;;  %v1376_v39 = vsel %vm1373_vm3, %v1374_v53, %v3325_v0  ;;  %v1586_v34 = vrot.slane %v3318_v57, 6 }
 0x1fd   :  { %2265 = vrot.lane.b32.xlu1 %v2264_v12, %s2389_s13  ;;  %v1103_v58 = vpop.f32.mrf.mxu1  ;;  %v2269_v32 = vpack.i.bf16 %v1672_v30, %v1357_v21  ;;  %v1590_v6 = vrot.slane %v3318_v57, 7 }
 0x1fe   :  { %2235 = vrot.lane.b32.xlu0 %v2234_v4, %s2398_s19  ;;  %v1104_v25 = vadd.f32 %v1103_v58, %v3280_v33  ;;  %v1131_v54 = vsel %vm319_vm2, %v3372_v24, 0.0  ;;  %v2289_v46 = vpack.i.bf16 %v3372_v24, %v3286_v51  ;;  %v1724_v62 = vrot.slane %v3372_v24, 2 }
 0x1ff   :  { %v1964_v63 = vpop.f32.mrf.mxu1  ;;  %v3391_v16 = vrot.slane %v3372_v24, 6  ;;  %v1132_v27 = vadd.f32 %v1131_v54, %v1130_v42  ;;  %v3406_v11 = vrot.slane %v3372_v24, 7  ;;  %v2279_v17 = vpack.i.bf16 %v3398_v37, %v1586_v34 }
 0x200   :  { %v3388_v22 = vmax.f32 %v1104_v25, 0.0  ;;  %v2294_v18 = vpack.i.bf16 %v1724_v62, %v1486_v47  ;;  %v1544_v4 = vrot.slane %v3306_v9, 4  ;;  %v1550_v25 = vsel %vm1388_vm8, %v1502_v50, %v1549_v40 }
 0x201   :  { %2275 = vrot.lane.b32.xlu1 %v2274_v55, %s2389_s13  ;;  %v1106_v33 = vpop.f32.mrf.mxu1  ;;  %v1680_v10 = vsel %vm1366_vm1, %v3398_v37, %v3391_v16  ;;  %v1685_v48 = vsel %vm1373_vm3, %v1635_v14, %v3406_v11  ;;  %v2284_v55 = vpack.i.bf16 %v1635_v14, %v1590_v6  ;;  %v1643_v54 = vrot.slane %v3372_v24, 4 }
 0x202   :  { %2245 = vrot.lane.b32.xlu0 %v2244_v52, %s2389_s13  ;;  %v1133_v19 = vsel %vm319_vm2, %v3388_v22, 0.0  ;;  %v2319_v8 = vpack.i.bf16 %v1680_v10, %v1369_v35  ;;  %v2324_v15 = vpack.i.bf16 %v1685_v48, %v1376_v39  ;;  %v1742_v28 = vrot.slane %v3388_v22, 4 }
 0x203   :  { %v1134_v7 = vadd.f32 %v1133_v19, %v1132_v27  ;;  %v1965_v59 = vpop.f32.mrf.mxu1  ;;  %v2339_v0 = vpack.i.bf16 %v3318_v57, %v3388_v22  ;;  %v1545_v29 = vsel %vm1543_vm6, %v1498_v49, %v1544_v4  ;;  %v1696_v45 = vrot.slane %v3388_v22, 5 }
 0x204   :  { %v2344_v52 = vpack.i.bf16 %v1742_v28, %v1545_v29  ;;  %v2299_v49 = vpack.i.bf16 %v3391_v16, %v1506_v43  ;;  %v1383_v27 = vrot.slane %v3296_v41, 4  ;;  %v1701_v43 = vrot.slane %v3388_v22, 6 }
 0x205   :  { %2290 = vrot.lane.b32.xlu1 %v2289_v46, %s2395_s7  ;;  %v1135_v1 = vrot.slane %v1134_v7, 4  ;;  %v1554_v59 = vrot.slane %v3306_v9, 6  ;;  %v1731_v23 = vrot.slane %v3388_v22, 7  ;;  %v1716_v14 = vrot.slane %v3372_v24, 1 }
 0x206   :  { %2260 = vrot.lane.b32.xlu0 %v2259_v61, %s2387_s25  ;;  %v2349_v61 = vpack.i.bf16 %v1696_v45, %v1550_v25  ;;  %v2309_v39 = vpack.i.bf16 %v3391_v16, %v3398_v37  ;;  %v1389_v37 = vrot.slane %v3296_v41, 5  ;;  %v1648_v6 = vrot.slane %v3372_v24, 5 }
 0x207   :  { %v1136_v36 = vadd.f32 %v1135_v1, %v1134_v7  ;;  %v2354_v48 = vpack.i.bf16 %v1701_v43, %v1554_v59  ;;  %v1732_v34 = vsel %vm1373_vm3, %v3406_v11, %v1731_v23  ;;  %v1185_v59 = vld [vmem:[%s3785_s8] sm:$0x1]  ;;  %vm1478_vm3 = vcmask 584706  }
 0x208   :  { %v1697_v29 = vsel %vm1388_vm8, %v1648_v6, %v1696_v45 }
 0x209   :  { %2295 = vrot.lane.b32.xlu1 %v2294_v18, %s2389_s13  ;;  %v1137_v47 = vrot.slane %v1136_v36, 2  ;;  %v2304_v18 = vpack.i.bf16 %v1643_v54, %v1383_v27 }
 0x20a   :  { %1639 = vrot.lane.b32.xlu0 %v3355_v56, %s2395_s7 }
 0x20b   :  { %v1138_v12 = vadd.f32 %v1137_v47, %v1136_v36 }
 0x20d   :  { %2320 = vrot.lane.b32.xlu1 %v2319_v8, %s2390_s14  ;;  %v1139_v21 = vrot.slane %v1138_v12, 1 }
 0x20e   :  { %2270 = vrot.lane.b32.xlu0 %v2269_v32, %s2387_s25 }
 0x20f   :  { %v1140_v31 = vadd.f32 %v1139_v21, %v1138_v12  ;;  %v1717_v21 = vsel %vm1411_vm0, %v1672_v30, %v1716_v14  ;;  %vm3606_vm0 = vmor %vm1388_vm8, %vm1471_vm15 }
 0x210   :  { %v2314_v40 = vpack.i.bf16 %v1716_v14, %v1717_v21 }
 0x211   :  { %2325 = vrot.lane.b32.xlu1 %v2324_v15, %s2392_s2  ;;  %v3435_v20 = vmul.f32 0.013888889, %v1140_v31 }
 0x212   :  { %2280 = vrot.lane.b32.xlu0 %v2279_v17, %s2390_s14 }
 0x213   :  { %v1143_v44 = vsub.f32 %v3291_v3, %v3435_v20  ;;  %v1144_v58 = vsub.f32 %v3296_v41, %v3435_v20  ;;  %v1145_v13 = vsub.f32 %v3284_v26, %v3435_v20  ;;  %v1146_v38 = vsub.f32 %v3286_v51, %v3435_v20 }
 0x214   :  { %v1147_v42 = vsub.f32 %v3306_v9, %v3435_v20  ;;  %v1148_v51 = vsub.f32 %v3318_v57, %v3435_v20  ;;  %v1149_v10 = vsub.f32 %v3355_v56, %v3435_v20  ;;  %v1150_v8 = vsub.f32 %v3372_v24, %v3435_v20 }
 0x215   :  { %2340 = vrot.lane.b32.xlu1 %v2339_v0, %s2395_s7  ;;  %v1152_v46 = vmul.f32 %v1143_v44, %v1143_v44  ;;  %v1153_v63 = vmul.f32 %v1144_v58, %v1144_v58  ;;  %v1154_v62 = vmul.f32 %v1145_v13, %v1145_v13  ;;  %v1155_v50 = vmul.f32 %v1146_v38, %v1146_v38 }
 0x216   :  { %2285 = vrot.lane.b32.xlu0 %v2284_v55, %s2392_s2  ;;  %v1156_v1 = vmul.f32 %v1147_v42, %v1147_v42  ;;  %v1157_v32 = vmul.f32 %v1148_v51, %v1148_v51  ;;  %v1151_v12 = vsub.f32 %v3388_v22, %v3435_v20  ;;  %v1158_v15 = vmul.f32 %v1149_v10, %v1149_v10  ;;  %v1189_v10 = vld [vmem:[%s3786_s9] sm:$0x1] }
 0x217   :  { %v1161_v33 = vsel %vm319_vm2, %v1152_v46, 0.0  ;;  %v1162_v19 = vsel %vm319_vm2, %v1153_v63, 0.0  ;;  %v1164_v35 = vsel %vm319_vm2, %v1154_v62, 0.0  ;;  %v1166_v53 = vsel %vm319_vm2, %v1155_v50, 0.0 }
 0x218   :  { %v1163_v7 = vadd.f32 %v1162_v19, %v1161_v33  ;;  %v1168_v17 = vsel %vm319_vm2, %v1156_v1, 0.0  ;;  %v1159_v28 = vmul.f32 %v1150_v8, %v1150_v8  ;;  %v1170_v31 = vsel %vm319_vm2, %v1157_v32, 0.0 }
 0x219   :  { %2345 = vrot.lane.b32.xlu1 %v2344_v52, %s2396_s29  ;;  %v2359_v22 = vpack.i.bf16 %v1732_v34, %v3406_v11  ;;  %v1598_v0 = vrot.slane %v3355_v56, 4  ;;  %v1160_v52 = vmul.f32 %v1151_v12, %v1151_v12  ;;  %v1172_v30 = vsel %vm319_vm2, %v1158_v15, 0.0 }
 0x21a   :  { %2300 = vrot.lane.b32.xlu0 %v2299_v49, %s2390_s14  ;;  %v1165_v36 = vadd.f32 %v1164_v35, %v1163_v7  ;;  %v1391_v11 = vsel %vm1388_vm8, %v1389_v37, %v1390_v60  ;;  %v1174_v13 = vsel %vm319_vm2, %v1159_v28, 0.0  ;;  %v1602_v49 = vrot.slane %v3355_v56, 5  ;;  %v3538_v35 = vld [vmem:[%s3787_s10] sm:$0xff] }
 0x21b   :  { %v1644_v44 = vsel %vm1543_vm6, %v1598_v0, %v1643_v54  ;;  %v2364_v38 = vpack.i.bf16 %v1697_v29, %v1391_v11  ;;  %v1176_v42 = vsel %vm319_vm2, %v1160_v52, 0.0  ;;  %v1702_v60 = vsel %vm1366_vm1, %v3391_v16, %v1701_v43  ;;  %1967 = vmatpush3.xpose.msk.msra.mxu0 %vm1278_vm10, %v3538_v35 }
 0x21c   :  { %v1167_v47 = vadd.f32 %v1166_v53, %v1165_v36  ;;  %v2329_v25 = vpack.i.bf16 %v1644_v44, %v1598_v0  ;;  %v1649_v54 = vsel %vm1388_vm8, %v1602_v49, %v1648_v6  ;;  %v2369_v51 = vpack.i.bf16 %v1702_v60, %v3334_v2 }
 0x21d   :  { %2350 = vrot.lane.b32.xlu1 %v2349_v61, %s2397_s24  ;;  %v2334_v62 = vpack.i.bf16 %v1649_v54, %v1602_v49  ;;  %vm1409_vm1 = vcmask 582656  }
 0x21e   :  { %2305 = vrot.lane.b32.xlu0 %v2304_v18, %s2396_s29  ;;  %v1169_v4 = vadd.f32 %v1168_v17, %v1167_v47 }
 0x220   :  { %v1171_v55 = vadd.f32 %v1170_v31, %v1169_v4 }
 0x221   :  { %2355 = vrot.lane.b32.xlu1 %v2354_v48, %s2398_s19 }
 0x222   :  { %2310 = vrot.lane.b32.xlu0 %v2309_v39, %s2398_s19  ;;  %v1173_v58 = vadd.f32 %v1172_v30, %v1171_v55 }
 0x224   :  { %v1175_v45 = vadd.f32 %v1174_v13, %v1173_v58 }
 0x225   :  { %2360 = vrot.lane.b32.xlu1 %v2359_v22, %s2392_s2 }
 0x226   :  { %2315 = vrot.lane.b32.xlu0 %v2314_v40, %s2387_s25  ;;  %v1177_v46 = vadd.f32 %v1176_v42, %v1175_v45 }
 0x228   :  { %v1178_v63 = vrot.slane %v1177_v46, 4 }
 0x229   :  { %2365 = vrot.lane.b32.xlu1 %v2364_v38, %s2397_s24 }
 0x22a   :  { %2330 = vrot.lane.b32.xlu0 %v2329_v25, %s2396_s29  ;;  %v1179_v61 = vadd.f32 %v1178_v63, %v1177_v46 }
 0x22c   :  { %v1180_v27 = vrot.slane %v1179_v61, 2 }
 0x22e   :  { %2335 = vrot.lane.b32.xlu0 %v2334_v62, %s2397_s24  ;;  %v1181_v50 = vadd.f32 %v1180_v27, %v1179_v61 }
 0x230   :  { %v1182_v33 = vrot.slane %v1181_v50, 1 }
 0x232   :  { %2370 = vrot.lane.b32.xlu0 %v2369_v51, %s2398_s19  ;;  %v1183_v19 = vadd.f32 %v1182_v33, %v1181_v50 }
 0x234   :  { %v1184_v7 = vmul.f32 0.013888889, %v1183_v19 }
 0x236   :  { %v1186_v18 = vadd.f32 1e-05, %v1184_v7 }
 0x238   :  { %2383 = vrsqrt.f32 %v1186_v18 }
 0x245   :  { %v2384_v23 = vpop.eup %2383 }
 0x246   :  { %v3518_v16 = vmul.f32 %v2384_v23, %v1185_v59 }
 0x248   :  { %v1196_v43 = vrot.slane %v3518_v16, %v2980_v5  ;;  %v1190_v2 = vmul.f32 %v3518_v16, %v3435_v20 }
 0x24a   :  { %1203 = vrot.lane.b32.xlu0 %v1196_v43, %s2390_s14  ;;  %1197 = vrot.lane.b32.xlu1 %v1196_v43, %s2387_s25  ;;  %v3531_v1 = vsub.f32 %v1189_v10, %v1190_v2 }
 0x24c   :  { %v1237_v20 = vrot.slane %v3531_v1, %v2980_v5 }
 0x24e   :  { %1206 = vrot.lane.b32.xlu0 %v1196_v43, %s2392_s2  ;;  %1200 = vrot.lane.b32.xlu1 %v1196_v43, %s2389_s13 }
 0x252   :  { %1209 = vrot.lane.b32.xlu0 %v1196_v43, %s2395_s7  ;;  %1212 = vrot.lane.b32.xlu1 %v1196_v43, %s2396_s29 }
 0x256   :  { %1215 = vrot.lane.b32.xlu1 %v1196_v43, %s2397_s24  ;;  %1238 = vrot.lane.b32.xlu0 %v1237_v20, %s2387_s25 }
 0x25a   :  { %1218 = vrot.lane.b32.xlu1 %v1196_v43, %s2398_s19  ;;  %1247 = vrot.lane.b32.xlu0 %v1237_v20, %s2392_s2  ;;  %v3548_v14 = vpop.permute.xlu1 %2220 }
 0x25b   :  { %v2222_v4 = vunpack.i.l.bf16 %v3548_v14 }
 0x25e   :  { %1241 = vrot.lane.b32.xlu1 %v1237_v20, %s2389_s13  ;;  %1253 = vrot.lane.b32.xlu0 %v1237_v20, %s2396_s29 }
 0x260   :  { %v3550_v36 = vpop.permute.xlu0 %2210 }
 0x261   :  { %v2213_v6 = vunpack.i.h.bf16 %v3550_v36  ;;  %v2212_v28 = vunpack.i.l.bf16 %v3550_v36 }
 0x262   :  { %1244 = vrot.lane.b32.xlu1 %v1237_v20, %s2390_s14  ;;  %1259 = vrot.lane.b32.xlu0 %v1237_v20, %s2398_s19 }
 0x263   :  { %v2241_v8 = vpop.permute.xlu1 %2240 }
 0x264   :  { %v2216_v32 = vpop.permute.xlu0 %2215  ;;  %v2243_v15 = vunpack.i.h.bf16 %v2241_v8  ;;  %v2242_v17 = vunpack.i.l.bf16 %v2241_v8 }
 0x265   :  { %v2218_v31 = vunpack.i.h.bf16 %v2216_v32  ;;  %v2217_v22 = vunpack.i.l.bf16 %v2216_v32 }
 0x266   :  { %1250 = vrot.lane.b32.xlu1 %v1237_v20, %s2395_s7  ;;  %v1449_v55 = vsel %vm319_vm2, %v3296_v41, %v2243_v15  ;;  %v1448_v40 = vsel %vm319_vm2, %v3291_v3, %v2242_v17 }
 0x267   :  { %v3556_v53 = vpop.permute.xlu1 %2250 }
 0x268   :  { %v2226_v48 = vpop.permute.xlu0 %2225  ;;  %v2252_v21 = vunpack.i.l.bf16 %v3556_v53 }
 0x269   :  { %v2228_v44 = vunpack.i.h.bf16 %v2226_v48  ;;  %v2227_v58 = vunpack.i.l.bf16 %v2226_v48 }
 0x26a   :  { %1256 = vrot.lane.b32.xlu1 %v1237_v20, %s2397_s24  ;;  %v1510_v30 = vsel %vm319_vm2, %v3296_v41, %v2252_v21 }
 0x26b   :  { %v2256_v47 = vpop.permute.xlu1 %2255 }
 0x26c   :  { %v2231_v39 = vpop.permute.xlu0 %2230  ;;  %v2258_v11 = vunpack.i.h.bf16 %v2256_v47  ;;  %v2257_v13 = vunpack.i.l.bf16 %v2256_v47 }
 0x26d   :  { %v2233_v42 = vunpack.i.h.bf16 %v2231_v39  ;;  %v2232_v62 = vunpack.i.l.bf16 %v2231_v39 }
 0x26f   :  { %v3560_v34 = vpop.permute.xlu1 %2265 }
 0x270   :  { %v2236_v12 = vpop.permute.xlu0 %2235 }
 0x271   :  { %v2238_v51 = vunpack.i.h.bf16 %v2236_v12  ;;  %v2237_v7 = vunpack.i.l.bf16 %v2236_v12 }
 0x273   :  { %v3564_v37 = vpop.permute.xlu1 %2275 }
 0x274   :  { %v2246_v0 = vpop.permute.xlu0 %2245 }
 0x275   :  { %v2248_v29 = vunpack.i.h.bf16 %v2246_v0  ;;  %v2247_v52 = vunpack.i.l.bf16 %v2246_v0 }
 0x277   :  { %v1450_v38 = vsel %vm323_vm5, %v1448_v40, %v2247_v52  ;;  %v1451_v49 = vsel %vm323_vm5, %v1449_v55, %v2247_v52  ;;  %v1511_v45 = vsel %vm323_vm5, %v1510_v30, %v2248_v29  ;;  %v3577_v25 = vpop.permute.xlu1 %2290 }
 0x278   :  { %v1452_v54 = vsel %vm327_vm7, %v1450_v38, %v2217_v22  ;;  %v1453_v46 = vsel %vm327_vm7, %v1451_v49, %v2217_v22  ;;  %v1512_v63 = vsel %vm327_vm7, %v1511_v45, %v2218_v31  ;;  %v3582_v41 = vpop.permute.xlu0 %2260 }
 0x279   :  { %v1454_v60 = vsel %vm331_vm9, %v1452_v54, %v2257_v13  ;;  %v1455_v61 = vsel %vm331_vm9, %v1453_v46, %v2258_v11  ;;  %v1513_v27 = vsel %vm331_vm9, %v1512_v63, %v2222_v4  ;;  %v2263_v13 = vunpack.i.h.bf16 %v3582_v41 }
 0x27a   :  { %v1456_v50 = vsel %vm1225_vm11, %v1454_v60, %v2212_v28  ;;  %v1457_v33 = vsel %vm1225_vm11, %v1455_v61, %v2213_v6  ;;  %v1514_v19 = vsel %vm1225_vm11, %v1513_v27, %v2213_v6  ;;  %v2262_v49 = vunpack.i.l.bf16 %v3582_v41 }
 0x27b   :  { %v1458_v18 = vsel %vm1227_vm12, %v1456_v50, %v2227_v58  ;;  %v1459_v59 = vsel %vm1227_vm12, %v1457_v33, %v2227_v58  ;;  %v1515_v23 = vsel %vm1227_vm12, %v1514_v19, %v2228_v44  ;;  %v3595_v43 = vpop.permute.xlu1 %2295  ;;  %v2253_v44 = vunpack.i.h.bf16 %v3556_v53 }
 0x27c   :  { %v1460_v2 = vsel %vm1229_vm13, %v1458_v18, %v2232_v62  ;;  %v1461_v10 = vsel %vm1229_vm13, %v1459_v59, %v2232_v62  ;;  %v1516_v20 = vsel %vm1229_vm13, %v1515_v23, %v2233_v42  ;;  %v3600_v8 = vpop.permute.xlu0 %1639  ;;  %v2297_v58 = vunpack.i.l.bf16 %v3595_v43 }
 0x27d   :  { %v1462_v32 = vsel %vm1231_vm14, %v1460_v2, %v2237_v7  ;;  %v1463_v48 = vsel %vm1231_vm14, %v1461_v10, %v2237_v7  ;;  %v1517_v47 = vsel %vm1231_vm14, %v1516_v20, %v2238_v51  ;;  %v2223_v54 = vunpack.i.h.bf16 %v3548_v14 }
 0x27e   :  { %v1918_v39 = vpack.c.bf16 %v1462_v32, %v1462_v32  ;;  %v1919_v12 = vpack.c.bf16 %v1463_v48, %v1463_v48  ;;  %v1920_v15 = vpack.c.bf16 %v1517_v47, %v1517_v47  ;;  %v1558_v46 = vsel %vm319_vm2, %v3284_v26, %v2253_v44 }
 0x27f   :  { %v2321_v21 = vpop.permute.xlu1 %2320  ;;  %v2278_v53 = vunpack.i.h.bf16 %v3564_v37  ;;  %v2267_v62 = vunpack.i.l.bf16 %v3560_v34  ;;  %v2277_v60 = vunpack.i.l.bf16 %v3564_v37  ;;  %v1559_v41 = vsel %vm323_vm5, %v1558_v46, %v2297_v58 }
 0x280   :  { %v1895_v4 = vrot.slane %v1918_v39, 9  ;;  %v1475_v6 = vrot.slane %v1919_v12, 5  ;;  %v1897_v31 = vrot.slane %v1920_v15, 10  ;;  %v2271_v22 = vpop.permute.xlu0 %2270  ;;  %v2292_v27 = vunpack.i.l.bf16 %v3577_v25 }
 0x281   :  { %v2273_v52 = vunpack.i.h.bf16 %v2271_v22  ;;  %v2272_v11 = vunpack.i.l.bf16 %v2271_v22  ;;  %v1657_v14 = vsel %vm319_vm2, %v3318_v57, %v2263_v13  ;;  %v1610_v33 = vsel %vm319_vm2, %v3306_v9, %v2262_v49 }
 0x282   :  { %v1476_v0 = vsel %vm3606_vm0, %v1895_v4, %v1475_v6  ;;  %1525 = vst.msk [vmem:[#allocation3 + $0x4] sm:$0x3] %vm1409_vm1, %v1897_v31  ;;  %v2323_v37 = vunpack.i.h.bf16 %v2321_v21  ;;  %v2268_v32 = vunpack.i.h.bf16 %v3560_v34  ;;  %v2322_v48 = vunpack.i.l.bf16 %v2321_v21 }
 0x283   :  { %v3613_v55 = vpop.permute.xlu1 %2325  ;;  %1479 = vst.msk [vmem:[#allocation3] sm:$0xc] %vm1478_vm3, %v1476_v0  ;;  %v1706_v45 = vsel %vm319_vm2, %v3355_v56, %v2273_v52  ;;  %v1400_v61 = vsel %vm319_vm2, %v3291_v3, %v2272_v11  ;;  %v1611_v4 = vsel %vm323_vm5, %v1610_v33, %v2267_v62  ;;  %v2293_v21 = vunpack.i.h.bf16 %v3577_v25 }
 0x284   :  { %v2281_v40 = vpop.permute.xlu0 %2280  ;;  %v1707_v26 = vsel %vm323_vm5, %v1706_v45, %v2278_v53  ;;  %v1401_v18 = vsel %vm323_vm5, %v1400_v61, %v2277_v60  ;;  %v2328_v57 = vunpack.i.h.bf16 %v3613_v55  ;;  %v2327_v15 = vunpack.i.l.bf16 %v3613_v55 }
 0x285   :  { %v1708_v2 = vsel %vm327_vm7, %v1707_v26, %v2323_v37  ;;  %v2283_v10 = vunpack.i.h.bf16 %v2281_v40  ;;  %v2282_v20 = vunpack.i.l.bf16 %v2281_v40  ;;  %v1402_v22 = vsel %vm327_vm7, %v1401_v18, %v2322_v48 }
 0x286   :  { %v1709_v0 = vsel %vm331_vm9, %v1708_v2, %v2328_v57  ;;  %v1658_v40 = vsel %vm323_vm5, %v1657_v14, %v2268_v32  ;;  %v2298_v49 = vunpack.i.h.bf16 %v3595_v43  ;;  %v1403_v45 = vsel %vm331_vm9, %v1402_v22, %v2327_v15 }
 0x287   :  { %v3616_v29 = vpop.permute.xlu1 %2340  ;;  %v1659_v52 = vsel %vm327_vm7, %v1658_v40, %v2283_v10  ;;  %v1612_v55 = vsel %vm327_vm7, %v1611_v4, %v2282_v20  ;;  %v1710_v25 = vsel %vm1225_vm11, %v1709_v0, %v2293_v21 }
 0x288   :  { %v2286_v30 = vpop.permute.xlu0 %2285  ;;  %v2342_v53 = vunpack.i.l.bf16 %v3616_v29 }
 0x289   :  { %v2288_v47 = vunpack.i.h.bf16 %v2286_v30  ;;  %v2287_v39 = vunpack.i.l.bf16 %v2286_v30 }
 0x28b   :  { %v3621_v38 = vpop.permute.xlu1 %2345  ;;  %v1613_v44 = vsel %vm331_vm9, %v1612_v55, %v2287_v39  ;;  %v1660_v58 = vsel %vm331_vm9, %v1659_v52, %v2288_v47 }
 0x28c   :  { %v3626_v42 = vpop.permute.xlu0 %2300  ;;  %v2347_v19 = vunpack.i.l.bf16 %v3621_v38 }
 0x28d   :  { %v2302_v63 = vunpack.i.l.bf16 %v3626_v42  ;;  %v2303_v61 = vunpack.i.h.bf16 %v3626_v42 }
 0x28f   :  { %v1560_v51 = vsel %vm327_vm7, %v1559_v41, %v2302_v63  ;;  %v3643_v50 = vpop.permute.xlu1 %2350  ;;  %v2348_v41 = vunpack.i.h.bf16 %v3621_v38 }
 0x290   :  { %v1561_v7 = vsel %vm331_vm9, %v1560_v51, %v2223_v54  ;;  %v3649_v3 = vpop.permute.xlu0 %2305  ;;  %v2352_v23 = vunpack.i.l.bf16 %v3643_v50  ;;  %v2343_v54 = vunpack.i.h.bf16 %v3616_v29  ;;  %v2353_v14 = vunpack.i.h.bf16 %v3643_v50 }
 0x291   :  { %v1562_v59 = vsel %vm1225_vm11, %v1561_v7, %v2292_v27  ;;  %v1661_v27 = vsel %vm1225_vm11, %v1660_v58, %v3600_v8  ;;  %v2308_v26 = vunpack.i.h.bf16 %v3649_v3 }
 0x292   :  { %v1563_v9 = vsel %vm1227_vm12, %v1562_v59, %v2347_v19  ;;  %v1614_v43 = vsel %vm1225_vm11, %v1613_v44, %v2343_v54  ;;  %v2307_v19 = vunpack.i.l.bf16 %v3649_v3 }
 0x293   :  { %v3658_v12 = vpop.permute.xlu1 %2355  ;;  %v1564_v34 = vsel %vm1229_vm13, %v1563_v9, %v2352_v23  ;;  %v1711_v44 = vsel %vm1227_vm12, %v1710_v25, %v2308_v26 }
 0x294   :  { %v2357_v6 = vunpack.i.l.bf16 %v3658_v12  ;;  %v3663_v31 = vpop.permute.xlu0 %2310  ;;  %v2358_v50 = vunpack.i.h.bf16 %v3658_v12 }
 0x295   :  { %v2313_v2 = vunpack.i.h.bf16 %v3663_v31  ;;  %v2312_v10 = vunpack.i.l.bf16 %v3663_v31 }
 0x296   :  { %v1565_v30 = vsel %vm1231_vm14, %v1564_v34, %v2357_v6 }
 0x297   :  { %v1921_v11 = vpack.c.bf16 %v1565_v30, %v1565_v30  ;;  %v2361_v13 = vpop.permute.xlu1 %2360  ;;  %v1404_v30 = vsel %vm1225_vm11, %v1403_v45, %v2212_v28 }
 0x298   :  { %v2316_v46 = vpop.permute.xlu0 %2315  ;;  %v2363_v38 = vunpack.i.h.bf16 %v2361_v13  ;;  %v2362_v33 = vunpack.i.l.bf16 %v2361_v13 }
 0x299   :  { %v1570_v63 = vrot.slane %v1921_v11, 7  ;;  %v2318_v62 = vunpack.i.h.bf16 %v2316_v46  ;;  %v2317_v60 = vunpack.i.l.bf16 %v2316_v46 }
 0x29b   :  { %1572 = vst.msk [vmem:[#allocation3 + $0x4] sm:$0xc] %vm1478_vm3, %v1570_v63  ;;  %v1753_v29 = vsel %vm319_vm2, %v3372_v24, %v2318_v62  ;;  %v1752_v51 = vsel %vm319_vm2, %v3355_v56, %v2317_v60  ;;  %v2366_v57 = vpop.permute.xlu1 %2365  ;;  %v1405_v63 = vsel %vm1227_vm12, %v1404_v30, %v2307_v19 }
 0x29c   :  { %v1755_v42 = vsel %vm323_vm5, %v1753_v29, %v2298_v49  ;;  %v1754_v8 = vsel %vm323_vm5, %v1752_v51, %v2298_v49  ;;  %v2331_v37 = vpop.permute.xlu0 %2330  ;;  %v2368_v48 = vunpack.i.h.bf16 %v2366_v57  ;;  %v2367_v47 = vunpack.i.l.bf16 %v2366_v57 }
 0x29d   :  { %v1757_v7 = vsel %vm327_vm7, %v1755_v42, %v2303_v61  ;;  %v1756_v18 = vsel %vm327_vm7, %v1754_v8, %v2303_v61  ;;  %v2333_v59 = vunpack.i.h.bf16 %v2331_v37  ;;  %v2332_v23 = vunpack.i.l.bf16 %v2331_v37 }
 0x29e   :  { %v1758_v24 = vsel %vm331_vm9, %v1756_v18, %v2362_v33  ;;  %v1759_v56 = vsel %vm331_vm9, %v1757_v7, %v2363_v38  ;;  %v1712_v62 = vsel %vm1229_vm13, %v1711_v44, %v2368_v48  ;;  %v1406_v28 = vsel %vm1229_vm13, %v1405_v63, %v2367_v47 }
 0x29f   :  { %v1760_v20 = vsel %vm1225_vm11, %v1758_v24, %v2293_v21  ;;  %v1761_v3 = vsel %vm1225_vm11, %v1759_v56, %v2342_v53  ;;  %v1662_v0 = vsel %vm1227_vm12, %v1661_v27, %v2333_v59  ;;  %v1615_v40 = vsel %vm1227_vm12, %v1614_v43, %v2332_v23 }
 0x2a0   :  { %v1762_v9 = vsel %vm1227_vm12, %v1760_v20, %v2348_v41  ;;  %v1763_v32 = vsel %vm1227_vm12, %v1761_v3, %v2348_v41  ;;  %v2336_v39 = vpop.permute.xlu0 %2335 }
 0x2a1   :  { %v1764_v12 = vsel %vm1229_vm13, %v1762_v9, %v2353_v14  ;;  %v1765_v15 = vsel %vm1229_vm13, %v1763_v32, %v2353_v14  ;;  %v2338_v4 = vunpack.i.h.bf16 %v2336_v39  ;;  %v2337_v6 = vunpack.i.l.bf16 %v2336_v39 }
 0x2a2   :  { %v1766_v22 = vsel %vm1231_vm14, %v1764_v12, %v2358_v50  ;;  %v1767_v31 = vsel %vm1231_vm14, %v1765_v15, %v2358_v50 }
 0x2a3   :  { %v1924_v34 = vpack.c.bf16 %v1766_v22, %v1766_v22  ;;  %v1925_v21 = vpack.c.bf16 %v1767_v31, %v1767_v31  ;;  %v1616_v52 = vsel %vm1229_vm13, %v1615_v40, %v2337_v6  ;;  %v1663_v55 = vsel %vm1229_vm13, %v1662_v0, %v2338_v4 }
 0x2a4   :  { %v1617_v58 = vsel %vm1231_vm14, %v1616_v52, %v2312_v10  ;;  %v1664_v11 = vsel %vm1231_vm14, %v1663_v55, %v2313_v2  ;;  %v2371_v13 = vpop.permute.xlu0 %2370 }
 0x2a5   :  { %v1904_v49 = vrot.slane %v1924_v34, 9  ;;  %v1776_v54 = vrot.slane %v1925_v21, 5  ;;  %v1922_v46 = vpack.c.bf16 %v1617_v58, %v1617_v58  ;;  %v1923_v53 = vpack.c.bf16 %v1664_v11, %v1664_v11  ;;  %v1277_v34 = vld [vmem:[%s3788_s11] sm:$0x1] }
 0x2a6   :  { %v2373_v60 = vunpack.i.h.bf16 %v2371_v13  ;;  %v2372_v41 = vunpack.i.l.bf16 %v2371_v13 }
 0x2a7   :  { %v1777_v36 = vsel %vm3606_vm0, %v1904_v49, %v1776_v54  ;;  %v1900_v45 = vrot.slane %v1922_v46, 10  ;;  %v1669_v25 = vrot.slane %v1923_v53, 7 }
 0x2a8   :  { %1779 = vst.msk [vmem:[#allocation3 + $0xc] sm:$0xc] %vm1478_vm3, %v1777_v36  ;;  %v1407_v61 = vsel %vm1231_vm14, %v1406_v28, %v2372_v41  ;;  %v1713_v27 = vsel %vm1231_vm14, %v1712_v62, %v2373_v60 }
 0x2a9   :  { %1625 = vst.msk [vmem:[#allocation3 + $0x8] sm:$0x3] %vm1409_vm1, %v1900_v45  ;;  %v1408_v43 = vpack.c.bf16 %v1407_v61, %v1407_v61  ;;  %v1714_v14 = vpack.c.bf16 %v1713_v27, %v1713_v27 }
 0x2aa   :  { %1671 = vst.msk [vmem:[#allocation3 + $0x8] sm:$0xc] %vm1478_vm3, %v1669_v25 }
 0x2ab   :  { %1410 = vst.msk [vmem:[#allocation3] sm:$0x3] %vm1409_vm1, %v1408_v43  ;;  %1715 = vst.msk [vmem:[#allocation3 + $0xc] sm:$0x3] %vm1409_vm1, %v1714_v14 }
 0x2b2   :  { %v2379_v31 = vld [vmem:[#allocation3] sm:$0xff]   ;;  %v2380_v40 = vld [vmem:[#allocation3 + $0x8] sm:$0xff]  }
 0x2bc   :  { %v1204_v17 = vpop.permute.xlu0 %1203  ;;  %v1198_v26 = vpop.permute.xlu1 %1197 }
 0x2bd   :  { %v1221_v29 = vsel %vm319_vm2, %v3518_v16, %v1198_v26 }
 0x2c0   :  { %v1207_v51 = vpop.permute.xlu0 %1206  ;;  %v1201_v38 = vpop.permute.xlu1 %1200 }
 0x2c1   :  { %v1222_v33 = vsel %vm323_vm5, %v1221_v29, %v1201_v38 }
 0x2c2   :  { %v1223_v42 = vsel %vm327_vm7, %v1222_v33, %v1204_v17 }
 0x2c3   :  { %v1224_v19 = vsel %vm331_vm9, %v1223_v42, %v1207_v51 }
 0x2c4   :  { %v1213_v8 = vpop.permute.xlu1 %1212  ;;  %v1210_v37 = vpop.permute.xlu0 %1209 }
 0x2c5   :  { %v1226_v50 = vsel %vm1225_vm11, %v1224_v19, %v1210_v37 }
 0x2c6   :  { %v1228_v18 = vsel %vm1227_vm12, %v1226_v50, %v1213_v8 }
 0x2c8   :  { %v1216_v7 = vpop.permute.xlu1 %1215  ;;  %v1239_v57 = vpop.permute.xlu0 %1238 }
 0x2c9   :  { %v1230_v24 = vsel %vm1229_vm13, %v1228_v18, %v1216_v7  ;;  %v1262_v3 = vsel %vm319_vm2, %v3531_v1, %v1239_v57 }
 0x2cc   :  { %v1219_v56 = vpop.permute.xlu1 %1218  ;;  %v1248_v10 = vpop.permute.xlu0 %1247 }
 0x2cd   :  { %v1232_v16 = vsel %vm1231_vm14, %v1230_v24, %v1219_v56 }
 0x2ce   :  { %v1274_v59 = vrot.slane %v1232_v16, %v2980_v5 }
 0x2d0   :  { %v1275_v23 = vmul.f32 %v1274_v59, %v3538_v35  ;;  %v1242_v2 = vpop.permute.xlu1 %1241  ;;  %v1254_v47 = vpop.permute.xlu0 %1253 }
 0x2d1   :  { %v1263_v9 = vsel %vm323_vm5, %v1262_v3, %v1242_v2 }
 0x2d2   :  { %v1276_v20 = vpack.c.bf16 %v1275_v23, %v1275_v23 }
 0x2d4   :  { %1979 = vmatprep.subr.msk.bf16.mxu0 %vm1278_vm10, %v1276_v20  ;;  %v1245_v32 = vpop.permute.xlu1 %1244  ;;  %v1260_v6 = vpop.permute.xlu0 %1259  ;;  %v1807_v0 = vsel %vm1278_vm10, %v1276_v20, 0 }
 0x2d5   :  { %v1264_v48 = vsel %vm327_vm7, %v1263_v9, %v1245_v32 }
 0x2d6   :  { %v1265_v12 = vsel %vm331_vm9, %v1264_v48, %v1248_v10 }
 0x2d8   :  { %v1251_v39 = vpop.permute.xlu1 %1250 }
 0x2d9   :  { %v1266_v15 = vsel %vm1225_vm11, %v1265_v12, %v1251_v39 }
 0x2da   :  { %v1267_v4 = vsel %vm1227_vm12, %v1266_v15, %v1254_v47 }
 0x2dc   :  { %v1257_v35 = vpop.permute.xlu1 %1256 }
 0x2dd   :  { %v1268_v22 = vsel %vm1229_vm13, %v1267_v4, %v1257_v35 }
 0x2de   :  { %v1269_v1 = vsel %vm1231_vm14, %v1268_v22, %v1260_v6 }
 0x2df   :  { %1969 = vmatmul.mubr.msk.f32.vlgmr.msra.gmra.mxu0 %vm1278_vm10, %v1269_v1 }
 0x2e0   :  { %1972 = vmatpush3.bf16.xpose.msra.mxu0 %v1807_v0  ;;  %1973 = vmatprep.mubr.msk.bf16.mxu0 %vm1278_vm10, %v2379_v31 }
 0x2e7   :  { %1974 = vmatmul.mubr.msk.bf16.vlgmr.msra.gmra.mxu0 %vm1278_vm10, %v2380_v40 }
 0x39f   :  { %v1351_v21 = vpop.f32.mrf.mxu0 }
 0x3a0   :  { %v1355_v55 = vadd.f32 %v1351_v21, %v1277_v34 }
 0x3a1   :  { %v1970_v52 = vpop.f32.mrf.mxu0 }
 0x3a2   :  { %v1788_v30 = vrot.slane %v1355_v55, %v2980_v5 }
 0x3a7   :  { %v1975_v44 = vpop.f32.mrf.mxu0 }
 0x3a8   :  { %v1852_v58 = vadd.f32 %v1975_v44, %v1788_v30 }
 0x3a9   :  { %v1843_v11 = vpop.f32.mrf.mxu0 }
 0x3aa   :  { %v1860_v13 = vmax.f32 %v1852_v58, 0.0  ;;  %v1844_v49 = vadd.f32 %v1843_v11, %v1788_v30 }
 0x3ab   :  { %v1976_v54 = vpop.f32.mrf.mxu0 }
 0x3ac   :  { %1864 = vst.msk [vmem:[%s3789_s12 + $0x10] sm:$0xff] %vm319_vm2, %v1860_v13  ;;  %v1858_v46 = vmax.f32 %v1844_v49, 0.0  ;;  %v1855_v53 = vadd.f32 %v1976_v54, %v1788_v30 }
 0x3ad   :  { %v1846_v63 = vpop.f32.mrf.mxu0 }
 0x3ae   :  { %1862 = vst.msk [vmem:[%s3789_s12] sm:$0xff] %vm319_vm2, %v1858_v46  ;;  %v1861_v5 = vmax.f32 %v1855_v53, 0.0  ;;  %v1847_v62 = vadd.f32 %v1846_v63, %v1788_v30 }
 0x3b0   :  { %1865 = vst.msk [vmem:[%s3789_s12 + $0x18] sm:$0xff] %vm319_vm2, %v1861_v5  ;;  %v1859_v60 = vmax.f32 %v1847_v62, 0.0 }
 0x3b2   :  { %1863 = vst.msk [vmem:[%s3789_s12 + $0x8] sm:$0xff] %vm319_vm2, %v1859_v60 }

</bundles_post_ra>
